<compile_context>
chip_gen: v7x
topology: tpu7x:2x2x1
jax: 0.10.0
libtpu: 0.0.40
codegen_flags: <defaults>
</compile_context>

<pallas_src>
import functools

import jax
import jax.numpy as jnp
from jax.experimental import pallas as pl
from jax.experimental.pallas import tpu as pltpu


# -----------------------------------------------------------------------------
# Small helpers
# -----------------------------------------------------------------------------
def _round_up(x, m):
    return (x + m - 1) // m * m


def _pick_b_block(bp, max_blk=128):
    """Largest multiple-of-8 divisor of bp that is <= max_blk (>= 8)."""
    best = 8
    for cand in range(8, min(bp, max_blk) + 1, 8):
        if bp % cand == 0:
            best = cand
    return best


def _place_gates(w, out_rows, H, Hp):
    """(rows, 3H) -> (out_rows, 3Hp): gate k placed at column k*Hp, zero pad.

    Keeps each gate slice starting on a 128-lane boundary after padding.
    """
    rows = w.shape[0]
    out = jnp.zeros((out_rows, 3 * Hp), w.dtype)
    for k in range(3):
        out = out.at[:rows, k * Hp:k * Hp + H].set(w[:, k * H:(k + 1) * H])
    return out


# -----------------------------------------------------------------------------
# Fused recurrent kernel.
#   grid = (n_b, n_t): batch blocks ("parallel") x time blocks ("arbitrary").
#   Per grid step:
#     * compute gi for the whole time block (one big bf16 matmul, f32 acc),
#     * advance the hidden state t_blk times (unrolled fori_loop, h carried in
#       a VMEM scratch, only the recurrent matmul on the serial path),
#     * on the last time block: one backward GRU step on x[T-1] (that is all
#       rnn_output[-1]'s backward half depends on) + fused FC, writing only the
#       (b_blk, Cp) logits block.
# -----------------------------------------------------------------------------
def _gru_fused_kernel(emb_ref, w_ih_f_ref, b_ih_f_ref, w_hh_f_ref, b_hh_f_ref,
                      h0_f_ref, emb_last_ref, w_ih_b_ref, b_ih_b_ref,
                      w_hh_b_ref, b_hh_b_ref, h0_b_ref, fc_w_ref, fc_b_ref,
                      out_ref, h_scr, gi_scr, *, t_blk, t_total):
    b_blk, Hp = h_scr.shape
    Ep = emb_ref.shape[-1]
    t_idx = pl.program_id(1)

    @pl.when(t_idx == 0)
    def _():
        h_scr[...] = h0_f_ref[...]

    # ---- Block-level input projection (off the serial dependency chain) ----
    # One (t_blk*b_blk, Ep) x (Ep, 3Hp) bf16 matmul with f32 accumulation per
    # grid step; streaming bf16 emb instead of f32 gi removes the (T, B, 3Hp)
    # HBM round trip entirely.  gi stays f32 but only in VMEM (never HBM).
    gi = jnp.dot(emb_ref[...].reshape(t_blk * b_blk, Ep), w_ih_f_ref[...],
                 preferred_element_type=jnp.float32) + b_ih_f_ref[...]
    gi_scr[...] = gi.reshape(t_blk, b_blk, 3 * Hp)

    # Hoisted loads: reused across the unrolled time loop.
    w_hh_f = w_hh_f_ref[...]            # (Hp, 3Hp) bf16
    b_hh_f = b_hh_f_ref[...]            # (1, 3Hp) f32

    def gru_cell(gi_t, gh, h_prev):
        # Gate slices are 128-lane aligned (Hp is a multiple of 128).
        r = jax.nn.sigmoid(gi_t[:, 0:Hp] + gh[:, 0:Hp])
        z = jax.nn.sigmoid(gi_t[:, Hp:2 * Hp] + gh[:, Hp:2 * Hp])
        n = jnp.tanh(gi_t[:, 2 * Hp:3 * Hp] + r * gh[:, 2 * Hp:3 * Hp])
        return n + z * (h_prev - n)     # == (1-z)*n + z*h, one fewer VPU op

    t_base = t_idx * t_blk
    needs_guard = (t_total % t_blk) != 0   # static: only padded steps masked

    def step(i, h):
        # Only this (b_blk, Hp) x (Hp, 3Hp) matmul stays on the serial path.
        gh = jnp.dot(h.astype(w_hh_f.dtype), w_hh_f,
                     preferred_element_type=jnp.float32) + b_hh_f
        h_new = gru_cell(gi_scr[i], gh, h)
        if needs_guard:
            h_new = jnp.where(t_base + i < t_total, h_new, h)
        return h_new

    h_f = jax.lax.fori_loop(0, t_blk, step, h_scr[...], unroll=True)
    h_scr[...] = h_f

    @pl.when(t_idx == pl.num_programs(1) - 1)
    def _():
        # Backward half of rnn_output[-1] is exactly one GRU step on x[T-1]
        # starting from h0_b (PyTorch bidirectional output semantics).
        h0_b = h0_b_ref[...]
        w_hh_b = w_hh_b_ref[...]
        gi_b = jnp.dot(emb_last_ref[...], w_ih_b_ref[...],
                       preferred_element_type=jnp.float32) + b_ih_b_ref[...]
        gh_b = jnp.dot(h0_b.astype(w_hh_b.dtype), w_hh_b,
                       preferred_element_type=jnp.float32) + b_hh_b_ref[...]
        h_b = gru_cell(gi_b, gh_b, h0_b)

        # Fused FC on per-direction halves of fc_w (no in-kernel concat);
        # the (b_blk, Cp) lane-dense store is the kernel's only HBM writeback.
        fc_w_f = fc_w_ref[0:Hp, :]
        fc_w_b = fc_w_ref[Hp:2 * Hp, :]
        logits = (jnp.dot(h_f.astype(fc_w_f.dtype), fc_w_f,
                          preferred_element_type=jnp.float32)
                  + jnp.dot(h_b.astype(fc_w_b.dtype), fc_w_b,
                            preferred_element_type=jnp.float32)
                  + fc_b_ref[...])
        out_ref[...] = logits


def gru_bidir_fc(emb, emb_last, h0_f, h0_b, pp, *, t_blk, b_blk, t_total):
    T_pad, Bp, Ep = emb.shape
    Hp = h0_f.shape[-1]
    G = 3 * Hp
    Cp = pp["fc_w"].shape[1]
    n_t = T_pad // t_blk
    n_b = Bp // b_blk

    kernel = functools.partial(_gru_fused_kernel, t_blk=t_blk, t_total=t_total)

    def make_call(single_buffer_weights):
        # Grid-invariant weights/biases/fc: single-buffer to halve their VMEM
        # footprint (matters at Hp~1024 on v7x's 64 MiB VMEM). Streamed emb and
        # the small per-batch-block inputs keep default double buffering.
        if single_buffer_weights:
            def inv(shape):
                return pl.BlockSpec(shape, lambda b, t: (0, 0),
                                    pipeline_mode=pl.Buffered(buffer_count=1))
        else:
            def inv(shape):
                return pl.BlockSpec(shape, lambda b, t: (0, 0))

        def per_batch(shape):
            return pl.BlockSpec(shape, lambda b, t: (b, 0))

        # NOTE: at production sizes, budget (t_blk*b_blk*3Hp f32) gi scratch +
        # double-buffered emb blocks against VMEM and set
        # CompilerParams(vmem_limit_bytes=...) per generation (64 MiB on v7x).
        return pl.pallas_call(
            kernel,
            out_shape=jax.ShapeDtypeStruct((Bp, Cp), jnp.float32),
            grid_spec=pltpu.PrefetchScalarGridSpec(
                num_scalar_prefetch=0,
                grid=(n_b, n_t),
                in_specs=[
                    pl.BlockSpec((t_blk, b_blk, Ep), lambda b, t: (t, b, 0)),  # emb (streamed)
                    inv((Ep, G)),            # W_ih forward
                    inv((1, G)),             # b_ih forward
                    inv((Hp, G)),            # W_hh forward
                    inv((1, G)),             # b_hh forward
                    per_batch((b_blk, Hp)),  # h0 forward
                    per_batch((b_blk, Ep)),  # emb[T-1]
                    inv((Ep, G)),            # W_ih backward
                    inv((1, G)),             # b_ih backward
                    inv((Hp, G)),            # W_hh backward
                    inv((1, G)),             # b_hh backward
                    per_batch((b_blk, Hp)),  # h0 backward
                    inv((2 * Hp, Cp)),       # fc_w
                    inv((1, Cp)),            # fc_b
                ],
                out_specs=pl.BlockSpec((b_blk, Cp), lambda b, t: (b, 0)),
                scratch_shapes=[
                    pltpu.VMEM((b_blk, Hp), jnp.float32),          # carried h
                    pltpu.VMEM((t_blk, b_blk, G), jnp.float32),    # block gi
                ],
            ),
            compiler_params=pltpu.CompilerParams(
                # batch axis parallel (v7x 2-TC sharding), time axis serial.
                dimension_semantics=("parallel", "arbitrary")),
        )

    args = (emb, pp["w_ih_f"], pp["b_ih_f"], pp["w_hh_f"], pp["b_hh_f"], h0_f,
            emb_last, pp["w_ih_b"], pp["b_ih_b"], pp["w_hh_b"], pp["b_hh_b"],
            h0_b, pp["fc_w"], pp["fc_b"])
    try:
        return make_call(True)(*args)
    except Exception:
        # pipeline_mode=pl.Buffered(1) not supported by this jax/libtpu build:
        # fall back to default double buffering (correctness unaffected).
        return make_call(False)(*args)


# -----------------------------------------------------------------------------
# Parameter preparation: pad to TPU-friendly sizes + bf16 weights.
# -----------------------------------------------------------------------------
def prepare_params(params, nemb, nhid, nclass):
    Ep = _round_up(nemb, 128)
    Hp = _round_up(nhid, 128)
    Cp = _round_up(nclass, 128)
    V = params["emb"].shape[0]
    bf16 = jnp.bfloat16

    emb_p = jnp.zeros((V, Ep), jnp.float32).at[:, :nemb].set(params["emb"])

    fc_w_p = jnp.zeros((2 * Hp, Cp), jnp.float32)
    fc_w_p = fc_w_p.at[:nhid, :nclass].set(params["fc_w"][:nhid])
    fc_w_p = fc_w_p.at[Hp:Hp + nhid, :nclass].set(params["fc_w"][nhid:])
    fc_b_p = jnp.zeros((1, Cp), jnp.float32).at[:, :nclass].set(params["fc_b"])

    return {
        "emb":    emb_p.astype(bf16),
        "w_ih_f": _place_gates(params["w_ih_f"], Ep, nhid, Hp).astype(bf16),
        "w_hh_f": _place_gates(params["w_hh_f"], Hp, nhid, Hp).astype(bf16),
        "b_ih_f": _place_gates(params["b_ih_f"], 1, nhid, Hp),
        "b_hh_f": _place_gates(params["b_hh_f"], 1, nhid, Hp),
        "w_ih_b": _place_gates(params["w_ih_b"], Ep, nhid, Hp).astype(bf16),
        "w_hh_b": _place_gates(params["w_hh_b"], Hp, nhid, Hp).astype(bf16),
        "b_ih_b": _place_gates(params["b_ih_b"], 1, nhid, Hp),
        "b_hh_b": _place_gates(params["b_hh_b"], 1, nhid, Hp),
        "fc_w":   fc_w_p.astype(bf16),
        "fc_b":   fc_b_p,
        "Ep": Ep, "Hp": Hp, "Cp": Cp,
    }


# -----------------------------------------------------------------------------
# Full forward pass (matches RNN.forward: emb -> dropout -> biGRU -> out[-1]
# -> dropout -> fc).
# -----------------------------------------------------------------------------
def rnn_forward(pp, x_ids, hidden_state, *, nhid, nclass,
                max_t_blk=32, max_b_blk=128):
    T, B = x_ids.shape
    Ep, Hp, Cp = pp["Ep"], pp["Hp"], pp["Cp"]
    # Throughput note: the serial-path MXU fill equals the batch; pack multiple
    # sequences so effective B >= 128 at production (pads here are correctness
    # padding only, rows B..Bp are sliced away).
    Bp = _round_up(B, 8)

    x_p = jnp.zeros((T, Bp), x_ids.dtype).at[:, :B].set(x_ids)
    h0 = jnp.zeros((2, Bp, Hp), jnp.float32).at[:, :B, :nhid].set(hidden_state)

    # Embedding lookup (gather glue); dropout1/dropout2 are identity (inference).
    # TODO(synk): for large vocab/E, fuse this gather into the recurrent kernel
    # via scalar-prefetched token ids + per-row DMA instead of jnp.take.
    emb = jnp.take(pp["emb"], x_p, axis=0)                 # (T, Bp, Ep) bf16

    # Divisibility-free time blocking: pad T to a multiple of t_blk; padded
    # steps are masked inside the kernel.
    t_blk = min(max_t_blk, T)
    n_t = (T + t_blk - 1) // t_blk
    T_pad = n_t * t_blk
    if T_pad != T:
        emb_in = jnp.zeros((T_pad, Bp, Ep), emb.dtype).at[:T].set(emb)
    else:
        emb_in = emb
    emb_last = emb[T - 1]                                  # (Bp, Ep) bf16

    b_blk = _pick_b_block(Bp, max_b_blk)

    logits_p = gru_bidir_fc(emb_in, emb_last, h0[0], h0[1], pp,
                            t_blk=t_blk, b_blk=b_blk, t_total=T)
    return logits_p[:B, :nclass]


# -----------------------------------------------------------------------------
# Pure-JAX f32 reference (full bidirectional GRU, for correctness check).
# -----------------------------------------------------------------------------
def gru_dir_ref(x_emb, w_ih, w_hh, b_ih, b_hh, h0, reverse):
    T = x_emb.shape[0]
    H = h0.shape[-1]
    order = range(T - 1, -1, -1) if reverse else range(T)
    outs = [None] * T
    h = h0
    for t in order:
        gi = x_emb[t] @ w_ih + b_ih
        gh = h @ w_hh + b_hh
        r = jax.nn.sigmoid(gi[:, :H] + gh[:, :H])
        z = jax.nn.sigmoid(gi[:, H:2 * H] + gh[:, H:2 * H])
        n = jnp.tanh(gi[:, 2 * H:] + r * gh[:, 2 * H:])
        h = (1.0 - z) * n + z * h
        outs[t] = h
    return jnp.stack(outs, axis=0)


def rnn_forward_ref(params, x_ids, hidden_state):
    emb = jnp.take(params["emb"], x_ids, axis=0)
    out_f = gru_dir_ref(emb, params["w_ih_f"], params["w_hh_f"],
                        params["b_ih_f"], params["b_hh_f"], hidden_state[0], False)
    out_b = gru_dir_ref(emb, params["w_ih_b"], params["w_hh_b"],
                        params["b_ih_b"], params["b_hh_b"], hidden_state[1], True)
    last = jnp.concatenate([out_f, out_b], axis=-1)[-1]
    return last @ params["fc_w"] + params["fc_b"]


# -----------------------------------------------------------------------------
# Deterministic parameter init (shapes from the PyTorch module's __init__;
# GRU weights stored transposed: (in, 3H) / (H, 3H), gate order [r, z, n]).
# -----------------------------------------------------------------------------
def init_params(key, vocab_size, nemb, nhid, nclass):
    ks = jax.random.split(key, 12)
    s = 1.0 / jnp.sqrt(nhid)
    sf = 1.0 / jnp.sqrt(2 * nhid)
    u = lambda k, shape, scale: jax.random.uniform(k, shape, jnp.float32, -scale, scale)
    return {
        "emb":    jax.random.normal(ks[0], (vocab_size, nemb), jnp.float32),
        "w_ih_f": u(ks[1], (nemb, 3 * nhid), s),
        "w_hh_f": u(ks[2], (nhid, 3 * nhid), s),
        "b_ih_f": u(ks[3], (1, 3 * nhid), s),
        "b_hh_f": u(ks[4], (1, 3 * nhid), s),
        "w_ih_b": u(ks[5], (nemb, 3 * nhid), s),
        "w_hh_b": u(ks[6], (nhid, 3 * nhid), s),
        "b_ih_b": u(ks[7], (1, 3 * nhid), s),
        "b_hh_b": u(ks[8], (1, 3 * nhid), s),
        "fc_w":   u(ks[9], (2 * nhid, nclass), sf),
        "fc_b":   u(ks[10], (1, nclass), sf),
    }


if __name__ == "__main__":
    vocab_size, nemb, nhid, nclass = 100, 16, 32, 4
    T, B = 8, 2

    key = jax.random.PRNGKey(0)
    kp, kx = jax.random.split(key)
    params = init_params(kp, vocab_size, nemb, nhid, nclass)
    pp = prepare_params(params, nemb, nhid, nclass)

    x_ids = jax.random.randint(kx, (T, B), 0, vocab_size, dtype=jnp.int32)
    hidden_state = jnp.zeros((2, B, nhid), jnp.float32)   # init_hiddens(B)

    logits = jax.block_until_ready(
        rnn_forward(pp, x_ids, hidden_state, nhid=nhid, nclass=nclass))
    ref = jax.block_until_ready(rnn_forward_ref(params, x_ids, hidden_state))

    assert logits.shape == (B, nclass)
    assert jnp.allclose(logits, ref, rtol=2e-2, atol=2e-2), (logits, ref)
    print("KERNEL_OK")
</pallas_src>

<mosaic_0001>
module attributes {stable_mosaic.version = 11 : i64} {
  func.func @_gru_fused_kernel(%arg0: i32, %arg1: i32, %arg2: memref<8x8x128xbf16, #tpu.memory_space<vmem>>, %arg3: memref<128x384xbf16, #tpu.memory_space<vmem>>, %arg4: memref<1x384xf32, #tpu.memory_space<vmem>>, %arg5: memref<128x384xbf16, #tpu.memory_space<vmem>>, %arg6: memref<1x384xf32, #tpu.memory_space<vmem>>, %arg7: memref<8x128xf32, #tpu.memory_space<vmem>>, %arg8: memref<8x128xbf16, #tpu.memory_space<vmem>>, %arg9: memref<128x384xbf16, #tpu.memory_space<vmem>>, %arg10: memref<1x384xf32, #tpu.memory_space<vmem>>, %arg11: memref<128x384xbf16, #tpu.memory_space<vmem>>, %arg12: memref<1x384xf32, #tpu.memory_space<vmem>>, %arg13: memref<8x128xf32, #tpu.memory_space<vmem>>, %arg14: memref<256x128xbf16, #tpu.memory_space<vmem>>, %arg15: memref<1x128xf32, #tpu.memory_space<vmem>>, %arg16: memref<8x128xf32, #tpu.memory_space<vmem>>, %arg17: memref<8x128xf32, #tpu.memory_space<vmem>>, %arg18: memref<8x8x384xf32, #tpu.memory_space<vmem>>) attributes {dimension_semantics = [#tpu.dimension_semantics<parallel>, #tpu.dimension_semantics<arbitrary>], iteration_bounds = array<i64: 1, 1>, scalar_prefetch = 0 : i64, scratch_operands = 2 : i64, tpu.core_type = #tpu.core_type<tc>, window_params = [{transform_indices = @transform_0, window_bounds = array<i64: 8, 8, 128>}, {pipeline_mode = #tpu.pipeline_mode<synchronous>, transform_indices = @transform_1, window_bounds = array<i64: 128, 384>}, {pipeline_mode = #tpu.pipeline_mode<synchronous>, transform_indices = @transform_2, window_bounds = array<i64: 1, 384>}, {pipeline_mode = #tpu.pipeline_mode<synchronous>, transform_indices = @transform_3, window_bounds = array<i64: 128, 384>}, {pipeline_mode = #tpu.pipeline_mode<synchronous>, transform_indices = @transform_4, window_bounds = array<i64: 1, 384>}, {transform_indices = @transform_5, window_bounds = array<i64: 8, 128>}, {transform_indices = @transform_6, window_bounds = array<i64: 8, 128>}, {pipeline_mode = #tpu.pipeline_mode<synchronous>, transform_indices = @transform_7, window_bounds = array<i64: 128, 384>}, {pipeline_mode = #tpu.pipeline_mode<synchronous>, transform_indices = @transform_8, window_bounds = array<i64: 1, 384>}, {pipeline_mode = #tpu.pipeline_mode<synchronous>, transform_indices = @transform_9, window_bounds = array<i64: 128, 384>}, {pipeline_mode = #tpu.pipeline_mode<synchronous>, transform_indices = @transform_10, window_bounds = array<i64: 1, 384>}, {transform_indices = @transform_11, window_bounds = array<i64: 8, 128>}, {pipeline_mode = #tpu.pipeline_mode<synchronous>, transform_indices = @transform_12, window_bounds = array<i64: 256, 128>}, {pipeline_mode = #tpu.pipeline_mode<synchronous>, transform_indices = @transform_13, window_bounds = array<i64: 1, 128>}, {transform_indices = @transform_14, window_bounds = array<i64: 8, 128>}]} {
    %c0_i32 = arith.constant 0 : i32
    %0 = arith.cmpi eq, %arg1, %c0_i32 : i32
    %1 = arith.extui %0 : i1 to i32
    %c0_i32_0 = arith.constant 0 : i32
    %2 = arith.cmpi ne, %1, %c0_i32_0 : i32
    scf.if %2 {
      %c0_61 = arith.constant 0 : index
      %c0_62 = arith.constant 0 : index
      %267 = vector.load %arg7[%c0_61, %c0_62] : memref<8x128xf32, #tpu.memory_space<vmem>>, vector<8x128xf32>
      %c0_63 = arith.constant 0 : index
      %c0_64 = arith.constant 0 : index
      %268 = vector.load %arg17[%c0_63, %c0_64] : memref<8x128xf32, #tpu.memory_space<vmem>>, vector<8x128xf32>
      tpu.vector_store %arg17[%c0_63, %c0_64], %267 {strides = array<i32>} : memref<8x128xf32, #tpu.memory_space<vmem>>, vector<8x128xf32>,
    } else {
    }
    %c0 = arith.constant 0 : index
    %c0_1 = arith.constant 0 : index
    %c0_2 = arith.constant 0 : index
    %3 = vector.load %arg2[%c0, %c0_1, %c0_2] : memref<8x8x128xbf16, #tpu.memory_space<vmem>>, vector<8x8x128xbf16>
    %4 = vector.shape_cast %3 : vector<8x8x128xbf16> to vector<64x128xbf16>
    %c0_3 = arith.constant 0 : index
    %c0_4 = arith.constant 0 : index
    %5 = vector.load %arg3[%c0_3, %c0_4] : memref<128x384xbf16, #tpu.memory_space<vmem>>, vector<128x384xbf16>
    %cst = arith.constant dense<0.000000e+00> : vector<64x384xf32>
    %6 = tpu.matmul %4, %5, %cst {dimension_numbers = #tpu.dot_dimension_numbers<[1], [0], [0], [1], [0, 0, 1, 1], [], []>} : vector<64x128xbf16>, vector<128x384xbf16>, vector<64x384xf32> -> vector<64x384xf32>
    %c0_5 = arith.constant 0 : index
    %c0_6 = arith.constant 0 : index
    %7 = vector.load %arg4[%c0_5, %c0_6] : memref<1x384xf32, #tpu.memory_space<vmem>>, vector<1x384xf32>
    %8 = vector.broadcast %7 : vector<1x384xf32> to vector<64x384xf32>
    %9 = arith.addf %6, %8 : vector<64x384xf32>
    %10 = vector.shape_cast %9 : vector<64x384xf32> to vector<8x8x384xf32>
    %c0_7 = arith.constant 0 : index
    %c0_8 = arith.constant 0 : index
    %c0_9 = arith.constant 0 : index
    %11 = vector.load %arg18[%c0_7, %c0_8, %c0_9] : memref<8x8x384xf32, #tpu.memory_space<vmem>>, vector<8x8x384xf32>
    tpu.vector_store %arg18[%c0_7, %c0_8, %c0_9], %10 {strides = array<i32>} : memref<8x8x384xf32, #tpu.memory_space<vmem>>, vector<8x8x384xf32>,
    %c0_10 = arith.constant 0 : index
    %c0_11 = arith.constant 0 : index
    %12 = vector.load %arg5[%c0_10, %c0_11] : memref<128x384xbf16, #tpu.memory_space<vmem>>, vector<128x384xbf16>
    %c0_12 = arith.constant 0 : index
    %c0_13 = arith.constant 0 : index
    %13 = vector.load %arg6[%c0_12, %c0_13] : memref<1x384xf32, #tpu.memory_space<vmem>>, vector<1x384xf32>
    %c0_14 = arith.constant 0 : index
    %c0_15 = arith.constant 0 : index
    %14 = vector.load %arg17[%c0_14, %c0_15] : memref<8x128xf32, #tpu.memory_space<vmem>>, vector<8x128xf32>
    %c0_i32_16 = arith.constant 0 : i32
    %15 = arith.truncf %14 : vector<8x128xf32> to vector<8x128xbf16>
    %cst_17 = arith.constant dense<0.000000e+00> : vector<8x384xf32>
    %16 = tpu.matmul %15, %12, %cst_17 {dimension_numbers = #tpu.dot_dimension_numbers<[1], [0], [0], [1], [0, 0, 1, 1], [], []>} : vector<8x128xbf16>, vector<128x384xbf16>, vector<8x384xf32> -> vector<8x384xf32>
    %17 = vector.broadcast %13 : vector<1x384xf32> to vector<8x384xf32>
    %18 = arith.addf %16, %17 : vector<8x384xf32>
    %19 = arith.index_cast %c0_i32_16 : i32 to index
    %c0_18 = arith.constant 0 : index
    %c0_19 = arith.constant 0 : index
    %20 = vector.load %arg18[%19, %c0_18, %c0_19] : memref<8x8x384xf32, #tpu.memory_space<vmem>>, vector<1x8x384xf32>
    %21 = vector.shape_cast %20 : vector<1x8x384xf32> to vector<8x384xf32>
    %22 = vector.extract_strided_slice %21 {offsets = [0, 0], sizes = [8, 128], strides = [1, 1]} : vector<8x384xf32> to vector<8x128xf32>
    %23 = vector.extract_strided_slice %18 {offsets = [0, 0], sizes = [8, 128], strides = [1, 1]} : vector<8x384xf32> to vector<8x128xf32>
    %24 = arith.addf %22, %23 : vector<8x128xf32>
    %25 = arith.negf %24 : vector<8x128xf32>
    %26 = math.exp %25 : vector<8x128xf32>
    %cst_20 = arith.constant 1.000000e+00 : f32
    %27 = vector.broadcast %cst_20 : f32 to vector<8x128xf32>
    %28 = arith.addf %27, %26 : vector<8x128xf32>
    %29 = arith.divf %27, %28 : vector<8x128xf32>
    %30 = vector.extract_strided_slice %21 {offsets = [0, 128], sizes = [8, 128], strides = [1, 1]} : vector<8x384xf32> to vector<8x128xf32>
    %31 = vector.extract_strided_slice %18 {offsets = [0, 128], sizes = [8, 128], strides = [1, 1]} : vector<8x384xf32> to vector<8x128xf32>
    %32 = arith.addf %30, %31 : vector<8x128xf32>
    %33 = arith.negf %32 : vector<8x128xf32>
    %34 = math.exp %33 : vector<8x128xf32>
    %cst_21 = arith.constant 1.000000e+00 : f32
    %35 = vector.broadcast %cst_21 : f32 to vector<8x128xf32>
    %36 = arith.addf %35, %34 : vector<8x128xf32>
    %37 = arith.divf %35, %36 : vector<8x128xf32>
    %38 = vector.extract_strided_slice %21 {offsets = [0, 256], sizes = [8, 128], strides = [1, 1]} : vector<8x384xf32> to vector<8x128xf32>
    %39 = vector.extract_strided_slice %18 {offsets = [0, 256], sizes = [8, 128], strides = [1, 1]} : vector<8x384xf32> to vector<8x128xf32>
    %40 = arith.mulf %29, %39 : vector<8x128xf32>
    %41 = arith.addf %38, %40 : vector<8x128xf32>
    %42 = math.tanh %41 : vector<8x128xf32>
    %43 = arith.subf %14, %42 : vector<8x128xf32>
    %44 = arith.mulf %37, %43 : vector<8x128xf32>
    %45 = arith.addf %42, %44 : vector<8x128xf32>
    %c1_i32 = arith.constant 1 : i32
    %46 = arith.truncf %45 : vector<8x128xf32> to vector<8x128xbf16>
    %cst_22 = arith.constant dense<0.000000e+00> : vector<8x384xf32>
    %47 = tpu.matmul %46, %12, %cst_22 {dimension_numbers = #tpu.dot_dimension_numbers<[1], [0], [0], [1], [0, 0, 1, 1], [], []>} : vector<8x128xbf16>, vector<128x384xbf16>, vector<8x384xf32> -> vector<8x384xf32>
    %48 = vector.broadcast %13 : vector<1x384xf32> to vector<8x384xf32>
    %49 = arith.addf %47, %48 : vector<8x384xf32>
    %50 = arith.index_cast %c1_i32 : i32 to index
    %c0_23 = arith.constant 0 : index
    %c0_24 = arith.constant 0 : index
    %51 = vector.load %arg18[%50, %c0_23, %c0_24] : memref<8x8x384xf32, #tpu.memory_space<vmem>>, vector<1x8x384xf32>
    %52 = vector.shape_cast %51 : vector<1x8x384xf32> to vector<8x384xf32>
    %53 = vector.extract_strided_slice %52 {offsets = [0, 0], sizes = [8, 128], strides = [1, 1]} : vector<8x384xf32> to vector<8x128xf32>
    %54 = vector.extract_strided_slice %49 {offsets = [0, 0], sizes = [8, 128], strides = [1, 1]} : vector<8x384xf32> to vector<8x128xf32>
    %55 = arith.addf %53, %54 : vector<8x128xf32>
    %56 = arith.negf %55 : vector<8x128xf32>
    %57 = math.exp %56 : vector<8x128xf32>
    %cst_25 = arith.constant 1.000000e+00 : f32
    %58 = vector.broadcast %cst_25 : f32 to vector<8x128xf32>
    %59 = arith.addf %58, %57 : vector<8x128xf32>
    %60 = arith.divf %58, %59 : vector<8x128xf32>
    %61 = vector.extract_strided_slice %52 {offsets = [0, 128], sizes = [8, 128], strides = [1, 1]} : vector<8x384xf32> to vector<8x128xf32>
    %62 = vector.extract_strided_slice %49 {offsets = [0, 128], sizes = [8, 128], strides = [1, 1]} : vector<8x384xf32> to vector<8x128xf32>
    %63 = arith.addf %61, %62 : vector<8x128xf32>
    %64 = arith.negf %63 : vector<8x128xf32>
    %65 = math.exp %64 : vector<8x128xf32>
    %cst_26 = arith.constant 1.000000e+00 : f32
    %66 = vector.broadcast %cst_26 : f32 to vector<8x128xf32>
    %67 = arith.addf %66, %65 : vector<8x128xf32>
    %68 = arith.divf %66, %67 : vector<8x128xf32>
    %69 = vector.extract_strided_slice %52 {offsets = [0, 256], sizes = [8, 128], strides = [1, 1]} : vector<8x384xf32> to vector<8x128xf32>
    %70 = vector.extract_strided_slice %49 {offsets = [0, 256], sizes = [8, 128], strides = [1, 1]} : vector<8x384xf32> to vector<8x128xf32>
    %71 = arith.mulf %60, %70 : vector<8x128xf32>
    %72 = arith.addf %69, %71 : vector<8x128xf32>
    %73 = math.tanh %72 : vector<8x128xf32>
    %74 = arith.subf %45, %73 : vector<8x128xf32>
    %75 = arith.mulf %68, %74 : vector<8x128xf32>
    %76 = arith.addf %73, %75 : vector<8x128xf32>
    %c2_i32 = arith.constant 2 : i32
    %77 = arith.truncf %76 : vector<8x128xf32> to vector<8x128xbf16>
    %cst_27 = arith.constant dense<0.000000e+00> : vector<8x384xf32>
    %78 = tpu.matmul %77, %12, %cst_27 {dimension_numbers = #tpu.dot_dimension_numbers<[1], [0], [0], [1], [0, 0, 1, 1], [], []>} : vector<8x128xbf16>, vector<128x384xbf16>, vector<8x384xf32> -> vector<8x384xf32>
    %79 = vector.broadcast %13 : vector<1x384xf32> to vector<8x384xf32>
    %80 = arith.addf %78, %79 : vector<8x384xf32>
    %81 = arith.index_cast %c2_i32 : i32 to index
    %c0_28 = arith.constant 0 : index
    %c0_29 = arith.constant 0 : index
    %82 = vector.load %arg18[%81, %c0_28, %c0_29] : memref<8x8x384xf32, #tpu.memory_space<vmem>>, vector<1x8x384xf32>
    %83 = vector.shape_cast %82 : vector<1x8x384xf32> to vector<8x384xf32>
    %84 = vector.extract_strided_slice %83 {offsets = [0, 0], sizes = [8, 128], strides = [1, 1]} : vector<8x384xf32> to vector<8x128xf32>
    %85 = vector.extract_strided_slice %80 {offsets = [0, 0], sizes = [8, 128], strides = [1, 1]} : vector<8x384xf32> to vector<8x128xf32>
    %86 = arith.addf %84, %85 : vector<8x128xf32>
    %87 = arith.negf %86 : vector<8x128xf32>
    %88 = math.exp %87 : vector<8x128xf32>
    %cst_30 = arith.constant 1.000000e+00 : f32
    %89 = vector.broadcast %cst_30 : f32 to vector<8x128xf32>
    %90 = arith.addf %89, %88 : vector<8x128xf32>
    %91 = arith.divf %89, %90 : vector<8x128xf32>
    %92 = vector.extract_strided_slice %83 {offsets = [0, 128], sizes = [8, 128], strides = [1, 1]} : vector<8x384xf32> to vector<8x128xf32>
    %93 = vector.extract_strided_slice %80 {offsets = [0, 128], sizes = [8, 128], strides = [1, 1]} : vector<8x384xf32> to vector<8x128xf32>
    %94 = arith.addf %92, %93 : vector<8x128xf32>
    %95 = arith.negf %94 : vector<8x128xf32>
    %96 = math.exp %95 : vector<8x128xf32>
    %cst_31 = arith.constant 1.000000e+00 : f32
    %97 = vector.broadcast %cst_31 : f32 to vector<8x128xf32>
    %98 = arith.addf %97, %96 : vector<8x128xf32>
    %99 = arith.divf %97, %98 : vector<8x128xf32>
    %100 = vector.extract_strided_slice %83 {offsets = [0, 256], sizes = [8, 128], strides = [1, 1]} : vector<8x384xf32> to vector<8x128xf32>
    %101 = vector.extract_strided_slice %80 {offsets = [0, 256], sizes = [8, 128], strides = [1, 1]} : vector<8x384xf32> to vector<8x128xf32>
    %102 = arith.mulf %91, %101 : vector<8x128xf32>
    %103 = arith.addf %100, %102 : vector<8x128xf32>
    %104 = math.tanh %103 : vector<8x128xf32>
    %105 = arith.subf %76, %104 : vector<8x128xf32>
    %106 = arith.mulf %99, %105 : vector<8x128xf32>
    %107 = arith.addf %104, %106 : vector<8x128xf32>
    %c3_i32 = arith.constant 3 : i32
    %108 = arith.truncf %107 : vector<8x128xf32> to vector<8x128xbf16>
    %cst_32 = arith.constant dense<0.000000e+00> : vector<8x384xf32>
    %109 = tpu.matmul %108, %12, %cst_32 {dimension_numbers = #tpu.dot_dimension_numbers<[1], [0], [0], [1], [0, 0, 1, 1], [], []>} : vector<8x128xbf16>, vector<128x384xbf16>, vector<8x384xf32> -> vector<8x384xf32>
    %110 = vector.broadcast %13 : vector<1x384xf32> to vector<8x384xf32>
    %111 = arith.addf %109, %110 : vector<8x384xf32>
    %112 = arith.index_cast %c3_i32 : i32 to index
    %c0_33 = arith.constant 0 : index
    %c0_34 = arith.constant 0 : index
    %113 = vector.load %arg18[%112, %c0_33, %c0_34] : memref<8x8x384xf32, #tpu.memory_space<vmem>>, vector<1x8x384xf32>
    %114 = vector.shape_cast %113 : vector<1x8x384xf32> to vector<8x384xf32>
    %115 = vector.extract_strided_slice %114 {offsets = [0, 0], sizes = [8, 128], strides = [1, 1]} : vector<8x384xf32> to vector<8x128xf32>
    %116 = vector.extract_strided_slice %111 {offsets = [0, 0], sizes = [8, 128], strides = [1, 1]} : vector<8x384xf32> to vector<8x128xf32>
    %117 = arith.addf %115, %116 : vector<8x128xf32>
    %118 = arith.negf %117 : vector<8x128xf32>
    %119 = math.exp %118 : vector<8x128xf32>
    %cst_35 = arith.constant 1.000000e+00 : f32
    %120 = vector.broadcast %cst_35 : f32 to vector<8x128xf32>
    %121 = arith.addf %120, %119 : vector<8x128xf32>
    %122 = arith.divf %120, %121 : vector<8x128xf32>
    %123 = vector.extract_strided_slice %114 {offsets = [0, 128], sizes = [8, 128], strides = [1, 1]} : vector<8x384xf32> to vector<8x128xf32>
    %124 = vector.extract_strided_slice %111 {offsets = [0, 128], sizes = [8, 128], strides = [1, 1]} : vector<8x384xf32> to vector<8x128xf32>
    %125 = arith.addf %123, %124 : vector<8x128xf32>
    %126 = arith.negf %125 : vector<8x128xf32>
    %127 = math.exp %126 : vector<8x128xf32>
    %cst_36 = arith.constant 1.000000e+00 : f32
    %128 = vector.broadcast %cst_36 : f32 to vector<8x128xf32>
    %129 = arith.addf %128, %127 : vector<8x128xf32>
    %130 = arith.divf %128, %129 : vector<8x128xf32>
    %131 = vector.extract_strided_slice %114 {offsets = [0, 256], sizes = [8, 128], strides = [1, 1]} : vector<8x384xf32> to vector<8x128xf32>
    %132 = vector.extract_strided_slice %111 {offsets = [0, 256], sizes = [8, 128], strides = [1, 1]} : vector<8x384xf32> to vector<8x128xf32>
    %133 = arith.mulf %122, %132 : vector<8x128xf32>
    %134 = arith.addf %131, %133 : vector<8x128xf32>
    %135 = math.tanh %134 : vector<8x128xf32>
    %136 = arith.subf %107, %135 : vector<8x128xf32>
    %137 = arith.mulf %130, %136 : vector<8x128xf32>
    %138 = arith.addf %135, %137 : vector<8x128xf32>
    %c4_i32 = arith.constant 4 : i32
    %139 = arith.truncf %138 : vector<8x128xf32> to vector<8x128xbf16>
    %cst_37 = arith.constant dense<0.000000e+00> : vector<8x384xf32>
    %140 = tpu.matmul %139, %12, %cst_37 {dimension_numbers = #tpu.dot_dimension_numbers<[1], [0], [0], [1], [0, 0, 1, 1], [], []>} : vector<8x128xbf16>, vector<128x384xbf16>, vector<8x384xf32> -> vector<8x384xf32>
    %141 = vector.broadcast %13 : vector<1x384xf32> to vector<8x384xf32>
    %142 = arith.addf %140, %141 : vector<8x384xf32>
    %143 = arith.index_cast %c4_i32 : i32 to index
    %c0_38 = arith.constant 0 : index
    %c0_39 = arith.constant 0 : index
    %144 = vector.load %arg18[%143, %c0_38, %c0_39] : memref<8x8x384xf32, #tpu.memory_space<vmem>>, vector<1x8x384xf32>
    %145 = vector.shape_cast %144 : vector<1x8x384xf32> to vector<8x384xf32>
    %146 = vector.extract_strided_slice %145 {offsets = [0, 0], sizes = [8, 128], strides = [1, 1]} : vector<8x384xf32> to vector<8x128xf32>
    %147 = vector.extract_strided_slice %142 {offsets = [0, 0], sizes = [8, 128], strides = [1, 1]} : vector<8x384xf32> to vector<8x128xf32>
    %148 = arith.addf %146, %147 : vector<8x128xf32>
    %149 = arith.negf %148 : vector<8x128xf32>
    %150 = math.exp %149 : vector<8x128xf32>
    %cst_40 = arith.constant 1.000000e+00 : f32
    %151 = vector.broadcast %cst_40 : f32 to vector<8x128xf32>
    %152 = arith.addf %151, %150 : vector<8x128xf32>
    %153 = arith.divf %151, %152 : vector<8x128xf32>
    %154 = vector.extract_strided_slice %145 {offsets = [0, 128], sizes = [8, 128], strides = [1, 1]} : vector<8x384xf32> to vector<8x128xf32>
    %155 = vector.extract_strided_slice %142 {offsets = [0, 128], sizes = [8, 128], strides = [1, 1]} : vector<8x384xf32> to vector<8x128xf32>
    %156 = arith.addf %154, %155 : vector<8x128xf32>
    %157 = arith.negf %156 : vector<8x128xf32>
    %158 = math.exp %157 : vector<8x128xf32>
    %cst_41 = arith.constant 1.000000e+00 : f32
    %159 = vector.broadcast %cst_41 : f32 to vector<8x128xf32>
    %160 = arith.addf %159, %158 : vector<8x128xf32>
    %161 = arith.divf %159, %160 : vector<8x128xf32>
    %162 = vector.extract_strided_slice %145 {offsets = [0, 256], sizes = [8, 128], strides = [1, 1]} : vector<8x384xf32> to vector<8x128xf32>
    %163 = vector.extract_strided_slice %142 {offsets = [0, 256], sizes = [8, 128], strides = [1, 1]} : vector<8x384xf32> to vector<8x128xf32>
    %164 = arith.mulf %153, %163 : vector<8x128xf32>
    %165 = arith.addf %162, %164 : vector<8x128xf32>
    %166 = math.tanh %165 : vector<8x128xf32>
    %167 = arith.subf %138, %166 : vector<8x128xf32>
    %168 = arith.mulf %161, %167 : vector<8x128xf32>
    %169 = arith.addf %166, %168 : vector<8x128xf32>
    %c5_i32 = arith.constant 5 : i32
    %170 = arith.truncf %169 : vector<8x128xf32> to vector<8x128xbf16>
    %cst_42 = arith.constant dense<0.000000e+00> : vector<8x384xf32>
    %171 = tpu.matmul %170, %12, %cst_42 {dimension_numbers = #tpu.dot_dimension_numbers<[1], [0], [0], [1], [0, 0, 1, 1], [], []>} : vector<8x128xbf16>, vector<128x384xbf16>, vector<8x384xf32> -> vector<8x384xf32>
    %172 = vector.broadcast %13 : vector<1x384xf32> to vector<8x384xf32>
    %173 = arith.addf %171, %172 : vector<8x384xf32>
    %174 = arith.index_cast %c5_i32 : i32 to index
    %c0_43 = arith.constant 0 : index
    %c0_44 = arith.constant 0 : index
    %175 = vector.load %arg18[%174, %c0_43, %c0_44] : memref<8x8x384xf32, #tpu.memory_space<vmem>>, vector<1x8x384xf32>
    %176 = vector.shape_cast %175 : vector<1x8x384xf32> to vector<8x384xf32>
    %177 = vector.extract_strided_slice %176 {offsets = [0, 0], sizes = [8, 128], strides = [1, 1]} : vector<8x384xf32> to vector<8x128xf32>
    %178 = vector.extract_strided_slice %173 {offsets = [0, 0], sizes = [8, 128], strides = [1, 1]} : vector<8x384xf32> to vector<8x128xf32>
    %179 = arith.addf %177, %178 : vector<8x128xf32>
    %180 = arith.negf %179 : vector<8x128xf32>
    %181 = math.exp %180 : vector<8x128xf32>
    %cst_45 = arith.constant 1.000000e+00 : f32
    %182 = vector.broadcast %cst_45 : f32 to vector<8x128xf32>
    %183 = arith.addf %182, %181 : vector<8x128xf32>
    %184 = arith.divf %182, %183 : vector<8x128xf32>
    %185 = vector.extract_strided_slice %176 {offsets = [0, 128], sizes = [8, 128], strides = [1, 1]} : vector<8x384xf32> to vector<8x128xf32>
    %186 = vector.extract_strided_slice %173 {offsets = [0, 128], sizes = [8, 128], strides = [1, 1]} : vector<8x384xf32> to vector<8x128xf32>
    %187 = arith.addf %185, %186 : vector<8x128xf32>
    %188 = arith.negf %187 : vector<8x128xf32>
    %189 = math.exp %188 : vector<8x128xf32>
    %cst_46 = arith.constant 1.000000e+00 : f32
    %190 = vector.broadcast %cst_46 : f32 to vector<8x128xf32>
    %191 = arith.addf %190, %189 : vector<8x128xf32>
    %192 = arith.divf %190, %191 : vector<8x128xf32>
    %193 = vector.extract_strided_slice %176 {offsets = [0, 256], sizes = [8, 128], strides = [1, 1]} : vector<8x384xf32> to vector<8x128xf32>
    %194 = vector.extract_strided_slice %173 {offsets = [0, 256], sizes = [8, 128], strides = [1, 1]} : vector<8x384xf32> to vector<8x128xf32>
    %195 = arith.mulf %184, %194 : vector<8x128xf32>
    %196 = arith.addf %193, %195 : vector<8x128xf32>
    %197 = math.tanh %196 : vector<8x128xf32>
    %198 = arith.subf %169, %197 : vector<8x128xf32>
    %199 = arith.mulf %192, %198 : vector<8x128xf32>
    %200 = arith.addf %197, %199 : vector<8x128xf32>
    %c6_i32 = arith.constant 6 : i32
    %201 = arith.truncf %200 : vector<8x128xf32> to vector<8x128xbf16>
    %cst_47 = arith.constant dense<0.000000e+00> : vector<8x384xf32>
    %202 = tpu.matmul %201, %12, %cst_47 {dimension_numbers = #tpu.dot_dimension_numbers<[1], [0], [0], [1], [0, 0, 1, 1], [], []>} : vector<8x128xbf16>, vector<128x384xbf16>, vector<8x384xf32> -> vector<8x384xf32>
    %203 = vector.broadcast %13 : vector<1x384xf32> to vector<8x384xf32>
    %204 = arith.addf %202, %203 : vector<8x384xf32>
    %205 = arith.index_cast %c6_i32 : i32 to index
    %c0_48 = arith.constant 0 : index
    %c0_49 = arith.constant 0 : index
    %206 = vector.load %arg18[%205, %c0_48, %c0_49] : memref<8x8x384xf32, #tpu.memory_space<vmem>>, vector<1x8x384xf32>
    %207 = vector.shape_cast %206 : vector<1x8x384xf32> to vector<8x384xf32>
    %208 = vector.extract_strided_slice %207 {offsets = [0, 0], sizes = [8, 128], strides = [1, 1]} : vector<8x384xf32> to vector<8x128xf32>
    %209 = vector.extract_strided_slice %204 {offsets = [0, 0], sizes = [8, 128], strides = [1, 1]} : vector<8x384xf32> to vector<8x128xf32>
    %210 = arith.addf %208, %209 : vector<8x128xf32>
    %211 = arith.negf %210 : vector<8x128xf32>
    %212 = math.exp %211 : vector<8x128xf32>
    %cst_50 = arith.constant 1.000000e+00 : f32
    %213 = vector.broadcast %cst_50 : f32 to vector<8x128xf32>
    %214 = arith.addf %213, %212 : vector<8x128xf32>
    %215 = arith.divf %213, %214 : vector<8x128xf32>
    %216 = vector.extract_strided_slice %207 {offsets = [0, 128], sizes = [8, 128], strides = [1, 1]} : vector<8x384xf32> to vector<8x128xf32>
    %217 = vector.extract_strided_slice %204 {offsets = [0, 128], sizes = [8, 128], strides = [1, 1]} : vector<8x384xf32> to vector<8x128xf32>
    %218 = arith.addf %216, %217 : vector<8x128xf32>
    %219 = arith.negf %218 : vector<8x128xf32>
    %220 = math.exp %219 : vector<8x128xf32>
    %cst_51 = arith.constant 1.000000e+00 : f32
    %221 = vector.broadcast %cst_51 : f32 to vector<8x128xf32>
    %222 = arith.addf %221, %220 : vector<8x128xf32>
    %223 = arith.divf %221, %222 : vector<8x128xf32>
    %224 = vector.extract_strided_slice %207 {offsets = [0, 256], sizes = [8, 128], strides = [1, 1]} : vector<8x384xf32> to vector<8x128xf32>
    %225 = vector.extract_strided_slice %204 {offsets = [0, 256], sizes = [8, 128], strides = [1, 1]} : vector<8x384xf32> to vector<8x128xf32>
    %226 = arith.mulf %215, %225 : vector<8x128xf32>
    %227 = arith.addf %224, %226 : vector<8x128xf32>
    %228 = math.tanh %227 : vector<8x128xf32>
    %229 = arith.subf %200, %228 : vector<8x128xf32>
    %230 = arith.mulf %223, %229 : vector<8x128xf32>
    %231 = arith.addf %228, %230 : vector<8x128xf32>
    %c7_i32 = arith.constant 7 : i32
    %232 = arith.truncf %231 : vector<8x128xf32> to vector<8x128xbf16>
    %cst_52 = arith.constant dense<0.000000e+00> : vector<8x384xf32>
    %233 = tpu.matmul %232, %12, %cst_52 {dimension_numbers = #tpu.dot_dimension_numbers<[1], [0], [0], [1], [0, 0, 1, 1], [], []>} : vector<8x128xbf16>, vector<128x384xbf16>, vector<8x384xf32> -> vector<8x384xf32>
    %234 = vector.broadcast %13 : vector<1x384xf32> to vector<8x384xf32>
    %235 = arith.addf %233, %234 : vector<8x384xf32>
    %236 = arith.index_cast %c7_i32 : i32 to index
    %c0_53 = arith.constant 0 : index
    %c0_54 = arith.constant 0 : index
    %237 = vector.load %arg18[%236, %c0_53, %c0_54] : memref<8x8x384xf32, #tpu.memory_space<vmem>>, vector<1x8x384xf32>
    %238 = vector.shape_cast %237 : vector<1x8x384xf32> to vector<8x384xf32>
    %239 = vector.extract_strided_slice %238 {offsets = [0, 0], sizes = [8, 128], strides = [1, 1]} : vector<8x384xf32> to vector<8x128xf32>
    %240 = vector.extract_strided_slice %235 {offsets = [0, 0], sizes = [8, 128], strides = [1, 1]} : vector<8x384xf32> to vector<8x128xf32>
    %241 = arith.addf %239, %240 : vector<8x128xf32>
    %242 = arith.negf %241 : vector<8x128xf32>
    %243 = math.exp %242 : vector<8x128xf32>
    %cst_55 = arith.constant 1.000000e+00 : f32
    %244 = vector.broadcast %cst_55 : f32 to vector<8x128xf32>
    %245 = arith.addf %244, %243 : vector<8x128xf32>
    %246 = arith.divf %244, %245 : vector<8x128xf32>
    %247 = vector.extract_strided_slice %238 {offsets = [0, 128], sizes = [8, 128], strides = [1, 1]} : vector<8x384xf32> to vector<8x128xf32>
    %248 = vector.extract_strided_slice %235 {offsets = [0, 128], sizes = [8, 128], strides = [1, 1]} : vector<8x384xf32> to vector<8x128xf32>
    %249 = arith.addf %247, %248 : vector<8x128xf32>
    %250 = arith.negf %249 : vector<8x128xf32>
    %251 = math.exp %250 : vector<8x128xf32>
    %cst_56 = arith.constant 1.000000e+00 : f32
    %252 = vector.broadcast %cst_56 : f32 to vector<8x128xf32>
    %253 = arith.addf %252, %251 : vector<8x128xf32>
    %254 = arith.divf %252, %253 : vector<8x128xf32>
    %255 = vector.extract_strided_slice %238 {offsets = [0, 256], sizes = [8, 128], strides = [1, 1]} : vector<8x384xf32> to vector<8x128xf32>
    %256 = vector.extract_strided_slice %235 {offsets = [0, 256], sizes = [8, 128], strides = [1, 1]} : vector<8x384xf32> to vector<8x128xf32>
    %257 = arith.mulf %246, %256 : vector<8x128xf32>
    %258 = arith.addf %255, %257 : vector<8x128xf32>
    %259 = math.tanh %258 : vector<8x128xf32>
    %260 = arith.subf %231, %259 : vector<8x128xf32>
    %261 = arith.mulf %254, %260 : vector<8x128xf32>
    %262 = arith.addf %259, %261 : vector<8x128xf32>
    %c8_i32 = arith.constant 8 : i32
    %c0_57 = arith.constant 0 : index
    %c0_58 = arith.constant 0 : index
    %263 = vector.load %arg17[%c0_57, %c0_58] : memref<8x128xf32, #tpu.memory_space<vmem>>, vector<8x128xf32>
    tpu.vector_store %arg17[%c0_57, %c0_58], %262 {strides = array<i32>} : memref<8x128xf32, #tpu.memory_space<vmem>>, vector<8x128xf32>,
    %c0_i32_59 = arith.constant 0 : i32
    %264 = arith.cmpi eq, %arg1, %c0_i32_59 : i32
    %265 = arith.extui %264 : i1 to i32
    %c0_i32_60 = arith.constant 0 : i32
    %266 = arith.cmpi ne, %265, %c0_i32_60 : i32
    scf.if %266 {
      %c0_61 = arith.constant 0 : index
      %c0_62 = arith.constant 0 : index
      %267 = vector.load %arg13[%c0_61, %c0_62] : memref<8x128xf32, #tpu.memory_space<vmem>>, vector<8x128xf32>
      %c0_63 = arith.constant 0 : index
      %c0_64 = arith.constant 0 : index
      %268 = vector.load %arg11[%c0_63, %c0_64] : memref<128x384xbf16, #tpu.memory_space<vmem>>, vector<128x384xbf16>
      %c0_65 = arith.constant 0 : index
      %c0_66 = arith.constant 0 : index
      %269 = vector.load %arg8[%c0_65, %c0_66] : memref<8x128xbf16, #tpu.memory_space<vmem>>, vector<8x128xbf16>
      %c0_67 = arith.constant 0 : index
      %c0_68 = arith.constant 0 : index
      %270 = vector.load %arg9[%c0_67, %c0_68] : memref<128x384xbf16, #tpu.memory_space<vmem>>, vector<128x384xbf16>
      %cst_69 = arith.constant dense<0.000000e+00> : vector<8x384xf32>
      %271 = tpu.matmul %269, %270, %cst_69 {dimension_numbers = #tpu.dot_dimension_numbers<[1], [0], [0], [1], [0, 0, 1, 1], [], []>} : vector<8x128xbf16>, vector<128x384xbf16>, vector<8x384xf32> -> vector<8x384xf32>
      %c0_70 = arith.constant 0 : index
      %c0_71 = arith.constant 0 : index
      %272 = vector.load %arg10[%c0_70, %c0_71] : memref<1x384xf32, #tpu.memory_space<vmem>>, vector<1x384xf32>
      %273 = vector.broadcast %272 : vector<1x384xf32> to vector<8x384xf32>
      %274 = arith.addf %271, %273 : vector<8x384xf32>
      %275 = arith.truncf %267 : vector<8x128xf32> to vector<8x128xbf16>
      %cst_72 = arith.constant dense<0.000000e+00> : vector<8x384xf32>
      %276 = tpu.matmul %275, %268, %cst_72 {dimension_numbers = #tpu.dot_dimension_numbers<[1], [0], [0], [1], [0, 0, 1, 1], [], []>} : vector<8x128xbf16>, vector<128x384xbf16>, vector<8x384xf32> -> vector<8x384xf32>
      %c0_73 = arith.constant 0 : index
      %c0_74 = arith.constant 0 : index
      %277 = vector.load %arg12[%c0_73, %c0_74] : memref<1x384xf32, #tpu.memory_space<vmem>>, vector<1x384xf32>
      %278 = vector.broadcast %277 : vector<1x384xf32> to vector<8x384xf32>
      %279 = arith.addf %276, %278 : vector<8x384xf32>
      %280 = vector.extract_strided_slice %274 {offsets = [0, 0], sizes = [8, 128], strides = [1, 1]} : vector<8x384xf32> to vector<8x128xf32>
      %281 = vector.extract_strided_slice %279 {offsets = [0, 0], sizes = [8, 128], strides = [1, 1]} : vector<8x384xf32> to vector<8x128xf32>
      %282 = arith.addf %280, %281 : vector<8x128xf32>
      %283 = arith.negf %282 : vector<8x128xf32>
      %284 = math.exp %283 : vector<8x128xf32>
      %cst_75 = arith.constant 1.000000e+00 : f32
      %285 = vector.broadcast %cst_75 : f32 to vector<8x128xf32>
      %286 = arith.addf %285, %284 : vector<8x128xf32>
      %287 = arith.divf %285, %286 : vector<8x128xf32>
      %288 = vector.extract_strided_slice %274 {offsets = [0, 128], sizes = [8, 128], strides = [1, 1]} : vector<8x384xf32> to vector<8x128xf32>
      %289 = vector.extract_strided_slice %279 {offsets = [0, 128], sizes = [8, 128], strides = [1, 1]} : vector<8x384xf32> to vector<8x128xf32>
      %290 = arith.addf %288, %289 : vector<8x128xf32>
      %291 = arith.negf %290 : vector<8x128xf32>
      %292 = math.exp %291 : vector<8x128xf32>
      %cst_76 = arith.constant 1.000000e+00 : f32
      %293 = vector.broadcast %cst_76 : f32 to vector<8x128xf32>
      %294 = arith.addf %293, %292 : vector<8x128xf32>
      %295 = arith.divf %293, %294 : vector<8x128xf32>
      %296 = vector.extract_strided_slice %274 {offsets = [0, 256], sizes = [8, 128], strides = [1, 1]} : vector<8x384xf32> to vector<8x128xf32>
      %297 = vector.extract_strided_slice %279 {offsets = [0, 256], sizes = [8, 128], strides = [1, 1]} : vector<8x384xf32> to vector<8x128xf32>
      %298 = arith.mulf %287, %297 : vector<8x128xf32>
      %299 = arith.addf %296, %298 : vector<8x128xf32>
      %300 = math.tanh %299 : vector<8x128xf32>
      %301 = arith.subf %267, %300 : vector<8x128xf32>
      %302 = arith.mulf %295, %301 : vector<8x128xf32>
      %303 = arith.addf %300, %302 : vector<8x128xf32>
      %c0_77 = arith.constant 0 : index
      %c0_78 = arith.constant 0 : index
      %304 = vector.load %arg14[%c0_77, %c0_78] : memref<256x128xbf16, #tpu.memory_space<vmem>>, vector<128x128xbf16>
      %c128 = arith.constant 128 : index
      %c0_79 = arith.constant 0 : index
      %305 = vector.load %arg14[%c128, %c0_79] : memref<256x128xbf16, #tpu.memory_space<vmem>>, vector<128x128xbf16>
      %306 = arith.truncf %262 : vector<8x128xf32> to vector<8x128xbf16>
      %cst_80 = arith.constant dense<0.000000e+00> : vector<8x128xf32>
      %307 = tpu.matmul %306, %304, %cst_80 {dimension_numbers = #tpu.dot_dimension_numbers<[1], [0], [0], [1], [0, 0, 1, 1], [], []>} : vector<8x128xbf16>, vector<128x128xbf16>, vector<8x128xf32> -> vector<8x128xf32>
      %308 = arith.truncf %303 : vector<8x128xf32> to vector<8x128xbf16>
      %cst_81 = arith.constant dense<0.000000e+00> : vector<8x128xf32>
      %309 = tpu.matmul %308, %305, %cst_81 {dimension_numbers = #tpu.dot_dimension_numbers<[1], [0], [0], [1], [0, 0, 1, 1], [], []>} : vector<8x128xbf16>, vector<128x128xbf16>, vector<8x128xf32> -> vector<8x128xf32>
      %310 = arith.addf %307, %309 : vector<8x128xf32>
      %c0_82 = arith.constant 0 : index
      %c0_83 = arith.constant 0 : index
      %311 = vector.load %arg15[%c0_82, %c0_83] : memref<1x128xf32, #tpu.memory_space<vmem>>, vector<1x128xf32>
      %312 = vector.broadcast %311 : vector<1x128xf32> to vector<8x128xf32>
      %313 = arith.addf %310, %312 : vector<8x128xf32>
      %c0_84 = arith.constant 0 : index
      %c0_85 = arith.constant 0 : index
      %314 = vector.load %arg16[%c0_84, %c0_85] : memref<8x128xf32, #tpu.memory_space<vmem>>, vector<8x128xf32>
      tpu.vector_store %arg16[%c0_84, %c0_85], %313 {strides = array<i32>} : memref<8x128xf32, #tpu.memory_space<vmem>>, vector<8x128xf32>,
    } else {
    }
    return
  }
  func.func @transform_0(%arg0: i32, %arg1: i32) -> (i32, i32, i32) {
    %c0_i32 = arith.constant 0 : i32
    %c0_i32_0 = arith.constant 0 : i32
    return %arg1, %arg0, %c0_i32 : i32, i32, i32
  }
  func.func @transform_1(%arg0: i32, %arg1: i32) -> (i32, i32) {
    %c0_i32 = arith.constant 0 : i32
    %c0_i32_0 = arith.constant 0 : i32
    %c0_i32_1 = arith.constant 0 : i32
    return %c0_i32, %c0_i32_0 : i32, i32
  }
  func.func @transform_2(%arg0: i32, %arg1: i32) -> (i32, i32) {
    %c0_i32 = arith.constant 0 : i32
    %c0_i32_0 = arith.constant 0 : i32
    %c0_i32_1 = arith.constant 0 : i32
    return %c0_i32, %c0_i32_0 : i32, i32
  }
  func.func @transform_3(%arg0: i32, %arg1: i32) -> (i32, i32) {
    %c0_i32 = arith.constant 0 : i32
    %c0_i32_0 = arith.constant 0 : i32
    %c0_i32_1 = arith.constant 0 : i32
    return %c0_i32, %c0_i32_0 : i32, i32
  }
  func.func @transform_4(%arg0: i32, %arg1: i32) -> (i32, i32) {
    %c0_i32 = arith.constant 0 : i32
    %c0_i32_0 = arith.constant 0 : i32
    %c0_i32_1 = arith.constant 0 : i32
    return %c0_i32, %c0_i32_0 : i32, i32
  }
  func.func @transform_5(%arg0: i32, %arg1: i32) -> (i32, i32) {
    %c0_i32 = arith.constant 0 : i32
    %c0_i32_0 = arith.constant 0 : i32
    return %arg0, %c0_i32 : i32, i32
  }
  func.func @transform_6(%arg0: i32, %arg1: i32) -> (i32, i32) {
    %c0_i32 = arith.constant 0 : i32
    %c0_i32_0 = arith.constant 0 : i32
    return %arg0, %c0_i32 : i32, i32
  }
  func.func @transform_7(%arg0: i32, %arg1: i32) -> (i32, i32) {
    %c0_i32 = arith.constant 0 : i32
    %c0_i32_0 = arith.constant 0 : i32
    %c0_i32_1 = arith.constant 0 : i32
    return %c0_i32, %c0_i32_0 : i32, i32
  }
  func.func @transform_8(%arg0: i32, %arg1: i32) -> (i32, i32) {
    %c0_i32 = arith.constant 0 : i32
    %c0_i32_0 = arith.constant 0 : i32
    %c0_i32_1 = arith.constant 0 : i32
    return %c0_i32, %c0_i32_0 : i32, i32
  }
  func.func @transform_9(%arg0: i32, %arg1: i32) -> (i32, i32) {
    %c0_i32 = arith.constant 0 : i32
    %c0_i32_0 = arith.constant 0 : i32
    %c0_i32_1 = arith.constant 0 : i32
    return %c0_i32, %c0_i32_0 : i32, i32
  }
  func.func @transform_10(%arg0: i32, %arg1: i32) -> (i32, i32) {
    %c0_i32 = arith.constant 0 : i32
    %c0_i32_0 = arith.constant 0 : i32
    %c0_i32_1 = arith.constant 0 : i32
    return %c0_i32, %c0_i32_0 : i32, i32
  }
  func.func @transform_11(%arg0: i32, %arg1: i32) -> (i32, i32) {
    %c0_i32 = arith.constant 0 : i32
    %c0_i32_0 = arith.constant 0 : i32
    return %arg0, %c0_i32 : i32, i32
  }
  func.func @transform_12(%arg0: i32, %arg1: i32) -> (i32, i32) {
    %c0_i32 = arith.constant 0 : i32
    %c0_i32_0 = arith.constant 0 : i32
    %c0_i32_1 = arith.constant 0 : i32
    return %c0_i32, %c0_i32_0 : i32, i32
  }
  func.func @transform_13(%arg0: i32, %arg1: i32) -> (i32, i32) {
    %c0_i32 = arith.constant 0 : i32
    %c0_i32_0 = arith.constant 0 : i32
    %c0_i32_1 = arith.constant 0 : i32
    return %c0_i32, %c0_i32_0 : i32, i32
  }
  func.func @transform_14(%arg0: i32, %arg1: i32) -> (i32, i32) {
    %c0_i32 = arith.constant 0 : i32
    %c0_i32_0 = arith.constant 0 : i32
    return %arg0, %c0_i32 : i32, i32
  }
}

module attributes {stable_mosaic.version = 11 : i64} {
  func.func @_gru_fused_kernel(%arg0: i32, %arg1: i32, %arg2: memref<8x8x128xbf16, #tpu.memory_space<vmem>>, %arg3: memref<128x384xbf16, #tpu.memory_space<vmem>>, %arg4: memref<1x384xf32, #tpu.memory_space<vmem>>, %arg5: memref<128x384xbf16, #tpu.memory_space<vmem>>, %arg6: memref<1x384xf32, #tpu.memory_space<vmem>>, %arg7: memref<8x128xf32, #tpu.memory_space<vmem>>, %arg8: memref<8x128xbf16, #tpu.memory_space<vmem>>, %arg9: memref<128x384xbf16, #tpu.memory_space<vmem>>, %arg10: memref<1x384xf32, #tpu.memory_space<vmem>>, %arg11: memref<128x384xbf16, #tpu.memory_space<vmem>>, %arg12: memref<1x384xf32, #tpu.memory_space<vmem>>, %arg13: memref<8x128xf32, #tpu.memory_space<vmem>>, %arg14: memref<256x128xbf16, #tpu.memory_space<vmem>>, %arg15: memref<1x128xf32, #tpu.memory_space<vmem>>, %arg16: memref<8x128xf32, #tpu.memory_space<vmem>>, %arg17: memref<8x128xf32, #tpu.memory_space<vmem>>, %arg18: memref<8x8x384xf32, #tpu.memory_space<vmem>>) attributes {dimension_semantics = [#tpu.dimension_semantics<parallel>, #tpu.dimension_semantics<arbitrary>], iteration_bounds = array<i64: 1, 1>, scalar_prefetch = 0 : i64, scratch_operands = 2 : i64, tpu.core_type = #tpu.core_type<tc>, window_params = [{transform_indices = @transform_0, window_bounds = array<i64: 8, 8, 128>}, {pipeline_mode = #tpu.pipeline_mode<synchronous>, transform_indices = @transform_1, window_bounds = array<i64: 128, 384>}, {pipeline_mode = #tpu.pipeline_mode<synchronous>, transform_indices = @transform_2, window_bounds = array<i64: 1, 384>}, {pipeline_mode = #tpu.pipeline_mode<synchronous>, transform_indices = @transform_3, window_bounds = array<i64: 128, 384>}, {pipeline_mode = #tpu.pipeline_mode<synchronous>, transform_indices = @transform_4, window_bounds = array<i64: 1, 384>}, {transform_indices = @transform_5, window_bounds = array<i64: 8, 128>}, {transform_indices = @transform_6, window_bounds = array<i64: 8, 128>}, {pipeline_mode = #tpu.pipeline_mode<synchronous>, transform_indices = @transform_7, window_bounds = array<i64: 128, 384>}, {pipeline_mode = #tpu.pipeline_mode<synchronous>, transform_indices = @transform_8, window_bounds = array<i64: 1, 384>}, {pipeline_mode = #tpu.pipeline_mode<synchronous>, transform_indices = @transform_9, window_bounds = array<i64: 128, 384>}, {pipeline_mode = #tpu.pipeline_mode<synchronous>, transform_indices = @transform_10, window_bounds = array<i64: 1, 384>}, {transform_indices = @transform_11, window_bounds = array<i64: 8, 128>}, {pipeline_mode = #tpu.pipeline_mode<synchronous>, transform_indices = @transform_12, window_bounds = array<i64: 256, 128>}, {pipeline_mode = #tpu.pipeline_mode<synchronous>, transform_indices = @transform_13, window_bounds = array<i64: 1, 128>}, {transform_indices = @transform_14, window_bounds = array<i64: 8, 128>}]} {
    %c0_i32 = arith.constant 0 : i32
    %0 = arith.cmpi eq, %arg1, %c0_i32 : i32
    %1 = arith.extui %0 : i1 to i32
    %c0_i32_0 = arith.constant 0 : i32
    %2 = arith.cmpi ne, %1, %c0_i32_0 : i32
    scf.if %2 {
      %c0_61 = arith.constant 0 : index
      %c0_62 = arith.constant 0 : index
      %267 = vector.load %arg7[%c0_61, %c0_62] : memref<8x128xf32, #tpu.memory_space<vmem>>, vector<8x128xf32>
      %c0_63 = arith.constant 0 : index
      %c0_64 = arith.constant 0 : index
      %268 = vector.load %arg17[%c0_63, %c0_64] : memref<8x128xf32, #tpu.memory_space<vmem>>, vector<8x128xf32>
      tpu.vector_store %arg17[%c0_63, %c0_64], %267 {strides = array<i32>} : memref<8x128xf32, #tpu.memory_space<vmem>>, vector<8x128xf32>,
    } else {
    }
    %c0 = arith.constant 0 : index
    %c0_1 = arith.constant 0 : index
    %c0_2 = arith.constant 0 : index
    %3 = vector.load %arg2[%c0, %c0_1, %c0_2] : memref<8x8x128xbf16, #tpu.memory_space<vmem>>, vector<8x8x128xbf16>
    %4 = vector.shape_cast %3 : vector<8x8x128xbf16> to vector<64x128xbf16>
    %c0_3 = arith.constant 0 : index
    %c0_4 = arith.constant 0 : index
    %5 = vector.load %arg3[%c0_3, %c0_4] : memref<128x384xbf16, #tpu.memory_space<vmem>>, vector<128x384xbf16>
    %cst = arith.constant dense<0.000000e+00> : vector<64x384xf32>
    %6 = tpu.matmul %4, %5, %cst {dimension_numbers = #tpu.dot_dimension_numbers<[1], [0], [0], [1], [0, 0, 1, 1], [], []>} : vector<64x128xbf16>, vector<128x384xbf16>, vector<64x384xf32> -> vector<64x384xf32>
    %c0_5 = arith.constant 0 : index
    %c0_6 = arith.constant 0 : index
    %7 = vector.load %arg4[%c0_5, %c0_6] : memref<1x384xf32, #tpu.memory_space<vmem>>, vector<1x384xf32>
    %8 = vector.broadcast %7 : vector<1x384xf32> to vector<64x384xf32>
    %9 = arith.addf %6, %8 : vector<64x384xf32>
    %10 = vector.shape_cast %9 : vector<64x384xf32> to vector<8x8x384xf32>
    %c0_7 = arith.constant 0 : index
    %c0_8 = arith.constant 0 : index
    %c0_9 = arith.constant 0 : index
    %11 = vector.load %arg18[%c0_7, %c0_8, %c0_9] : memref<8x8x384xf32, #tpu.memory_space<vmem>>, vector<8x8x384xf32>
    tpu.vector_store %arg18[%c0_7, %c0_8, %c0_9], %10 {strides = array<i32>} : memref<8x8x384xf32, #tpu.memory_space<vmem>>, vector<8x8x384xf32>,
    %c0_10 = arith.constant 0 : index
    %c0_11 = arith.constant 0 : index
    %12 = vector.load %arg5[%c0_10, %c0_11] : memref<128x384xbf16, #tpu.memory_space<vmem>>, vector<128x384xbf16>
    %c0_12 = arith.constant 0 : index
    %c0_13 = arith.constant 0 : index
    %13 = vector.load %arg6[%c0_12, %c0_13] : memref<1x384xf32, #tpu.memory_space<vmem>>, vector<1x384xf32>
    %c0_14 = arith.constant 0 : index
    %c0_15 = arith.constant 0 : index
    %14 = vector.load %arg17[%c0_14, %c0_15] : memref<8x128xf32, #tpu.memory_space<vmem>>, vector<8x128xf32>
    %c0_i32_16 = arith.constant 0 : i32
    %15 = arith.truncf %14 : vector<8x128xf32> to vector<8x128xbf16>
    %cst_17 = arith.constant dense<0.000000e+00> : vector<8x384xf32>
    %16 = tpu.matmul %15, %12, %cst_17 {dimension_numbers = #tpu.dot_dimension_numbers<[1], [0], [0], [1], [0, 0, 1, 1], [], []>} : vector<8x128xbf16>, vector<128x384xbf16>, vector<8x384xf32> -> vector<8x384xf32>
    %17 = vector.broadcast %13 : vector<1x384xf32> to vector<8x384xf32>
    %18 = arith.addf %16, %17 : vector<8x384xf32>
    %19 = arith.index_cast %c0_i32_16 : i32 to index
    %c0_18 = arith.constant 0 : index
    %c0_19 = arith.constant 0 : index
    %20 = vector.load %arg18[%19, %c0_18, %c0_19] : memref<8x8x384xf32, #tpu.memory_space<vmem>>, vector<1x8x384xf32>
    %21 = vector.shape_cast %20 : vector<1x8x384xf32> to vector<8x384xf32>
    %22 = vector.extract_strided_slice %21 {offsets = [0, 0], sizes = [8, 128], strides = [1, 1]} : vector<8x384xf32> to vector<8x128xf32>
    %23 = vector.extract_strided_slice %18 {offsets = [0, 0], sizes = [8, 128], strides = [1, 1]} : vector<8x384xf32> to vector<8x128xf32>
    %24 = arith.addf %22, %23 : vector<8x128xf32>
    %25 = arith.negf %24 : vector<8x128xf32>
    %26 = math.exp %25 : vector<8x128xf32>
    %cst_20 = arith.constant 1.000000e+00 : f32
    %27 = vector.broadcast %cst_20 : f32 to vector<8x128xf32>
    %28 = arith.addf %27, %26 : vector<8x128xf32>
    %29 = arith.divf %27, %28 : vector<8x128xf32>
    %30 = vector.extract_strided_slice %21 {offsets = [0, 128], sizes = [8, 128], strides = [1, 1]} : vector<8x384xf32> to vector<8x128xf32>
    %31 = vector.extract_strided_slice %18 {offsets = [0, 128], sizes = [8, 128], strides = [1, 1]} : vector<8x384xf32> to vector<8x128xf32>
    %32 = arith.addf %30, %31 : vector<8x128xf32>
    %33 = arith.negf %32 : vector<8x128xf32>
    %34 = math.exp %33 : vector<8x128xf32>
    %cst_21 = arith.constant 1.000000e+00 : f32
    %35 = vector.broadcast %cst_21 : f32 to vector<8x128xf32>
    %36 = arith.addf %35, %34 : vector<8x128xf32>
    %37 = arith.divf %35, %36 : vector<8x128xf32>
    %38 = vector.extract_strided_slice %21 {offsets = [0, 256], sizes = [8, 128], strides = [1, 1]} : vector<8x384xf32> to vector<8x128xf32>
    %39 = vector.extract_strided_slice %18 {offsets = [0, 256], sizes = [8, 128], strides = [1, 1]} : vector<8x384xf32> to vector<8x128xf32>
    %40 = arith.mulf %29, %39 : vector<8x128xf32>
    %41 = arith.addf %38, %40 : vector<8x128xf32>
    %42 = math.tanh %41 : vector<8x128xf32>
    %43 = arith.subf %14, %42 : vector<8x128xf32>
    %44 = arith.mulf %37, %43 : vector<8x128xf32>
    %45 = arith.addf %42, %44 : vector<8x128xf32>
    %c1_i32 = arith.constant 1 : i32
    %46 = arith.truncf %45 : vector<8x128xf32> to vector<8x128xbf16>
    %cst_22 = arith.constant dense<0.000000e+00> : vector<8x384xf32>
    %47 = tpu.matmul %46, %12, %cst_22 {dimension_numbers = #tpu.dot_dimension_numbers<[1], [0], [0], [1], [0, 0, 1, 1], [], []>} : vector<8x128xbf16>, vector<128x384xbf16>, vector<8x384xf32> -> vector<8x384xf32>
    %48 = vector.broadcast %13 : vector<1x384xf32> to vector<8x384xf32>
    %49 = arith.addf %47, %48 : vector<8x384xf32>
    %50 = arith.index_cast %c1_i32 : i32 to index
    %c0_23 = arith.constant 0 : index
    %c0_24 = arith.constant 0 : index
    %51 = vector.load %arg18[%50, %c0_23, %c0_24] : memref<8x8x384xf32, #tpu.memory_space<vmem>>, vector<1x8x384xf32>
    %52 = vector.shape_cast %51 : vector<1x8x384xf32> to vector<8x384xf32>
    %53 = vector.extract_strided_slice %52 {offsets = [0, 0], sizes = [8, 128], strides = [1, 1]} : vector<8x384xf32> to vector<8x128xf32>
    %54 = vector.extract_strided_slice %49 {offsets = [0, 0], sizes = [8, 128], strides = [1, 1]} : vector<8x384xf32> to vector<8x128xf32>
    %55 = arith.addf %53, %54 : vector<8x128xf32>
    %56 = arith.negf %55 : vector<8x128xf32>
    %57 = math.exp %56 : vector<8x128xf32>
    %cst_25 = arith.constant 1.000000e+00 : f32
    %58 = vector.broadcast %cst_25 : f32 to vector<8x128xf32>
    %59 = arith.addf %58, %57 : vector<8x128xf32>
    %60 = arith.divf %58, %59 : vector<8x128xf32>
    %61 = vector.extract_strided_slice %52 {offsets = [0, 128], sizes = [8, 128], strides = [1, 1]} : vector<8x384xf32> to vector<8x128xf32>
    %62 = vector.extract_strided_slice %49 {offsets = [0, 128], sizes = [8, 128], strides = [1, 1]} : vector<8x384xf32> to vector<8x128xf32>
    %63 = arith.addf %61, %62 : vector<8x128xf32>
    %64 = arith.negf %63 : vector<8x128xf32>
    %65 = math.exp %64 : vector<8x128xf32>
    %cst_26 = arith.constant 1.000000e+00 : f32
    %66 = vector.broadcast %cst_26 : f32 to vector<8x128xf32>
    %67 = arith.addf %66, %65 : vector<8x128xf32>
    %68 = arith.divf %66, %67 : vector<8x128xf32>
    %69 = vector.extract_strided_slice %52 {offsets = [0, 256], sizes = [8, 128], strides = [1, 1]} : vector<8x384xf32> to vector<8x128xf32>
    %70 = vector.extract_strided_slice %49 {offsets = [0, 256], sizes = [8, 128], strides = [1, 1]} : vector<8x384xf32> to vector<8x128xf32>
    %71 = arith.mulf %60, %70 : vector<8x128xf32>
    %72 = arith.addf %69, %71 : vector<8x128xf32>
    %73 = math.tanh %72 : vector<8x128xf32>
    %74 = arith.subf %45, %73 : vector<8x128xf32>
    %75 = arith.mulf %68, %74 : vector<8x128xf32>
    %76 = arith.addf %73, %75 : vector<8x128xf32>
    %c2_i32 = arith.constant 2 : i32
    %77 = arith.truncf %76 : vector<8x128xf32> to vector<8x128xbf16>
    %cst_27 = arith.constant dense<0.000000e+00> : vector<8x384xf32>
    %78 = tpu.matmul %77, %12, %cst_27 {dimension_numbers = #tpu.dot_dimension_numbers<[1], [0], [0], [1], [0, 0, 1, 1], [], []>} : vector<8x128xbf16>, vector<128x384xbf16>, vector<8x384xf32> -> vector<8x384xf32>
    %79 = vector.broadcast %13 : vector<1x384xf32> to vector<8x384xf32>
    %80 = arith.addf %78, %79 : vector<8x384xf32>
    %81 = arith.index_cast %c2_i32 : i32 to index
    %c0_28 = arith.constant 0 : index
    %c0_29 = arith.constant 0 : index
    %82 = vector.load %arg18[%81, %c0_28, %c0_29] : memref<8x8x384xf32, #tpu.memory_space<vmem>>, vector<1x8x384xf32>
    %83 = vector.shape_cast %82 : vector<1x8x384xf32> to vector<8x384xf32>
    %84 = vector.extract_strided_slice %83 {offsets = [0, 0], sizes = [8, 128], strides = [1, 1]} : vector<8x384xf32> to vector<8x128xf32>
    %85 = vector.extract_strided_slice %80 {offsets = [0, 0], sizes = [8, 128], strides = [1, 1]} : vector<8x384xf32> to vector<8x128xf32>
    %86 = arith.addf %84, %85 : vector<8x128xf32>
    %87 = arith.negf %86 : vector<8x128xf32>
    %88 = math.exp %87 : vector<8x128xf32>
    %cst_30 = arith.constant 1.000000e+00 : f32
    %89 = vector.broadcast %cst_30 : f32 to vector<8x128xf32>
    %90 = arith.addf %89, %88 : vector<8x128xf32>
    %91 = arith.divf %89, %90 : vector<8x128xf32>
    %92 = vector.extract_strided_slice %83 {offsets = [0, 128], sizes = [8, 128], strides = [1, 1]} : vector<8x384xf32> to vector<8x128xf32>
    %93 = vector.extract_strided_slice %80 {offsets = [0, 128], sizes = [8, 128], strides = [1, 1]} : vector<8x384xf32> to vector<8x128xf32>
    %94 = arith.addf %92, %93 : vector<8x128xf32>
    %95 = arith.negf %94 : vector<8x128xf32>
    %96 = math.exp %95 : vector<8x128xf32>
    %cst_31 = arith.constant 1.000000e+00 : f32
    %97 = vector.broadcast %cst_31 : f32 to vector<8x128xf32>
    %98 = arith.addf %97, %96 : vector<8x128xf32>
    %99 = arith.divf %97, %98 : vector<8x128xf32>
    %100 = vector.extract_strided_slice %83 {offsets = [0, 256], sizes = [8, 128], strides = [1, 1]} : vector<8x384xf32> to vector<8x128xf32>
    %101 = vector.extract_strided_slice %80 {offsets = [0, 256], sizes = [8, 128], strides = [1, 1]} : vector<8x384xf32> to vector<8x128xf32>
    %102 = arith.mulf %91, %101 : vector<8x128xf32>
    %103 = arith.addf %100, %102 : vector<8x128xf32>
    %104 = math.tanh %103 : vector<8x128xf32>
    %105 = arith.subf %76, %104 : vector<8x128xf32>
    %106 = arith.mulf %99, %105 : vector<8x128xf32>
    %107 = arith.addf %104, %106 : vector<8x128xf32>
    %c3_i32 = arith.constant 3 : i32
    %108 = arith.truncf %107 : vector<8x128xf32> to vector<8x128xbf16>
    %cst_32 = arith.constant dense<0.000000e+00> : vector<8x384xf32>
    %109 = tpu.matmul %108, %12, %cst_32 {dimension_numbers = #tpu.dot_dimension_numbers<[1], [0], [0], [1], [0, 0, 1, 1], [], []>} : vector<8x128xbf16>, vector<128x384xbf16>, vector<8x384xf32> -> vector<8x384xf32>
    %110 = vector.broadcast %13 : vector<1x384xf32> to vector<8x384xf32>
    %111 = arith.addf %109, %110 : vector<8x384xf32>
    %112 = arith.index_cast %c3_i32 : i32 to index
    %c0_33 = arith.constant 0 : index
    %c0_34 = arith.constant 0 : index
    %113 = vector.load %arg18[%112, %c0_33, %c0_34] : memref<8x8x384xf32, #tpu.memory_space<vmem>>, vector<1x8x384xf32>
    %114 = vector.shape_cast %113 : vector<1x8x384xf32> to vector<8x384xf32>
    %115 = vector.extract_strided_slice %114 {offsets = [0, 0], sizes = [8, 128], strides = [1, 1]} : vector<8x384xf32> to vector<8x128xf32>
    %116 = vector.extract_strided_slice %111 {offsets = [0, 0], sizes = [8, 128], strides = [1, 1]} : vector<8x384xf32> to vector<8x128xf32>
    %117 = arith.addf %115, %116 : vector<8x128xf32>
    %118 = arith.negf %117 : vector<8x128xf32>
    %119 = math.exp %118 : vector<8x128xf32>
    %cst_35 = arith.constant 1.000000e+00 : f32
    %120 = vector.broadcast %cst_35 : f32 to vector<8x128xf32>
    %121 = arith.addf %120, %119 : vector<8x128xf32>
    %122 = arith.divf %120, %121 : vector<8x128xf32>
    %123 = vector.extract_strided_slice %114 {offsets = [0, 128], sizes = [8, 128], strides = [1, 1]} : vector<8x384xf32> to vector<8x128xf32>
    %124 = vector.extract_strided_slice %111 {offsets = [0, 128], sizes = [8, 128], strides = [1, 1]} : vector<8x384xf32> to vector<8x128xf32>
    %125 = arith.addf %123, %124 : vector<8x128xf32>
    %126 = arith.negf %125 : vector<8x128xf32>
    %127 = math.exp %126 : vector<8x128xf32>
    %cst_36 = arith.constant 1.000000e+00 : f32
    %128 = vector.broadcast %cst_36 : f32 to vector<8x128xf32>
    %129 = arith.addf %128, %127 : vector<8x128xf32>
    %130 = arith.divf %128, %129 : vector<8x128xf32>
    %131 = vector.extract_strided_slice %114 {offsets = [0, 256], sizes = [8, 128], strides = [1, 1]} : vector<8x384xf32> to vector<8x128xf32>
    %132 = vector.extract_strided_slice %111 {offsets = [0, 256], sizes = [8, 128], strides = [1, 1]} : vector<8x384xf32> to vector<8x128xf32>
    %133 = arith.mulf %122, %132 : vector<8x128xf32>
    %134 = arith.addf %131, %133 : vector<8x128xf32>
    %135 = math.tanh %134 : vector<8x128xf32>
    %136 = arith.subf %107, %135 : vector<8x128xf32>
    %137 = arith.mulf %130, %136 : vector<8x128xf32>
    %138 = arith.addf %135, %137 : vector<8x128xf32>
    %c4_i32 = arith.constant 4 : i32
    %139 = arith.truncf %138 : vector<8x128xf32> to vector<8x128xbf16>
    %cst_37 = arith.constant dense<0.000000e+00> : vector<8x384xf32>
    %140 = tpu.matmul %139, %12, %cst_37 {dimension_numbers = #tpu.dot_dimension_numbers<[1], [0], [0], [1], [0, 0, 1, 1], [], []>} : vector<8x128xbf16>, vector<128x384xbf16>, vector<8x384xf32> -> vector<8x384xf32>
    %141 = vector.broadcast %13 : vector<1x384xf32> to vector<8x384xf32>
    %142 = arith.addf %140, %141 : vector<8x384xf32>
    %143 = arith.index_cast %c4_i32 : i32 to index
    %c0_38 = arith.constant 0 : index
    %c0_39 = arith.constant 0 : index
    %144 = vector.load %arg18[%143, %c0_38, %c0_39] : memref<8x8x384xf32, #tpu.memory_space<vmem>>, vector<1x8x384xf32>
    %145 = vector.shape_cast %144 : vector<1x8x384xf32> to vector<8x384xf32>
    %146 = vector.extract_strided_slice %145 {offsets = [0, 0], sizes = [8, 128], strides = [1, 1]} : vector<8x384xf32> to vector<8x128xf32>
    %147 = vector.extract_strided_slice %142 {offsets = [0, 0], sizes = [8, 128], strides = [1, 1]} : vector<8x384xf32> to vector<8x128xf32>
    %148 = arith.addf %146, %147 : vector<8x128xf32>
    %149 = arith.negf %148 : vector<8x128xf32>
    %150 = math.exp %149 : vector<8x128xf32>
    %cst_40 = arith.constant 1.000000e+00 : f32
    %151 = vector.broadcast %cst_40 : f32 to vector<8x128xf32>
    %152 = arith.addf %151, %150 : vector<8x128xf32>
    %153 = arith.divf %151, %152 : vector<8x128xf32>
    %154 = vector.extract_strided_slice %145 {offsets = [0, 128], sizes = [8, 128], strides = [1, 1]} : vector<8x384xf32> to vector<8x128xf32>
    %155 = vector.extract_strided_slice %142 {offsets = [0, 128], sizes = [8, 128], strides = [1, 1]} : vector<8x384xf32> to vector<8x128xf32>
    %156 = arith.addf %154, %155 : vector<8x128xf32>
    %157 = arith.negf %156 : vector<8x128xf32>
    %158 = math.exp %157 : vector<8x128xf32>
    %cst_41 = arith.constant 1.000000e+00 : f32
    %159 = vector.broadcast %cst_41 : f32 to vector<8x128xf32>
    %160 = arith.addf %159, %158 : vector<8x128xf32>
    %161 = arith.divf %159, %160 : vector<8x128xf32>
    %162 = vector.extract_strided_slice %145 {offsets = [0, 256], sizes = [8, 128], strides = [1, 1]} : vector<8x384xf32> to vector<8x128xf32>
    %163 = vector.extract_strided_slice %142 {offsets = [0, 256], sizes = [8, 128], strides = [1, 1]} : vector<8x384xf32> to vector<8x128xf32>
    %164 = arith.mulf %153, %163 : vector<8x128xf32>
    %165 = arith.addf %162, %164 : vector<8x128xf32>
    %166 = math.tanh %165 : vector<8x128xf32>
    %167 = arith.subf %138, %166 : vector<8x128xf32>
    %168 = arith.mulf %161, %167 : vector<8x128xf32>
    %169 = arith.addf %166, %168 : vector<8x128xf32>
    %c5_i32 = arith.constant 5 : i32
    %170 = arith.truncf %169 : vector<8x128xf32> to vector<8x128xbf16>
    %cst_42 = arith.constant dense<0.000000e+00> : vector<8x384xf32>
    %171 = tpu.matmul %170, %12, %cst_42 {dimension_numbers = #tpu.dot_dimension_numbers<[1], [0], [0], [1], [0, 0, 1, 1], [], []>} : vector<8x128xbf16>, vector<128x384xbf16>, vector<8x384xf32> -> vector<8x384xf32>
    %172 = vector.broadcast %13 : vector<1x384xf32> to vector<8x384xf32>
    %173 = arith.addf %171, %172 : vector<8x384xf32>
    %174 = arith.index_cast %c5_i32 : i32 to index
    %c0_43 = arith.constant 0 : index
    %c0_44 = arith.constant 0 : index
    %175 = vector.load %arg18[%174, %c0_43, %c0_44] : memref<8x8x384xf32, #tpu.memory_space<vmem>>, vector<1x8x384xf32>
    %176 = vector.shape_cast %175 : vector<1x8x384xf32> to vector<8x384xf32>
    %177 = vector.extract_strided_slice %176 {offsets = [0, 0], sizes = [8, 128], strides = [1, 1]} : vector<8x384xf32> to vector<8x128xf32>
    %178 = vector.extract_strided_slice %173 {offsets = [0, 0], sizes = [8, 128], strides = [1, 1]} : vector<8x384xf32> to vector<8x128xf32>
    %179 = arith.addf %177, %178 : vector<8x128xf32>
    %180 = arith.negf %179 : vector<8x128xf32>
    %181 = math.exp %180 : vector<8x128xf32>
    %cst_45 = arith.constant 1.000000e+00 : f32
    %182 = vector.broadcast %cst_45 : f32 to vector<8x128xf32>
    %183 = arith.addf %182, %181 : vector<8x128xf32>
    %184 = arith.divf %182, %183 : vector<8x128xf32>
    %185 = vector.extract_strided_slice %176 {offsets = [0, 128], sizes = [8, 128], strides = [1, 1]} : vector<8x384xf32> to vector<8x128xf32>
    %186 = vector.extract_strided_slice %173 {offsets = [0, 128], sizes = [8, 128], strides = [1, 1]} : vector<8x384xf32> to vector<8x128xf32>
    %187 = arith.addf %185, %186 : vector<8x128xf32>
    %188 = arith.negf %187 : vector<8x128xf32>
    %189 = math.exp %188 : vector<8x128xf32>
    %cst_46 = arith.constant 1.000000e+00 : f32
    %190 = vector.broadcast %cst_46 : f32 to vector<8x128xf32>
    %191 = arith.addf %190, %189 : vector<8x128xf32>
    %192 = arith.divf %190, %191 : vector<8x128xf32>
    %193 = vector.extract_strided_slice %176 {offsets = [0, 256], sizes = [8, 128], strides = [1, 1]} : vector<8x384xf32> to vector<8x128xf32>
    %194 = vector.extract_strided_slice %173 {offsets = [0, 256], sizes = [8, 128], strides = [1, 1]} : vector<8x384xf32> to vector<8x128xf32>
    %195 = arith.mulf %184, %194 : vector<8x128xf32>
    %196 = arith.addf %193, %195 : vector<8x128xf32>
    %197 = math.tanh %196 : vector<8x128xf32>
    %198 = arith.subf %169, %197 : vector<8x128xf32>
    %199 = arith.mulf %192, %198 : vector<8x128xf32>
    %200 = arith.addf %197, %199 : vector<8x128xf32>
    %c6_i32 = arith.constant 6 : i32
    %201 = arith.truncf %200 : vector<8x128xf32> to vector<8x128xbf16>
    %cst_47 = arith.constant dense<0.000000e+00> : vector<8x384xf32>
    %202 = tpu.matmul %201, %12, %cst_47 {dimension_numbers = #tpu.dot_dimension_numbers<[1], [0], [0], [1], [0, 0, 1, 1], [], []>} : vector<8x128xbf16>, vector<128x384xbf16>, vector<8x384xf32> -> vector<8x384xf32>
    %203 = vector.broadcast %13 : vector<1x384xf32> to vector<8x384xf32>
    %204 = arith.addf %202, %203 : vector<8x384xf32>
    %205 = arith.index_cast %c6_i32 : i32 to index
    %c0_48 = arith.constant 0 : index
    %c0_49 = arith.constant 0 : index
    %206 = vector.load %arg18[%205, %c0_48, %c0_49] : memref<8x8x384xf32, #tpu.memory_space<vmem>>, vector<1x8x384xf32>
    %207 = vector.shape_cast %206 : vector<1x8x384xf32> to vector<8x384xf32>
    %208 = vector.extract_strided_slice %207 {offsets = [0, 0], sizes = [8, 128], strides = [1, 1]} : vector<8x384xf32> to vector<8x128xf32>
    %209 = vector.extract_strided_slice %204 {offsets = [0, 0], sizes = [8, 128], strides = [1, 1]} : vector<8x384xf32> to vector<8x128xf32>
    %210 = arith.addf %208, %209 : vector<8x128xf32>
    %211 = arith.negf %210 : vector<8x128xf32>
    %212 = math.exp %211 : vector<8x128xf32>
    %cst_50 = arith.constant 1.000000e+00 : f32
    %213 = vector.broadcast %cst_50 : f32 to vector<8x128xf32>
    %214 = arith.addf %213, %212 : vector<8x128xf32>
    %215 = arith.divf %213, %214 : vector<8x128xf32>
    %216 = vector.extract_strided_slice %207 {offsets = [0, 128], sizes = [8, 128], strides = [1, 1]} : vector<8x384xf32> to vector<8x128xf32>
    %217 = vector.extract_strided_slice %204 {offsets = [0, 128], sizes = [8, 128], strides = [1, 1]} : vector<8x384xf32> to vector<8x128xf32>
    %218 = arith.addf %216, %217 : vector<8x128xf32>
    %219 = arith.negf %218 : vector<8x128xf32>
    %220 = math.exp %219 : vector<8x128xf32>
    %cst_51 = arith.constant 1.000000e+00 : f32
    %221 = vector.broadcast %cst_51 : f32 to vector<8x128xf32>
    %222 = arith.addf %221, %220 : vector<8x128xf32>
    %223 = arith.divf %221, %222 : vector<8x128xf32>
    %224 = vector.extract_strided_slice %207 {offsets = [0, 256], sizes = [8, 128], strides = [1, 1]} : vector<8x384xf32> to vector<8x128xf32>
    %225 = vector.extract_strided_slice %204 {offsets = [0, 256], sizes = [8, 128], strides = [1, 1]} : vector<8x384xf32> to vector<8x128xf32>
    %226 = arith.mulf %215, %225 : vector<8x128xf32>
    %227 = arith.addf %224, %226 : vector<8x128xf32>
    %228 = math.tanh %227 : vector<8x128xf32>
    %229 = arith.subf %200, %228 : vector<8x128xf32>
    %230 = arith.mulf %223, %229 : vector<8x128xf32>
    %231 = arith.addf %228, %230 : vector<8x128xf32>
    %c7_i32 = arith.constant 7 : i32
    %232 = arith.truncf %231 : vector<8x128xf32> to vector<8x128xbf16>
    %cst_52 = arith.constant dense<0.000000e+00> : vector<8x384xf32>
    %233 = tpu.matmul %232, %12, %cst_52 {dimension_numbers = #tpu.dot_dimension_numbers<[1], [0], [0], [1], [0, 0, 1, 1], [], []>} : vector<8x128xbf16>, vector<128x384xbf16>, vector<8x384xf32> -> vector<8x384xf32>
    %234 = vector.broadcast %13 : vector<1x384xf32> to vector<8x384xf32>
    %235 = arith.addf %233, %234 : vector<8x384xf32>
    %236 = arith.index_cast %c7_i32 : i32 to index
    %c0_53 = arith.constant 0 : index
    %c0_54 = arith.constant 0 : index
    %237 = vector.load %arg18[%236, %c0_53, %c0_54] : memref<8x8x384xf32, #tpu.memory_space<vmem>>, vector<1x8x384xf32>
    %238 = vector.shape_cast %237 : vector<1x8x384xf32> to vector<8x384xf32>
    %239 = vector.extract_strided_slice %238 {offsets = [0, 0], sizes = [8, 128], strides = [1, 1]} : vector<8x384xf32> to vector<8x128xf32>
    %240 = vector.extract_strided_slice %235 {offsets = [0, 0], sizes = [8, 128], strides = [1, 1]} : vector<8x384xf32> to vector<8x128xf32>
    %241 = arith.addf %239, %240 : vector<8x128xf32>
    %242 = arith.negf %241 : vector<8x128xf32>
    %243 = math.exp %242 : vector<8x128xf32>
    %cst_55 = arith.constant 1.000000e+00 : f32
    %244 = vector.broadcast %cst_55 : f32 to vector<8x128xf32>
    %245 = arith.addf %244, %243 : vector<8x128xf32>
    %246 = arith.divf %244, %245 : vector<8x128xf32>
    %247 = vector.extract_strided_slice %238 {offsets = [0, 128], sizes = [8, 128], strides = [1, 1]} : vector<8x384xf32> to vector<8x128xf32>
    %248 = vector.extract_strided_slice %235 {offsets = [0, 128], sizes = [8, 128], strides = [1, 1]} : vector<8x384xf32> to vector<8x128xf32>
    %249 = arith.addf %247, %248 : vector<8x128xf32>
    %250 = arith.negf %249 : vector<8x128xf32>
    %251 = math.exp %250 : vector<8x128xf32>
    %cst_56 = arith.constant 1.000000e+00 : f32
    %252 = vector.broadcast %cst_56 : f32 to vector<8x128xf32>
    %253 = arith.addf %252, %251 : vector<8x128xf32>
    %254 = arith.divf %252, %253 : vector<8x128xf32>
    %255 = vector.extract_strided_slice %238 {offsets = [0, 256], sizes = [8, 128], strides = [1, 1]} : vector<8x384xf32> to vector<8x128xf32>
    %256 = vector.extract_strided_slice %235 {offsets = [0, 256], sizes = [8, 128], strides = [1, 1]} : vector<8x384xf32> to vector<8x128xf32>
    %257 = arith.mulf %246, %256 : vector<8x128xf32>
    %258 = arith.addf %255, %257 : vector<8x128xf32>
    %259 = math.tanh %258 : vector<8x128xf32>
    %260 = arith.subf %231, %259 : vector<8x128xf32>
    %261 = arith.mulf %254, %260 : vector<8x128xf32>
    %262 = arith.addf %259, %261 : vector<8x128xf32>
    %c8_i32 = arith.constant 8 : i32
    %c0_57 = arith.constant 0 : index
    %c0_58 = arith.constant 0 : index
    %263 = vector.load %arg17[%c0_57, %c0_58] : memref<8x128xf32, #tpu.memory_space<vmem>>, vector<8x128xf32>
    tpu.vector_store %arg17[%c0_57, %c0_58], %262 {strides = array<i32>} : memref<8x128xf32, #tpu.memory_space<vmem>>, vector<8x128xf32>,
    %c0_i32_59 = arith.constant 0 : i32
    %264 = arith.cmpi eq, %arg1, %c0_i32_59 : i32
    %265 = arith.extui %264 : i1 to i32
    %c0_i32_60 = arith.constant 0 : i32
    %266 = arith.cmpi ne, %265, %c0_i32_60 : i32
    scf.if %266 {
      %c0_61 = arith.constant 0 : index
      %c0_62 = arith.constant 0 : index
      %267 = vector.load %arg13[%c0_61, %c0_62] : memref<8x128xf32, #tpu.memory_space<vmem>>, vector<8x128xf32>
      %c0_63 = arith.constant 0 : index
      %c0_64 = arith.constant 0 : index
      %268 = vector.load %arg11[%c0_63, %c0_64] : memref<128x384xbf16, #tpu.memory_space<vmem>>, vector<128x384xbf16>
      %c0_65 = arith.constant 0 : index
      %c0_66 = arith.constant 0 : index
      %269 = vector.load %arg8[%c0_65, %c0_66] : memref<8x128xbf16, #tpu.memory_space<vmem>>, vector<8x128xbf16>
      %c0_67 = arith.constant 0 : index
      %c0_68 = arith.constant 0 : index
      %270 = vector.load %arg9[%c0_67, %c0_68] : memref<128x384xbf16, #tpu.memory_space<vmem>>, vector<128x384xbf16>
      %cst_69 = arith.constant dense<0.000000e+00> : vector<8x384xf32>
      %271 = tpu.matmul %269, %270, %cst_69 {dimension_numbers = #tpu.dot_dimension_numbers<[1], [0], [0], [1], [0, 0, 1, 1], [], []>} : vector<8x128xbf16>, vector<128x384xbf16>, vector<8x384xf32> -> vector<8x384xf32>
      %c0_70 = arith.constant 0 : index
      %c0_71 = arith.constant 0 : index
      %272 = vector.load %arg10[%c0_70, %c0_71] : memref<1x384xf32, #tpu.memory_space<vmem>>, vector<1x384xf32>
      %273 = vector.broadcast %272 : vector<1x384xf32> to vector<8x384xf32>
      %274 = arith.addf %271, %273 : vector<8x384xf32>
      %275 = arith.truncf %267 : vector<8x128xf32> to vector<8x128xbf16>
      %cst_72 = arith.constant dense<0.000000e+00> : vector<8x384xf32>
      %276 = tpu.matmul %275, %268, %cst_72 {dimension_numbers = #tpu.dot_dimension_numbers<[1], [0], [0], [1], [0, 0, 1, 1], [], []>} : vector<8x128xbf16>, vector<128x384xbf16>, vector<8x384xf32> -> vector<8x384xf32>
      %c0_73 = arith.constant 0 : index
      %c0_74 = arith.constant 0 : index
      %277 = vector.load %arg12[%c0_73, %c0_74] : memref<1x384xf32, #tpu.memory_space<vmem>>, vector<1x384xf32>
      %278 = vector.broadcast %277 : vector<1x384xf32> to vector<8x384xf32>
      %279 = arith.addf %276, %278 : vector<8x384xf32>
      %280 = vector.extract_strided_slice %274 {offsets = [0, 0], sizes = [8, 128], strides = [1, 1]} : vector<8x384xf32> to vector<8x128xf32>
      %281 = vector.extract_strided_slice %279 {offsets = [0, 0], sizes = [8, 128], strides = [1, 1]} : vector<8x384xf32> to vector<8x128xf32>
      %282 = arith.addf %280, %281 : vector<8x128xf32>
      %283 = arith.negf %282 : vector<8x128xf32>
      %284 = math.exp %283 : vector<8x128xf32>
      %cst_75 = arith.constant 1.000000e+00 : f32
      %285 = vector.broadcast %cst_75 : f32 to vector<8x128xf32>
      %286 = arith.addf %285, %284 : vector<8x128xf32>
      %287 = arith.divf %285, %286 : vector<8x128xf32>
      %288 = vector.extract_strided_slice %274 {offsets = [0, 128], sizes = [8, 128], strides = [1, 1]} : vector<8x384xf32> to vector<8x128xf32>
      %289 = vector.extract_strided_slice %279 {offsets = [0, 128], sizes = [8, 128], strides = [1, 1]} : vector<8x384xf32> to vector<8x128xf32>
      %290 = arith.addf %288, %289 : vector<8x128xf32>
      %291 = arith.negf %290 : vector<8x128xf32>
      %292 = math.exp %291 : vector<8x128xf32>
      %cst_76 = arith.constant 1.000000e+00 : f32
      %293 = vector.broadcast %cst_76 : f32 to vector<8x128xf32>
      %294 = arith.addf %293, %292 : vector<8x128xf32>
      %295 = arith.divf %293, %294 : vector<8x128xf32>
      %296 = vector.extract_strided_slice %274 {offsets = [0, 256], sizes = [8, 128], strides = [1, 1]} : vector<8x384xf32> to vector<8x128xf32>
      %297 = vector.extract_strided_slice %279 {offsets = [0, 256], sizes = [8, 128], strides = [1, 1]} : vector<8x384xf32> to vector<8x128xf32>
      %298 = arith.mulf %287, %297 : vector<8x128xf32>
      %299 = arith.addf %296, %298 : vector<8x128xf32>
      %300 = math.tanh %299 : vector<8x128xf32>
      %301 = arith.subf %267, %300 : vector<8x128xf32>
      %302 = arith.mulf %295, %301 : vector<8x128xf32>
      %303 = arith.addf %300, %302 : vector<8x128xf32>
      %c0_77 = arith.constant 0 : index
      %c0_78 = arith.constant 0 : index
      %304 = vector.load %arg14[%c0_77, %c0_78] : memref<256x128xbf16, #tpu.memory_space<vmem>>, vector<128x128xbf16>
      %c128 = arith.constant 128 : index
      %c0_79 = arith.constant 0 : index
      %305 = vector.load %arg14[%c128, %c0_79] : memref<256x128xbf16, #tpu.memory_space<vmem>>, vector<128x128xbf16>
      %306 = arith.truncf %262 : vector<8x128xf32> to vector<8x128xbf16>
      %cst_80 = arith.constant dense<0.000000e+00> : vector<8x128xf32>
      %307 = tpu.matmul %306, %304, %cst_80 {dimension_numbers = #tpu.dot_dimension_numbers<[1], [0], [0], [1], [0, 0, 1, 1], [], []>} : vector<8x128xbf16>, vector<128x128xbf16>, vector<8x128xf32> -> vector<8x128xf32>
      %308 = arith.truncf %303 : vector<8x128xf32> to vector<8x128xbf16>
      %cst_81 = arith.constant dense<0.000000e+00> : vector<8x128xf32>
      %309 = tpu.matmul %308, %305, %cst_81 {dimension_numbers = #tpu.dot_dimension_numbers<[1], [0], [0], [1], [0, 0, 1, 1], [], []>} : vector<8x128xbf16>, vector<128x128xbf16>, vector<8x128xf32> -> vector<8x128xf32>
      %310 = arith.addf %307, %309 : vector<8x128xf32>
      %c0_82 = arith.constant 0 : index
      %c0_83 = arith.constant 0 : index
      %311 = vector.load %arg15[%c0_82, %c0_83] : memref<1x128xf32, #tpu.memory_space<vmem>>, vector<1x128xf32>
      %312 = vector.broadcast %311 : vector<1x128xf32> to vector<8x128xf32>
      %313 = arith.addf %310, %312 : vector<8x128xf32>
      %c0_84 = arith.constant 0 : index
      %c0_85 = arith.constant 0 : index
      %314 = vector.load %arg16[%c0_84, %c0_85] : memref<8x128xf32, #tpu.memory_space<vmem>>, vector<8x128xf32>
      tpu.vector_store %arg16[%c0_84, %c0_85], %313 {strides = array<i32>} : memref<8x128xf32, #tpu.memory_space<vmem>>, vector<8x128xf32>,
    } else {
    }
    return
  }
  func.func @transform_0(%arg0: i32, %arg1: i32) -> (i32, i32, i32) {
    %c0_i32 = arith.constant 0 : i32
    %c0_i32_0 = arith.constant 0 : i32
    return %arg1, %arg0, %c0_i32 : i32, i32, i32
  }
  func.func @transform_1(%arg0: i32, %arg1: i32) -> (i32, i32) {
    %c0_i32 = arith.constant 0 : i32
    %c0_i32_0 = arith.constant 0 : i32
    %c0_i32_1 = arith.constant 0 : i32
    return %c0_i32, %c0_i32_0 : i32, i32
  }
  func.func @transform_2(%arg0: i32, %arg1: i32) -> (i32, i32) {
    %c0_i32 = arith.constant 0 : i32
    %c0_i32_0 = arith.constant 0 : i32
    %c0_i32_1 = arith.constant 0 : i32
    return %c0_i32, %c0_i32_0 : i32, i32
  }
  func.func @transform_3(%arg0: i32, %arg1: i32) -> (i32, i32) {
    %c0_i32 = arith.constant 0 : i32
    %c0_i32_0 = arith.constant 0 : i32
    %c0_i32_1 = arith.constant 0 : i32
    return %c0_i32, %c0_i32_0 : i32, i32
  }
  func.func @transform_4(%arg0: i32, %arg1: i32) -> (i32, i32) {
    %c0_i32 = arith.constant 0 : i32
    %c0_i32_0 = arith.constant 0 : i32
    %c0_i32_1 = arith.constant 0 : i32
    return %c0_i32, %c0_i32_0 : i32, i32
  }
  func.func @transform_5(%arg0: i32, %arg1: i32) -> (i32, i32) {
    %c0_i32 = arith.constant 0 : i32
    %c0_i32_0 = arith.constant 0 : i32
    return %arg0, %c0_i32 : i32, i32
  }
  func.func @transform_6(%arg0: i32, %arg1: i32) -> (i32, i32) {
    %c0_i32 = arith.constant 0 : i32
    %c0_i32_0 = arith.constant 0 : i32
    return %arg0, %c0_i32 : i32, i32
  }
  func.func @transform_7(%arg0: i32, %arg1: i32) -> (i32, i32) {
    %c0_i32 = arith.constant 0 : i32
    %c0_i32_0 = arith.constant 0 : i32
    %c0_i32_1 = arith.constant 0 : i32
    return %c0_i32, %c0_i32_0 : i32, i32
  }
  func.func @transform_8(%arg0: i32, %arg1: i32) -> (i32, i32) {
    %c0_i32 = arith.constant 0 : i32
    %c0_i32_0 = arith.constant 0 : i32
    %c0_i32_1 = arith.constant 0 : i32
    return %c0_i32, %c0_i32_0 : i32, i32
  }
  func.func @transform_9(%arg0: i32, %arg1: i32) -> (i32, i32) {
    %c0_i32 = arith.constant 0 : i32
    %c0_i32_0 = arith.constant 0 : i32
    %c0_i32_1 = arith.constant 0 : i32
    return %c0_i32, %c0_i32_0 : i32, i32
  }
  func.func @transform_10(%arg0: i32, %arg1: i32) -> (i32, i32) {
    %c0_i32 = arith.constant 0 : i32
    %c0_i32_0 = arith.constant 0 : i32
    %c0_i32_1 = arith.constant 0 : i32
    return %c0_i32, %c0_i32_0 : i32, i32
  }
  func.func @transform_11(%arg0: i32, %arg1: i32) -> (i32, i32) {
    %c0_i32 = arith.constant 0 : i32
    %c0_i32_0 = arith.constant 0 : i32
    return %arg0, %c0_i32 : i32, i32
  }
  func.func @transform_12(%arg0: i32, %arg1: i32) -> (i32, i32) {
    %c0_i32 = arith.constant 0 : i32
    %c0_i32_0 = arith.constant 0 : i32
    %c0_i32_1 = arith.constant 0 : i32
    return %c0_i32, %c0_i32_0 : i32, i32
  }
  func.func @transform_13(%arg0: i32, %arg1: i32) -> (i32, i32) {
    %c0_i32 = arith.constant 0 : i32
    %c0_i32_0 = arith.constant 0 : i32
    %c0_i32_1 = arith.constant 0 : i32
    return %c0_i32, %c0_i32_0 : i32, i32
  }
  func.func @transform_14(%arg0: i32, %arg1: i32) -> (i32, i32) {
    %c0_i32 = arith.constant 0 : i32
    %c0_i32_0 = arith.constant 0 : i32
    return %arg0, %c0_i32 : i32, i32
  }
}

</mosaic_0001>

<bundles_post_ra>
// kernel: tpu_custom_call.1
= control target key start
LH: loop header
LB: loop body
LE: loop exit
PB: predicated region body
PF: predicated region fallthrough
CT: control target
= control target key end

     0   :  { %19 = vsyncpa [#allocation5], 0  ;;  %s4167_s0 = inlined_call_operand.hbm [shape: bf16[8,8,128], index: 0, kind: input, shape index: {}]   ;;  %s4168_s1 = inlined_call_operand.hbm [shape: bf16[128,384], index: 1, kind: input, shape index: {}]   ;;  %s4169_s2 = inlined_call_operand.hbm [shape: f32[1,384], index: 2, kind: input, shape index: {}]   ;;  %s4170_s3 = inlined_call_operand.hbm [shape: bf16[128,384], index: 3, kind: input, shape index: {}]   ;;  %s4171_s4 = inlined_call_operand.hbm [shape: f32[1,384], index: 4, kind: input, shape index: {}]   ;;  %s4172_s5 = inlined_call_operand.vmem [shape: f32[8,128], index: 5, kind: input, shape index: {}]   ;;  %s4173_s6 = inlined_call_operand.vmem [shape: bf16[8,128], index: 6, kind: input, shape index: {}]   ;;  %s4174_s7 = inlined_call_operand.hbm [shape: bf16[128,384], index: 7, kind: input, shape index: {}]   ;;  %s4175_s8 = inlined_call_operand.vmem [shape: f32[1,384], index: 8, kind: input, shape index: {}]   ;;  %s4176_s9 = inlined_call_operand.hbm [shape: bf16[128,384], index: 9, kind: input, shape index: {}]   ;;  %s4177_s10 = inlined_call_operand.vmem [shape: f32[1,384], index: 10, kind: input, shape index: {}]   ;;  %s4178_s11 = inlined_call_operand.vmem [shape: f32[8,128], index: 11, kind: input, shape index: {}]   ;;  %s4179_s12 = inlined_call_operand.hbm [shape: bf16[256,128], index: 12, kind: input, shape index: {}]   ;;  %s4180_s13 = inlined_call_operand.vmem [shape: f32[1,128], index: 13, kind: input, shape index: {}]   ;;  %s4181_s14 = inlined_call_operand.hbm [shape: f32[8,128], index: 14, kind: output, shape index: {}]  }
   0x1   :  { %20 = vsyncpa [#allocation8], 0 }
   0x2   :  { %21 = vsyncpa [#allocation11], 0 }
   0x3   :  { %22 = vsyncpa [#allocation14], 0 }
   0x4   :  { %23 = vsyncpa [#allocation17], 0 }
   0x5   :  { %24 = vsyncpa [#allocation6], 0  ;;  %s3352_s29 = smov [#allocation7]   ;;  %s3142_s17 = scalar_lea.hbm %s4168_s1, 3072 }
   0x6   :  { %s42_s30 = sshll.u32 %s3352_s29, 4  ;;  %p3143_p0 = scmp.ne.s32.totalorder %s4168_s1, %s3142_s17  ;;  %s43_s30 = int_to_ptr.vmem [resolvable:$true] %s42_s30 }
   0x7   :  { %p3146_p1 = scmp.lt.u32.totalorder %s3142_s17, %s4168_s1 }
   0x9   :  { %p3148_p2 = pnand %p3146_p1, %p3143_p0 }
   0xb   :  { %3151 = shalt.err (!%p3148_p2)
}
   0xc   :  { %s3152_s22 = scalar_lea.vmem %s43_s30, 3072  ;;  %p3157_p4 = scmp.lt.s32.totalorder %s43_s30, %s43_s30 }
   0xd   :  { %p3153_p3 = scmp.ne.s32.totalorder %s43_s30, %s3152_s22  ;;  %p3158_p5 = scmp.lt.s32.totalorder %s3152_s22, %s3152_s22 }
   0xf   :  { %p3159_p6 = por %p3158_p5, %p3157_p4 }
  0x11   :  { %p3160_p7 = pnand %p3159_p6, %p3153_p3 }
  0x13   :  { %3163 = shalt.err (!%p3160_p7)
}
  0x14   :  { %s3353_s23 = smov 192   ;;  %s3354_s24 = smov 12  }
  0x15   :  { %48 = dma.hbm_to_vmem [thread:$0]  %s4168_s1, 3072, %s43_s30, [#allocation8], %s3353_s23, %s3353_s23, %s3354_s24  }
  0x16   :  { %s3355_s27 = smov [#allocation10]   ;;  %s3356_s29 = smov [#allocation13]  }
  0x17   :  { %s64_s28 = sshll.u32 %s3355_s27, 4  ;;  %s90_s15 = sshll.u32 %s3356_s29, 4  ;;  %s65_s28 = int_to_ptr.vmem [resolvable:$true] %s64_s28  ;;  %s91_s15 = int_to_ptr.vmem [resolvable:$true] %s90_s15 }
  0x18   :  { %s3164_s18 = scalar_lea.hbm %s4170_s3, 3072 }
  0x19   :  { %p3165_p8 = scmp.ne.s32.totalorder %s4170_s3, %s3164_s18  ;;  %p3168_p9 = scmp.lt.u32.totalorder %s3164_s18, %s4170_s3 }
  0x1b   :  { %p3170_p10 = pnand %p3168_p9, %p3165_p8 }
  0x1d   :  { %3173 = shalt.err (!%p3170_p10)
}
  0x1e   :  { %s3174_s1 = scalar_lea.vmem %s65_s28, 3072  ;;  %p3179_p12 = scmp.lt.s32.totalorder %s65_s28, %s65_s28 }
  0x1f   :  { %p3175_p11 = scmp.ne.s32.totalorder %s65_s28, %s3174_s1  ;;  %p3180_p13 = scmp.lt.s32.totalorder %s3174_s1, %s3174_s1 }
  0x21   :  { %p3181_p0 = por %p3180_p13, %p3179_p12 }
  0x23   :  { %p3182_p1 = pnand %p3181_p0, %p3175_p11 }
  0x25   :  { %3185 = shalt.err (!%p3182_p1)
}
  0x26   :  { %70 = dma.hbm_to_vmem [thread:$0]  %s4170_s3, 3072, %s65_s28, [#allocation11], %s3353_s23, %s3353_s23, %s3354_s24  }
  0x27   :  { %s3186_s29 = scalar_lea.hbm %s4174_s7, 3072 }
  0x28   :  { %p3187_p2 = scmp.ne.s32.totalorder %s4174_s7, %s3186_s29  ;;  %p3190_p3 = scmp.lt.u32.totalorder %s3186_s29, %s4174_s7 }
  0x2a   :  { %p3192_p4 = pnand %p3190_p3, %p3187_p2 }
  0x2c   :  { %3195 = shalt.err (!%p3192_p4)
}
  0x2d   :  { %s3196_s20 = scalar_lea.vmem %s91_s15, 3072  ;;  %p3201_p6 = scmp.lt.s32.totalorder %s91_s15, %s91_s15 }
  0x2e   :  { %p3197_p5 = scmp.ne.s32.totalorder %s91_s15, %s3196_s20  ;;  %p3202_p7 = scmp.lt.s32.totalorder %s3196_s20, %s3196_s20 }
  0x30   :  { %p3203_p8 = por %p3202_p7, %p3201_p6 }
  0x32   :  { %p3204_p9 = pnand %p3203_p8, %p3197_p5 }
  0x34   :  { %3207 = shalt.err (!%p3204_p9)
}
  0x35   :  { %96 = dma.hbm_to_vmem [thread:$0]  %s4174_s7, 3072, %s91_s15, [#allocation14], %s3353_s23, %s3353_s23, %s3354_s24  }
  0x36   :  { %s3357_s21 = smov [#allocation4]   ;;  %s3208_s25 = scalar_lea.hbm %s4167_s0, 512 }
  0x37   :  { %s30_s22 = sshll.u32 %s3357_s21, 4  ;;  %p3209_p10 = scmp.ne.s32.totalorder %s4167_s0, %s3208_s25  ;;  %s31_s22 = int_to_ptr.vmem [resolvable:$true] %s30_s22 }
  0x38   :  { %p3212_p11 = scmp.lt.u32.totalorder %s3208_s25, %s4167_s0 }
  0x3a   :  { %p3214_p12 = pnand %p3212_p11, %p3209_p10 }
  0x3c   :  { %3217 = shalt.err (!%p3214_p12)
}
  0x3d   :  { %s3218_s17 = scalar_lea.vmem %s31_s22, 512  ;;  %p3223_p0 = scmp.lt.s32.totalorder %s31_s22, %s31_s22 }
  0x3e   :  { %p3219_p13 = scmp.ne.s32.totalorder %s31_s22, %s3218_s17  ;;  %p3224_p1 = scmp.lt.s32.totalorder %s3218_s17, %s3218_s17 }
  0x40   :  { %p3225_p2 = por %p3224_p1, %p3223_p0 }
  0x42   :  { %p3226_p3 = pnand %p3225_p2, %p3219_p13 }
  0x44   :  { %3229 = shalt.err (!%p3226_p3)
}
  0x45   :  { %s3358_s7 = smov 64   ;;  %s3359_s15 = smov 4  }
  0x46   :  { %36 = dma.hbm_to_vmem [thread:$0]  %s4167_s0, 512, %s31_s22, [#allocation5], %s3358_s7, %s3358_s7, %s3359_s15  }
  0x47   :  { %s3360_s20 = smov [#allocation9]   ;;  %s3361_s28 = smov [#allocation12]  }
  0x48   :  { %s55_s3 = sshll.u32 %s3360_s20, 4  ;;  %s77_s21 = sshll.u32 %s3361_s28, 4  ;;  %s56_s3 = int_to_ptr.vmem [resolvable:$true] %s55_s3  ;;  %s78_s21 = int_to_ptr.vmem [resolvable:$true] %s77_s21 }
  0x49   :  { %s3230_s25 = scalar_lea.hbm %s4169_s2, 48 }
  0x4a   :  { %p3231_p4 = scmp.ne.s32.totalorder %s4169_s2, %s3230_s25  ;;  %p3234_p5 = scmp.lt.u32.totalorder %s3230_s25, %s4169_s2 }
  0x4c   :  { %p3236_p6 = pnand %p3234_p5, %p3231_p4 }
  0x4e   :  { %3239 = shalt.err (!%p3236_p6)
}
  0x4f   :  { %s3240_s0 = scalar_lea.vmem %s56_s3, 48  ;;  %s3244_s22 = scalar_lea.vmem %s56_s3, 64 }
  0x50   :  { %p3241_p7 = scmp.ne.s32.totalorder %s56_s3, %s3240_s0  ;;  %p3245_p8 = scmp.lt.s32.totalorder %s56_s3, %s56_s3 }
  0x51   :  { %p3246_p9 = scmp.lt.s32.totalorder %s3244_s22, %s3240_s0 }
  0x53   :  { %p3247_p10 = por %p3246_p9, %p3245_p8 }
  0x55   :  { %p3248_p11 = pnand %p3247_p10, %p3241_p7 }
  0x57   :  { %3251 = shalt.err (!%p3248_p11)
}
  0x58   :  { %58 = dma.hbm_to_vmem [thread:$0]  %s4169_s2, 48, %s56_s3, [#allocation8]  }
  0x59   :  { %s3252_s28 = scalar_lea.hbm %s4171_s4, 48 }
  0x5a   :  { %p3253_p12 = scmp.ne.s32.totalorder %s4171_s4, %s3252_s28  ;;  %p3256_p13 = scmp.lt.u32.totalorder %s3252_s28, %s4171_s4 }
  0x5c   :  { %p3258_p0 = pnand %p3256_p13, %p3253_p12 }
  0x5e   :  { %3261 = shalt.err (!%p3258_p0)
}
  0x5f   :  { %s3262_s27 = scalar_lea.vmem %s78_s21, 48  ;;  %s3266_s29 = scalar_lea.vmem %s78_s21, 64 }
  0x60   :  { %p3263_p1 = scmp.ne.s32.totalorder %s78_s21, %s3262_s27  ;;  %p3267_p2 = scmp.lt.s32.totalorder %s78_s21, %s78_s21 }
  0x61   :  { %p3268_p3 = scmp.lt.s32.totalorder %s3266_s29, %s3262_s27 }
  0x63   :  { %p3269_p4 = por %p3268_p3, %p3267_p2 }
  0x65   :  { %p3270_p5 = pnand %p3269_p4, %p3263_p1 }
  0x67   :  { %3273 = shalt.err (!%p3270_p5)
}
  0x68   :  { %80 = dma.hbm_to_vmem [thread:$0]  %s4171_s4, 48, %s78_s21, [#allocation11]  }
  0x69   :  { %s3362_s16 = smov [#allocation15]   ;;  %s3363_s22 = smov [#allocation16]  }
  0x6a   :  { %s104_s0 = sshll.u32 %s3362_s16, 4  ;;  %s120_s17 = sshll.u32 %s3363_s22, 4  ;;  %s105_s0 = int_to_ptr.vmem [resolvable:$true] %s104_s0  ;;  %s3527_s17 = int_to_ptr.vmem [resolvable:$true] %s120_s17 }
  0x6b   :  { %s3274_s20 = scalar_lea.hbm %s4176_s9, 3072 }
  0x6c   :  { %p3275_p6 = scmp.ne.s32.totalorder %s4176_s9, %s3274_s20  ;;  %p3278_p7 = scmp.lt.u32.totalorder %s3274_s20, %s4176_s9 }
  0x6e   :  { %p3280_p8 = pnand %p3278_p7, %p3275_p6 }
  0x70   :  { %3283 = shalt.err (!%p3280_p8)
}
  0x71   :  { %s3284_s4 = scalar_lea.vmem %s105_s0, 3072  ;;  %p3289_p10 = scmp.lt.s32.totalorder %s105_s0, %s105_s0 }
  0x72   :  { %p3285_p9 = scmp.ne.s32.totalorder %s105_s0, %s3284_s4  ;;  %p3290_p11 = scmp.lt.s32.totalorder %s3284_s4, %s3284_s4 }
  0x74   :  { %p3291_p12 = por %p3290_p11, %p3289_p10 }
  0x76   :  { %p3292_p13 = pnand %p3291_p12, %p3285_p9 }
  0x78   :  { %3295 = shalt.err (!%p3292_p13)
}
  0x79   :  { %110 = dma.hbm_to_vmem [thread:$0]  %s4176_s9, 3072, %s105_s0, [#allocation14], %s3353_s23, %s3353_s23, %s3354_s24  }
  0x7a   :  { %s3296_s2 = scalar_lea.hbm %s4179_s12, 2048 }
  0x7b   :  { %p3297_p0 = scmp.ne.s32.totalorder %s4179_s12, %s3296_s2  ;;  %p3300_p1 = scmp.lt.u32.totalorder %s3296_s2, %s4179_s12 }
  0x7d   :  { %p3302_p2 = pnand %p3300_p1, %p3297_p0 }
  0x7f   :  { %3305 = shalt.err (!%p3302_p2)
}
  0x80   :  { %s3306_s19 = scalar_lea.vmem %s3527_s17, 2048  ;;  %p3311_p4 = scmp.lt.s32.totalorder %s3527_s17, %s3527_s17 }
  0x81   :  { %p3307_p3 = scmp.ne.s32.totalorder %s3527_s17, %s3306_s19  ;;  %p3312_p5 = scmp.lt.s32.totalorder %s3306_s19, %s3306_s19 }
  0x83   :  { %p3313_p6 = por %p3312_p5, %p3311_p4 }
  0x85   :  { %p3314_p7 = pnand %p3313_p6, %p3307_p3 }
  0x87   :  { %3317 = shalt.err (!%p3314_p7)
}
  0x88   :  { %126 = dma.hbm_to_vmem [thread:$0]  %s4179_s12, 2048, %s3527_s17, [#allocation17], %s3358_s7, %s3358_s7, %s3359_s15  }
  0x89   :  { %3340 = dma.done.wait [#allocation5], 512  }
  0x8a   :  { %3341 = vsyncadd [#allocation5], 4294966784 }
  0x8b   :  { %3342 = dma.done.wait [#allocation8], 3120  }
  0x8c   :  { %3343 = vsyncadd [#allocation8], 4294964176 }
  0x8d   :  { %3344 = dma.done.wait [#allocation11], 3120  }
  0x8e   :  { %3345 = vsyncadd [#allocation11], 4294964176 }
  0x8f   :  { %3346 = dma.done.wait [#allocation14], 6144  }
  0x90   :  { %3347 = vsyncadd [#allocation14], 4294961152 }
  0x91   :  { %3348 = dma.done.wait [#allocation17], 2048  }
  0x92   :  { %3349 = vsyncadd [#allocation17], 4294965248  ;;  %v4182_v0 = vmov 0   ;;  %v2880_v1 = vld [vmem:[#allocation7 + $0x4] ss:$12 sps:$4 sm:$0xff]   ;;  %v2915_v31 = vld [vmem:[#allocation4 + $0x8] sm:$0xff]   ;;  %v202_v56 = vlaneseq }
  0x93   :  { %401 = vmatprep.mubr.bf16.mxu0 %v4182_v0  ;;  %v2882_v2 = vld [vmem:[#allocation7] ss:$12 sps:$4 sm:$0xff]   ;;  %369 = vmatprep.subr.bf16.mxu0 %v2880_v1  ;;  %v2883_v3 = vld [vmem:[#allocation7 + $0x1c] ss:$12 sps:$4 sm:$0xff]   ;;  %v2885_v4 = vld [vmem:[#allocation7 + $0x18] ss:$12 sps:$4 sm:$0xff]  }
  0x94   :  { %370 = vmatpush1.bf16.msra.mxu0 %v2882_v2  ;;  %v2886_v5 = vld [vmem:[#allocation7 + $0x34] ss:$12 sps:$4 sm:$0xff]   ;;  %v2888_v6 = vld [vmem:[#allocation7 + $0x30] ss:$12 sps:$4 sm:$0xff]   ;;  %v2889_v7 = vld [vmem:[#allocation7 + $0x4c] ss:$12 sps:$4 sm:$0xff]  }
  0x95   :  { %371 = vmatprep.subr.bf16.mxu0 %v2883_v3  ;;  %v2901_v8 = vld [vmem:[#allocation7 + $0x8] ss:$12 sps:$4 sm:$0xff]   ;;  %v2892_v10 = vld [vmem:[#allocation7 + $0x64] ss:$12 sps:$4 sm:$0xff]   ;;  %v2905_v11 = vld [vmem:[#allocation7 + $0x20] ss:$12 sps:$4 sm:$0xff]  }
  0x96   :  { %v2891_v9 = vld [vmem:[#allocation7 + $0x48] ss:$12 sps:$4 sm:$0xff]   ;;  %2592 = vmatprep.subr.bf16.mxu1 %v2901_v8  ;;  %v2906_v12 = vld [vmem:[#allocation4] sm:$0xff]   ;;  %v2914_v16 = vld [vmem:[#allocation7 + $0x50] ss:$12 sps:$4 sm:$0xff]   ;;  %v4184_v38 = vmov 0.0  }
  0x97   :  { %2593 = vmatpush3.bf16.msra.mxu1 %v2901_v8  ;;  %v2894_v13 = vld [vmem:[#allocation7 + $0x60] ss:$12 sps:$4 sm:$0xff]   ;;  %v2910_v14 = vld [vmem:[#allocation7 + $0x38] ss:$12 sps:$4 sm:$0xff]   ;;  %2608 = vmatprep.mubr.bf16.mxu1 %v2906_v12  ;;  %v2895_v15 = vld [vmem:[#allocation7 + $0x7c] ss:$12 sps:$4 sm:$0xff]  }
  0x98   :  { %372 = vmatpush1.bf16.msra.mxu0 %v2885_v4  ;;  %2594 = vmatprep.subr.bf16.mxu1 %v2905_v11  ;;  %v2897_v17 = vld [vmem:[#allocation7 + $0x78] ss:$12 sps:$4 sm:$0xff]   ;;  %v2898_v18 = vld [vmem:[#allocation7 + $0x94] ss:$12 sps:$4 sm:$0xff]   ;;  %v2900_v20 = vld [vmem:[#allocation7 + $0x90] ss:$12 sps:$4 sm:$0xff]  }
  0x99   :  { %373 = vmatprep.subr.bf16.mxu0 %v2886_v5  ;;  %v2919_v19 = vld [vmem:[#allocation7 + $0x68] ss:$12 sps:$4 sm:$0xff]   ;;  %v2902_v21 = vld [vmem:[#allocation7 + $0xac] ss:$12 sps:$4 sm:$0xff]   ;;  %v3567_v26 = vld [vmem:[#allocation10] ss:$12 sps:$4 sm:$0xff]  }
  0x9a   :  { %v2923_v22 = vld [vmem:[#allocation7 + $0x80] ss:$12 sps:$4 sm:$0xff]   ;;  %v2904_v23 = vld [vmem:[#allocation7 + $0xa8] ss:$12 sps:$4 sm:$0xff]   ;;  %v2928_v25 = vld [vmem:[#allocation7 + $0x98] ss:$12 sps:$4 sm:$0xff]  }
  0x9b   :  { %2595 = vmatpush3.bf16.msra.mxu1 %v2905_v11  ;;  %v3565_v24 = vld [vmem:[#allocation10 + $0x4] ss:$12 sps:$4 sm:$0xff]   ;;  %v3570_v27 = vld [vmem:[#allocation10 + $0x1c] ss:$12 sps:$4 sm:$0xff]   ;;  %v2932_v28 = vld [vmem:[#allocation7 + $0xb0] ss:$12 sps:$4 sm:$0xff]  }
  0x9c   :  { %374 = vmatpush1.bf16.msra.mxu0 %v2888_v6  ;;  %2596 = vmatprep.subr.bf16.mxu1 %v2910_v14  ;;  %v3573_v29 = vld [vmem:[#allocation10 + $0x18] ss:$12 sps:$4 sm:$0xff]   ;;  %v3577_v30 = vld [vmem:[#allocation10 + $0x34] ss:$12 sps:$4 sm:$0xff]   ;;  %v3580_v32 = vld [vmem:[#allocation10 + $0x30] ss:$12 sps:$4 sm:$0xff]  }
  0x9d   :  { %375 = vmatprep.subr.bf16.mxu0 %v2889_v7  ;;  %v3583_v33 = vld [vmem:[#allocation10 + $0x4c] ss:$12 sps:$4 sm:$0xff]   ;;  %v3585_v34 = vld [vmem:[#allocation10 + $0x48] ss:$12 sps:$4 sm:$0xff]   ;;  %v3589_v37 = vld [vmem:[#allocation10 + $0x64] ss:$12 sps:$4 sm:$0xff]  }
  0x9e   :  { %v2924_v35 = vld [vmem:[#allocation4 + $0x10] sm:$0xff]   ;;  %v3587_v36 = vld [vmem:[#allocation10 + $0x8] ss:$12 sps:$4 sm:$0xff]   ;;  %v3604_v42 = vld [vmem:[#allocation10 + $0x38] ss:$12 sps:$4 sm:$0xff]   ;;  %vm3366_vm0 = vmmov 0  }
  0x9f   :  { %2597 = vmatpush3.bf16.msra.mxu1 %v2910_v14  ;;  %v3594_v39 = vld [vmem:[#allocation10 + $0x20] ss:$12 sps:$4 sm:$0xff]   ;;  %v3600_v41 = vld [vmem:[#allocation10 + $0x7c] ss:$12 sps:$4 sm:$0xff]   ;;  %v2933_v43 = vld [vmem:[#allocation4 + $0x18] sm:$0xff]   ;;  %v203_v57 = vshrl.u32 %v202_v56, 7 }
  0xa0   :  { %376 = vmatpush1.bf16.msra.mxu0 %v2891_v9  ;;  %2598 = vmatprep.subr.bf16.mxu1 %v2914_v16  ;;  %v3597_v40 = vld [vmem:[#allocation10 + $0x60] ss:$12 sps:$4 sm:$0xff]   ;;  %v3607_v44 = vld [vmem:[#allocation10 + $0x78] ss:$12 sps:$4 sm:$0xff]   ;;  %v3615_v46 = vld [vmem:[#allocation10 + $0x50] ss:$12 sps:$4 sm:$0xff]  }
  0xa1   :  { %377 = vmatprep.subr.bf16.mxu0 %v2892_v10  ;;  %v3610_v45 = vld [vmem:[#allocation10 + $0x94] ss:$12 sps:$4 sm:$0xff]   ;;  %v3618_v47 = vld [vmem:[#allocation10 + $0x90] ss:$12 sps:$4 sm:$0xff]   ;;  %v3623_v48 = vld [vmem:[#allocation10 + $0xac] ss:$12 sps:$4 sm:$0xff]  }
  0xa2   :  { %v3627_v49 = vld [vmem:[#allocation10 + $0x68] ss:$12 sps:$4 sm:$0xff]   ;;  %v3635_v51 = vld [vmem:[%s4172_s5] sm:$0xff]  ;;  %v3649_v54 = vld [vmem:[#allocation10 + $0x98] ss:$12 sps:$4 sm:$0xff]   ;;  %v3695_v58 = vsub.s32 0, %v203_v57 }
  0xa3   :  { %2599 = vmatpush3.bf16.msra.mxu1 %v2914_v16  ;;  %v3630_v50 = vld [vmem:[#allocation10 + $0xa8] ss:$12 sps:$4 sm:$0xff]   ;;  %v3641_v52 = vld [vmem:[#allocation10 + $0x80] ss:$12 sps:$4 sm:$0xff]   ;;  %v565_v53 = vpack.c.bf16 %v3635_v51, %v3635_v51  ;;  %v3654_v55 = vld [vmem:[#allocation10 + $0xb0] ss:$12 sps:$4 sm:$0xff]  }
  0xa4   :  { %378 = vmatpush1.bf16.msra.mxu0 %v2894_v13  ;;  %2600 = vmatprep.subr.bf16.mxu1 %v2919_v19  ;;  %4190 = vst [vmem:[#allocation25_spill] sm:$0xff] %v3695_v58  ;;  %v200_v59 = vld [vmem:[#allocation9] sm:$0x7]  ;;  %v3697_v60 = vsub.s32 1, %v203_v57  ;;  %v3703_v5 = vsub.s32 2, %v203_v57  ;;  %s3367_s28 = smov [#allocation18]  }
  0xa5   :  { %379 = vmatprep.subr.bf16.mxu0 %v2895_v15  ;;  %v205_v62 = vrot.slane %v200_v59, %v3695_v58  ;;  %s2324_s1 = sshll.u32 %s3367_s28, 4  ;;  %s2325_s1 = int_to_ptr.vmem [resolvable:$true] %s2324_s1 }
  0xa6   :  { %4191 = vst [vmem:[#allocation26_spill] sm:$0xff] %v3697_v60  ;;  %v209_v1 = vrot.slane %v200_v59, %v3697_v60  ;;  %v3708_v7 = vrot.slane %v200_v59, %v3703_v5  ;;  %s3318_s30 = scalar_lea.vmem %s2325_s1, 128  ;;  %p3323_p9 = scmp.lt.s32.totalorder %s2325_s1, %s2325_s1 }
  0xa7   :  { %2601 = vmatpush3.bf16.msra.mxu1 %v2919_v19  ;;  %p3319_p8 = scmp.ne.s32.totalorder %s2325_s1, %s3318_s30  ;;  %p3324_p10 = scmp.lt.s32.totalorder %s3318_s30, %s3318_s30 }
  0xa8   :  { %380 = vmatpush1.bf16.msra.mxu0 %v2897_v17  ;;  %2602 = vmatprep.subr.bf16.mxu1 %v2923_v22 }
  0xa9   :  { %381 = vmatprep.subr.bf16.mxu0 %v2898_v18  ;;  %p3325_p11 = por %p3324_p10, %p3323_p9 }
  0xab   :  { %2603 = vmatpush3.bf16.msra.mxu1 %v2923_v22  ;;  %p3326_p12 = pnand %p3325_p11, %p3319_p8 }
  0xac   :  { %382 = vmatpush1.bf16.msra.mxu0 %v2900_v20  ;;  %2604 = vmatprep.subr.bf16.mxu1 %v2928_v25 }
  0xad   :  { %383 = vmatprep.subr.bf16.mxu0 %v2902_v21 }
  0xaf   :  { %2605 = vmatpush3.bf16.msra.mxu1 %v2928_v25 }
  0xb0   :  { %384 = vmatpush1.bf16.msra.mxu0 %v2904_v23  ;;  %2606 = vmatprep.subr.bf16.mxu1 %v2932_v28 }
  0xb1   :  { %710 = vmatprep.subr.bf16.mxu0 %v3565_v24 }
  0xb3   :  { %402 = vmatmul.mubr.bf16.vlgmr.msra.gmra.mrb[0].mxu0 %v2906_v12  ;;  %2607 = vmatpush3.bf16.msra.mxu1 %v2932_v28 }
  0xb4   :  { %711 = vmatpush1.bf16.msra.mxu0 %v3567_v26  ;;  %411 = vmatprep.mubr.bf16.mxu0 %v4182_v0 }
  0xb5   :  { %712 = vmatprep.subr.bf16.mxu0 %v3570_v27  ;;  %2616 = vmatprep.subr.bf16.mxu1 %v4184_v38 }
  0xb6   :  { %2609 = vmatmul.mubr.bf16.vlgmr.msra.gmra.mrb[0].mxu1 %v2915_v31 }
  0xb7   :  { %2617 = vmatpush3.bf16.msra.mxu1 %v3587_v36  ;;  %2612 = vmatprep.mubr.bf16.mxu1 %v2924_v35 }
  0xb8   :  { %713 = vmatpush1.bf16.msra.mxu0 %v3573_v29  ;;  %2618 = vmatprep.subr.bf16.mxu1 %v4184_v38 }
  0xb9   :  { %714 = vmatprep.subr.bf16.mxu0 %v3577_v30 }
  0xbb   :  { %412 = vmatmul.mubr.bf16.gmra.mrb[4].mxu0 %v2915_v31  ;;  %2619 = vmatpush3.bf16.msra.mxu1 %v3594_v39 }
  0xbc   :  { %715 = vmatpush1.bf16.msra.mxu0 %v3580_v32  ;;  %421 = vmatprep.mubr.bf16.mxu0 %v4182_v0 }
  0xbd   :  { %716 = vmatprep.subr.bf16.mxu0 %v3583_v33  ;;  %2620 = vmatprep.subr.bf16.mxu1 %v4184_v38 }
  0xbe   :  { %2613 = vmatmul.mubr.bf16.gmra.mrb[4].mxu1 %v2933_v43 }
  0xbf   :  { %2621 = vmatpush3.bf16.msra.mxu1 %v3604_v42  ;;  %2632 = vmatprep.mubr.msk.bf16.mxu1 %vm3366_vm0, %v4184_v38 }
  0xc0   :  { %717 = vmatpush1.bf16.msra.mxu0 %v3585_v34  ;;  %2622 = vmatprep.subr.bf16.mxu1 %v4184_v38 }
  0xc1   :  { %718 = vmatprep.subr.bf16.mxu0 %v3589_v37 }
  0xc3   :  { %422 = vmatmul.mubr.bf16.gmra.mrb[8].mxu0 %v2924_v35  ;;  %2623 = vmatpush3.bf16.msra.mxu1 %v3615_v46 }
  0xc4   :  { %719 = vmatpush1.bf16.msra.mxu0 %v3597_v40  ;;  %431 = vmatprep.mubr.bf16.mxu0 %v4182_v0 }
  0xc5   :  { %720 = vmatprep.subr.bf16.mxu0 %v3600_v41  ;;  %2624 = vmatprep.subr.bf16.mxu1 %v4184_v38 }
  0xc7   :  { %2625 = vmatpush3.bf16.msra.mxu1 %v3627_v49 }
  0xc8   :  { %721 = vmatpush1.bf16.msra.mxu0 %v3607_v44  ;;  %2626 = vmatprep.subr.bf16.mxu1 %v4184_v38 }
  0xc9   :  { %722 = vmatprep.subr.bf16.mxu0 %v3610_v45 }
  0xcb   :  { %432 = vmatmul.mubr.bf16.gmra.mrb[12].mxu0 %v2933_v43  ;;  %2627 = vmatpush3.bf16.msra.mxu1 %v3641_v52 }
  0xcc   :  { %723 = vmatpush1.bf16.msra.mxu0 %v3618_v47  ;;  %742 = vmatprep.mubr.bf16.mxu0 %v4182_v0 }
  0xcd   :  { %724 = vmatprep.subr.bf16.mxu0 %v3623_v48  ;;  %2628 = vmatprep.subr.bf16.mxu1 %v4184_v38 }
  0xcf   :  { %2629 = vmatpush3.bf16.msra.mxu1 %v3649_v54 }
  0xd0   :  { %725 = vmatpush1.bf16.msra.mxu0 %v3630_v50  ;;  %2630 = vmatprep.subr.bf16.mxu1 %v4184_v38 }
  0xd1   :  { %815 = vmatprep.subr.bf16.mxu0 %v3565_v24 }
  0xd3   :  { %743 = vmatmul.mubr.bf16.vlgmr.msra.gmra.mrb[16].mxu0 %v565_v53  ;;  %2631 = vmatpush3.bf16.msra.mxu1 %v3654_v55 }
  0xd4   :  { %816 = vmatpush1.bf16.msra.mxu0 %v3567_v26  ;;  %847 = vmatprep.mubr.bf16.mxu0 %v4182_v0 }
  0xd5   :  { %817 = vmatprep.subr.bf16.mxu0 %v3570_v27  ;;  %2636 = vmatprep.subr.bf16.mxu1 %v4184_v38 }
  0xd6   :  { %2633 = vmatmul.mubr.bf16.vlgmr.msra.gmra.mrb[8].mxu1 %v565_v53 }
  0xd7   :  { %2637 = vmatpush3.bf16.msra.mxu1 %v3587_v36  ;;  %2652 = vmatprep.mubr.msk.bf16.mxu1 %vm3366_vm0, %v4184_v38 }
  0xd8   :  { %818 = vmatpush1.bf16.msra.mxu0 %v3573_v29  ;;  %2638 = vmatprep.subr.bf16.mxu1 %v4184_v38 }
  0xd9   :  { %819 = vmatprep.subr.bf16.mxu0 %v3577_v30 }
  0xdb   :  { %2639 = vmatpush3.bf16.msra.mxu1 %v3594_v39 }
  0xdc   :  { %820 = vmatpush1.bf16.msra.mxu0 %v3580_v32  ;;  %2640 = vmatprep.subr.bf16.mxu1 %v4184_v38 }
  0xdd   :  { %821 = vmatprep.subr.bf16.mxu0 %v3583_v33 }
  0xdf   :  { %2641 = vmatpush3.bf16.msra.mxu1 %v3604_v42 }
  0xe0   :  { %822 = vmatpush1.bf16.msra.mxu0 %v3585_v34  ;;  %2642 = vmatprep.subr.bf16.mxu1 %v4184_v38 }
  0xe1   :  { %823 = vmatprep.subr.bf16.mxu0 %v3589_v37 }
  0xe3   :  { %2643 = vmatpush3.bf16.msra.mxu1 %v3615_v46 }
  0xe4   :  { %824 = vmatpush1.bf16.msra.mxu0 %v3597_v40  ;;  %2644 = vmatprep.subr.bf16.mxu1 %v4184_v38 }
  0xe5   :  { %825 = vmatprep.subr.bf16.mxu0 %v3600_v41 }
  0xe7   :  { %2645 = vmatpush3.bf16.msra.mxu1 %v3627_v49 }
  0xe8   :  { %826 = vmatpush1.bf16.msra.mxu0 %v3607_v44  ;;  %2646 = vmatprep.subr.bf16.mxu1 %v4184_v38 }
  0xe9   :  { %827 = vmatprep.subr.bf16.mxu0 %v3610_v45 }
  0xeb   :  { %2647 = vmatpush3.bf16.msra.mxu1 %v3641_v52 }
  0xec   :  { %828 = vmatpush1.bf16.msra.mxu0 %v3618_v47  ;;  %2648 = vmatprep.subr.bf16.mxu1 %v4184_v38 }
  0xed   :  { %829 = vmatprep.subr.bf16.mxu0 %v3623_v48 }
  0xef   :  { %2649 = vmatpush3.bf16.msra.mxu1 %v3649_v54 }
  0xf0   :  { %830 = vmatpush1.bf16.msra.mxu0 %v3630_v50  ;;  %2650 = vmatprep.subr.bf16.mxu1 %v4184_v38 }
  0xf1   :  { %921 = vmatprep.subr.bf16.mxu0 %v3565_v24 }
  0xf3   :  { %2651 = vmatpush3.bf16.msra.mxu1 %v3654_v55 }
  0xf4   :  { %2656 = vmatprep.subr.bf16.mxu1 %v4184_v38 }
 0x186   :  { %v403_v61 = vpop.f32.mrb[0].mxu0 }
 0x187   :  { %v405_v63 = vpop.f32.mrb[1].mxu0  ;;  %v404_v38 = vadd.f32 %v403_v61, %v205_v62 }
 0x188   :  { %v407_v2 = vpop.f32.mrb[2].mxu0 }
 0x189   :  { %v3701_v3 = vadd.f32 %v407_v2, %v205_v62  ;;  %v409_v4 = vpop.f32.mrb[3].mxu0  ;;  %v2610_v13 = vpop.f32.mrb[0].mxu1 }
 0x18a   :  { %v3705_v6 = vadd.f32 %v409_v4, %v209_v1  ;;  %v3717_v16 = vadd.f32 %v2610_v13, %v3708_v7  ;;  %v476_v17 = vpop.f32.mrb[1].mxu1 }
 0x18b   :  { %v2611_v19 = vpop.f32.mrb[2].mxu1 }
 0x18c   :  { %v3722_v20 = vadd.f32 %v2611_v19, %v3708_v7  ;;  %v479_v21 = vpop.f32.mrb[3].mxu1 }
 0x18d   :  { %v3725_v22 = vadd.f32 %v479_v21, %v3708_v7 }
 0x18e   :  { %v413_v8 = vpop.f32.mrb[4].mxu0 }
 0x18f   :  { %v3710_v9 = vadd.f32 %v413_v8, %v205_v62  ;;  %v415_v10 = vpop.f32.mrb[5].mxu0 }
 0x190   :  { %v3712_v11 = vadd.f32 %v415_v10, %v209_v1  ;;  %v417_v12 = vpop.f32.mrb[6].mxu0 }
 0x191   :  { %v3714_v14 = vadd.f32 %v417_v12, %v205_v62  ;;  %v419_v15 = vpop.f32.mrb[7].mxu0  ;;  %v2614_v43 = vpop.f32.mrb[4].mxu1 }
 0x192   :  { %v3719_v18 = vadd.f32 %v419_v15, %v209_v1  ;;  %v3734_v57 = vadd.f32 %v2614_v43, %v3708_v7  ;;  %v492_v59 = vpop.f32.mrb[5].mxu1 }
 0x193   :  { %v3739_v4 = vadd.f32 %v492_v59, %v3708_v7  ;;  %v2615_v8 = vpop.f32.mrb[6].mxu1 }
 0x194   :  { %4193 = vst [vmem:[#allocation28_spill] sm:$0xff] %v3734_v57  ;;  %v3742_v10 = vadd.f32 %v2615_v8, %v3708_v7  ;;  %v495_v12 = vpop.f32.mrb[7].mxu1 }
 0x195   :  { %4195 = vst [vmem:[#allocation30_spill] sm:$0xff] %v3739_v4  ;;  %v3745_v13 = vadd.f32 %v495_v12, %v3708_v7 }
 0x196   :  { %v423_v23 = vpop.f32.mrb[8].mxu0  ;;  %4196 = vst [vmem:[#allocation31_spill] sm:$0xff] %v3742_v10 }
 0x197   :  { %v3727_v25 = vadd.f32 %v423_v23, %v205_v62  ;;  %v425_v28 = vpop.f32.mrb[9].mxu0  ;;  %4197 = vst [vmem:[#allocation32_spill] sm:$0xff] %v3745_v13 }
 0x198   :  { %v3729_v31 = vadd.f32 %v425_v28, %v209_v1  ;;  %v427_v35 = vpop.f32.mrb[10].mxu0 }
 0x199   :  { %v3731_v53 = vadd.f32 %v427_v35, %v205_v62  ;;  %v429_v56 = vpop.f32.mrb[11].mxu0  ;;  %v563_v35 = vld [vmem:[#allocation12] sm:$0x7] }
 0x19a   :  { %v3736_v2 = vadd.f32 %v429_v56, %v209_v1  ;;  %v3756_v8 = vrot.slane %v563_v35, %v3695_v58  ;;  %v3759_v0 = vrot.slane %v563_v35, %v3697_v60  ;;  %v3764_v61 = vrot.slane %v563_v35, %v3703_v5 }
 0x19b   :  { %4192 = vst [vmem:[#allocation27_spill] sm:$0xff] %v3731_v53 }
 0x19c   :  { %4194 = vst [vmem:[#allocation29_spill] sm:$0xff] %v3736_v2 }
 0x19e   :  { %v433_v15 = vpop.f32.mrb[12].mxu0 }
 0x19f   :  { %v3747_v19 = vadd.f32 %v433_v15, %v205_v62  ;;  %v435_v21 = vpop.f32.mrb[13].mxu0 }
 0x1a0   :  { %v3749_v23 = vadd.f32 %v435_v21, %v209_v1  ;;  %v437_v28 = vpop.f32.mrb[14].mxu0  ;;  %v406_v21 = vadd.f32 %v405_v63, %v209_v1 }
 0x1a1   :  { %4198 = vst [vmem:[#allocation33_spill] sm:$0xff] %v3747_v19  ;;  %v3751_v43 = vadd.f32 %v437_v28, %v205_v62  ;;  %v439_v56 = vpop.f32.mrb[15].mxu0 }
 0x1a2   :  { %4199 = vst [vmem:[#allocation34_spill] sm:$0xff] %v3749_v23  ;;  %v3753_v59 = vadd.f32 %v439_v56, %v209_v1  ;;  %v477_v1 = vadd.f32 %v476_v17, %v3708_v7  ;;  %v4202_v7 = vmov 0.0   ;;  %v4203_v17 = vmov 0  }
 0x1a3   :  { %4200 = vst [vmem:[#allocation35_spill] sm:$0xff] %v3751_v43 }
 0x1a4   :  { %4201 = vst [vmem:[#allocation36_spill] sm:$0xff] %v3753_v59 }
 0x1a6   :  { %v744_v12 = vpop.f32.mrb[16].mxu0 }
 0x1a7   :  { %v745_v15 = vadd.f32 %v744_v12, %v3756_v8  ;;  %v746_v10 = vpop.f32.mrb[17].mxu0 }
 0x1a8   :  { %v747_v57 = vadd.f32 %v746_v10, %v3759_v0  ;;  %v748_v23 = vpop.f32.mrb[18].mxu0 }
 0x1a9   :  { %v794_v28 = vadd.f32 %v745_v15, %v404_v38  ;;  %v749_v43 = vpop.f32.mrb[19].mxu0  ;;  %v785_v59 = vpop.f32.mrb[8].mxu1 }
 0x1aa   :  { %v801_v19 = vadd.f32 %v747_v57, %v406_v21  ;;  %v2634_v58 = vpop.f32.mrb[9].mxu1  ;;  %v786_v62 = vadd.f32 %v785_v59, %v3764_v61 }
 0x1ab   :  { %v2389_v56 = vmul.f32 -1.442695, %v794_v28  ;;  %v788_v13 = vpop.f32.mrb[10].mxu1 }
 0x1ac   :  { %v2635_v2 = vpop.f32.mrb[11].mxu1  ;;  %v2390_v60 = vmul.f32 -1.442695, %v801_v19 }
 0x1ad   :  { %3028 = vpow2.f32 %v2389_v56 }
 0x1ae   :  { %3030 = vpow2.f32 %v2390_v60 }
 0x1b7   :  { %v3029_v53 = vpop.eup %3028 }
 0x1b8   :  { %v798_v4 = vadd.f32 1.0, %v3029_v53  ;;  %v3031_v63 = vpop.eup %3030 }
 0x1b9   :  { %v805_v10 = vadd.f32 1.0, %v3031_v63 }
 0x1ba   :  { %3032 = vrcp.f32 %v798_v4 }
 0x1c4   :  { %v3033_v38 = vpop.eup %3032 }
 0x1c5   :  { %v808_v57 = vmul.f32 %v3033_v38, %v786_v62 }
 0x1c7   :  { %v809_v23 = vadd.f32 %v808_v57, %v477_v1 }
 0x1c9   :  { %3034 = vtanh.f32 %v809_v23 }
 0x1ca   :  { %3036 = vrcp.f32 %v805_v10 }
 0x1d3   :  { %v3035_v58 = vpop.eup %3034 }
 0x1d4   :  { %v811_v2 = vsub.f32 %v3635_v51, %v3035_v58  ;;  %v3037_v53 = vpop.eup %3036 }
 0x1d6   :  { %v812_v60 = vmul.f32 %v3037_v53, %v811_v2 }
 0x1d8   :  { %v3769_v4 = vadd.f32 %v3035_v58, %v812_v60 }
 0x1da   :  { %v814_v13 = vpack.c.bf16 %v3769_v4, %v3769_v4 }
 0x1dc   :  { %848 = vmatmul.mubr.bf16.vlgmr.msra.gmra.mrb[20].mxu0 %v814_v13  ;;  %2653 = vmatmul.mubr.bf16.vlgmr.msra.gmra.mrb[12].mxu1 %v814_v13 }
 0x1dd   :  { %922 = vmatpush1.bf16.msra.mxu0 %v3567_v26  ;;  %2657 = vmatpush3.bf16.msra.mxu1 %v3587_v36 }
 0x1de   :  { %923 = vmatprep.subr.bf16.mxu0 %v3570_v27  ;;  %2658 = vmatprep.subr.bf16.mxu1 %v4202_v7 }
 0x1df   :  { %953 = vmatprep.mubr.bf16.mxu0 %v4203_v17  ;;  %2672 = vmatprep.mubr.msk.bf16.mxu1 %vm3366_vm0, %v4202_v7 }
 0x1e1   :  { %924 = vmatpush1.bf16.msra.mxu0 %v3573_v29  ;;  %2659 = vmatpush3.bf16.msra.mxu1 %v3594_v39 }
 0x1e2   :  { %925 = vmatprep.subr.bf16.mxu0 %v3577_v30  ;;  %2660 = vmatprep.subr.bf16.mxu1 %v4202_v7 }
 0x1e5   :  { %926 = vmatpush1.bf16.msra.mxu0 %v3580_v32  ;;  %2661 = vmatpush3.bf16.msra.mxu1 %v3604_v42 }
 0x1e6   :  { %927 = vmatprep.subr.bf16.mxu0 %v3583_v33  ;;  %2662 = vmatprep.subr.bf16.mxu1 %v4202_v7 }
 0x1e9   :  { %928 = vmatpush1.bf16.msra.mxu0 %v3585_v34  ;;  %2663 = vmatpush3.bf16.msra.mxu1 %v3615_v46 }
 0x1ea   :  { %929 = vmatprep.subr.bf16.mxu0 %v3589_v37  ;;  %2664 = vmatprep.subr.bf16.mxu1 %v4202_v7 }
 0x1ed   :  { %930 = vmatpush1.bf16.msra.mxu0 %v3597_v40  ;;  %2665 = vmatpush3.bf16.msra.mxu1 %v3627_v49 }
 0x1ee   :  { %931 = vmatprep.subr.bf16.mxu0 %v3600_v41  ;;  %2666 = vmatprep.subr.bf16.mxu1 %v4202_v7 }
 0x1f1   :  { %932 = vmatpush1.bf16.msra.mxu0 %v3607_v44  ;;  %2667 = vmatpush3.bf16.msra.mxu1 %v3641_v52 }
 0x1f2   :  { %933 = vmatprep.subr.bf16.mxu0 %v3610_v45  ;;  %2668 = vmatprep.subr.bf16.mxu1 %v4202_v7 }
 0x1f5   :  { %934 = vmatpush1.bf16.msra.mxu0 %v3618_v47  ;;  %2669 = vmatpush3.bf16.msra.mxu1 %v3649_v54 }
 0x1f6   :  { %935 = vmatprep.subr.bf16.mxu0 %v3623_v48  ;;  %2670 = vmatprep.subr.bf16.mxu1 %v4202_v7 }
 0x1f9   :  { %936 = vmatpush1.bf16.msra.mxu0 %v3630_v50  ;;  %2671 = vmatpush3.bf16.msra.mxu1 %v3654_v55 }
 0x1fa   :  { %1027 = vmatprep.subr.bf16.mxu0 %v3565_v24  ;;  %2676 = vmatprep.subr.bf16.mxu1 %v4202_v7 }
 0x2af   :  { %v849_v51 = vpop.f32.mrb[20].mxu0  ;;  %v890_v19 = vpop.f32.mrb[12].mxu1 }
 0x2b0   :  { %v850_v35 = vadd.f32 %v849_v51, %v3756_v8  ;;  %v851_v43 = vpop.f32.mrb[21].mxu0  ;;  %v2654_v59 = vpop.f32.mrb[13].mxu1  ;;  %v891_v58 = vadd.f32 %v890_v19, %v3764_v61 }
 0x2b1   :  { %v852_v12 = vadd.f32 %v851_v43, %v3759_v0  ;;  %v853_v15 = vpop.f32.mrb[22].mxu0  ;;  %v893_v21 = vpop.f32.mrb[14].mxu1 }
 0x2b2   :  { %v900_v28 = vadd.f32 %v850_v35, %v3701_v3  ;;  %v854_v56 = vpop.f32.mrb[23].mxu0  ;;  %v2655_v62 = vpop.f32.mrb[15].mxu1 }
 0x2b3   :  { %v907_v63 = vadd.f32 %v852_v12, %v3705_v6 }
 0x2b4   :  { %v2391_v38 = vmul.f32 -1.442695, %v900_v28 }
 0x2b5   :  { %v2392_v1 = vmul.f32 -1.442695, %v907_v63 }
 0x2b6   :  { %3038 = vpow2.f32 %v2391_v38 }
 0x2b7   :  { %3040 = vpow2.f32 %v2392_v1 }
 0x2c0   :  { %v3039_v57 = vpop.eup %3038 }
 0x2c1   :  { %v904_v10 = vadd.f32 1.0, %v3039_v57  ;;  %v3041_v23 = vpop.eup %3040 }
 0x2c2   :  { %v911_v13 = vadd.f32 1.0, %v3041_v23 }
 0x2c3   :  { %3042 = vrcp.f32 %v904_v10 }
 0x2cd   :  { %v3043_v2 = vpop.eup %3042 }
 0x2ce   :  { %v914_v53 = vmul.f32 %v3043_v2, %v891_v58 }
 0x2d0   :  { %v915_v60 = vadd.f32 %v914_v53, %v3725_v22 }
 0x2d2   :  { %3044 = vtanh.f32 %v915_v60 }
 0x2d3   :  { %3046 = vrcp.f32 %v911_v13 }
 0x2dc   :  { %v3045_v3 = vpop.eup %3044 }
 0x2dd   :  { %v917_v6 = vsub.f32 %v3769_v4, %v3045_v3  ;;  %v3047_v51 = vpop.eup %3046 }
 0x2df   :  { %v918_v35 = vmul.f32 %v3047_v51, %v917_v6 }
 0x2e1   :  { %v3815_v43 = vadd.f32 %v3045_v3, %v918_v35 }
 0x2e3   :  { %v920_v59 = vpack.c.bf16 %v3815_v43, %v3815_v43 }
 0x2e5   :  { %954 = vmatmul.mubr.bf16.vlgmr.msra.gmra.mrb[24].mxu0 %v920_v59  ;;  %2673 = vmatmul.mubr.bf16.vlgmr.msra.gmra.mrb[16].mxu1 %v920_v59 }
 0x2e6   :  { %1028 = vmatpush1.bf16.msra.mxu0 %v3567_v26  ;;  %2677 = vmatpush3.bf16.msra.mxu1 %v3587_v36 }
 0x2e7   :  { %1029 = vmatprep.subr.bf16.mxu0 %v3570_v27  ;;  %2678 = vmatprep.subr.bf16.mxu1 %v4202_v7 }
 0x2e8   :  { %1059 = vmatprep.mubr.bf16.mxu0 %v4203_v17  ;;  %2692 = vmatprep.mubr.msk.bf16.mxu1 %vm3366_vm0, %v4202_v7 }
 0x2ea   :  { %1030 = vmatpush1.bf16.msra.mxu0 %v3573_v29  ;;  %2679 = vmatpush3.bf16.msra.mxu1 %v3594_v39 }
 0x2eb   :  { %1031 = vmatprep.subr.bf16.mxu0 %v3577_v30  ;;  %2680 = vmatprep.subr.bf16.mxu1 %v4202_v7 }
 0x2ee   :  { %1032 = vmatpush1.bf16.msra.mxu0 %v3580_v32  ;;  %2681 = vmatpush3.bf16.msra.mxu1 %v3604_v42 }
 0x2ef   :  { %1033 = vmatprep.subr.bf16.mxu0 %v3583_v33  ;;  %2682 = vmatprep.subr.bf16.mxu1 %v4202_v7 }
 0x2f2   :  { %1034 = vmatpush1.bf16.msra.mxu0 %v3585_v34  ;;  %2683 = vmatpush3.bf16.msra.mxu1 %v3615_v46 }
 0x2f3   :  { %1035 = vmatprep.subr.bf16.mxu0 %v3589_v37  ;;  %2684 = vmatprep.subr.bf16.mxu1 %v4202_v7 }
 0x2f6   :  { %1036 = vmatpush1.bf16.msra.mxu0 %v3597_v40  ;;  %2685 = vmatpush3.bf16.msra.mxu1 %v3627_v49 }
 0x2f7   :  { %1037 = vmatprep.subr.bf16.mxu0 %v3600_v41  ;;  %2686 = vmatprep.subr.bf16.mxu1 %v4202_v7 }
 0x2fa   :  { %1038 = vmatpush1.bf16.msra.mxu0 %v3607_v44  ;;  %2687 = vmatpush3.bf16.msra.mxu1 %v3641_v52 }
 0x2fb   :  { %1039 = vmatprep.subr.bf16.mxu0 %v3610_v45  ;;  %2688 = vmatprep.subr.bf16.mxu1 %v4202_v7 }
 0x2fe   :  { %1040 = vmatpush1.bf16.msra.mxu0 %v3618_v47  ;;  %2689 = vmatpush3.bf16.msra.mxu1 %v3649_v54 }
 0x2ff   :  { %1041 = vmatprep.subr.bf16.mxu0 %v3623_v48  ;;  %2690 = vmatprep.subr.bf16.mxu1 %v4202_v7 }
 0x302   :  { %1042 = vmatpush1.bf16.msra.mxu0 %v3630_v50  ;;  %2691 = vmatpush3.bf16.msra.mxu1 %v3654_v55 }
 0x303   :  { %1133 = vmatprep.subr.bf16.mxu0 %v3565_v24  ;;  %2696 = vmatprep.subr.bf16.mxu1 %v4202_v7 }
 0x3b8   :  { %v955_v22 = vpop.f32.mrb[24].mxu0  ;;  %v996_v4 = vpop.f32.mrb[16].mxu1 }
 0x3b9   :  { %v956_v19 = vadd.f32 %v955_v22, %v3756_v8  ;;  %v957_v12 = vpop.f32.mrb[25].mxu0  ;;  %v2674_v15 = vpop.f32.mrb[17].mxu1  ;;  %v997_v53 = vadd.f32 %v996_v4, %v3764_v61 }
 0x3ba   :  { %v958_v21 = vadd.f32 %v957_v12, %v3759_v0  ;;  %v959_v28 = vpop.f32.mrb[26].mxu0  ;;  %v999_v56 = vpop.f32.mrb[18].mxu1 }
 0x3bb   :  { %v1006_v62 = vadd.f32 %v956_v19, %v3710_v9  ;;  %v960_v63 = vpop.f32.mrb[27].mxu0  ;;  %v2675_v38 = vpop.f32.mrb[19].mxu1 }
 0x3bc   :  { %v1013_v1 = vadd.f32 %v958_v21, %v3712_v11 }
 0x3bd   :  { %v2393_v57 = vmul.f32 -1.442695, %v1006_v62 }
 0x3be   :  { %v2394_v10 = vmul.f32 -1.442695, %v1013_v1 }
 0x3bf   :  { %3048 = vpow2.f32 %v2393_v57 }
 0x3c0   :  { %3050 = vpow2.f32 %v2394_v10 }
 0x3c9   :  { %v3049_v23 = vpop.eup %3048 }
 0x3ca   :  { %v1010_v58 = vadd.f32 1.0, %v3049_v23  ;;  %v3051_v2 = vpop.eup %3050 }
 0x3cb   :  { %v1017_v6 = vadd.f32 1.0, %v3051_v2 }
 0x3cc   :  { %3052 = vrcp.f32 %v1010_v58 }
 0x3d6   :  { %v3053_v60 = vpop.eup %3052 }
 0x3d7   :  { %v1020_v13 = vmul.f32 %v3053_v60, %v997_v53  ;;  %v3911_v53 = vld [vmem:[#allocation10] ss:$12 sps:$4 sm:$0xff]   ;;  %v3922_v60 = vld [vmem:[#allocation10 + $0x18] ss:$12 sps:$4 sm:$0xff]  }
 0x3d9   :  { %v1021_v3 = vadd.f32 %v1020_v13, %v3717_v16  ;;  %v3926_v13 = vld [vmem:[#allocation10 + $0x34] ss:$12 sps:$4 sm:$0xff]  }
 0x3db   :  { %3054 = vtanh.f32 %v1021_v3  ;;  %v3934_v3 = vld [vmem:[#allocation10 + $0x4c] ss:$12 sps:$4 sm:$0xff]  }
 0x3dc   :  { %3056 = vrcp.f32 %v1017_v6  ;;  %v3938_v6 = vld [vmem:[#allocation10 + $0x48] ss:$12 sps:$4 sm:$0xff]  }
 0x3e5   :  { %v3055_v9 = vpop.eup %3054 }
 0x3e6   :  { %v1023_v11 = vsub.f32 %v3815_v43, %v3055_v9  ;;  %v3057_v51 = vpop.eup %3056 }
 0x3e8   :  { %v1024_v35 = vmul.f32 %v3057_v51, %v1023_v11 }
 0x3ea   :  { %v3861_v59 = vadd.f32 %v3055_v9, %v1024_v35 }
 0x3ec   :  { %v1026_v22 = vpack.c.bf16 %v3861_v59, %v3861_v59 }
 0x3ee   :  { %1060 = vmatmul.mubr.bf16.vlgmr.msra.gmra.mrb[28].mxu0 %v1026_v22  ;;  %2693 = vmatmul.mubr.bf16.vlgmr.msra.gmra.mrb[20].mxu1 %v1026_v22 }
 0x3ef   :  { %1134 = vmatpush1.bf16.msra.mxu0 %v3567_v26  ;;  %2697 = vmatpush3.bf16.msra.mxu1 %v3587_v36 }
 0x3f0   :  { %1135 = vmatprep.subr.bf16.mxu0 %v3570_v27  ;;  %2698 = vmatprep.subr.bf16.mxu1 %v4202_v7 }
 0x3f1   :  { %1165 = vmatprep.mubr.bf16.mxu0 %v4203_v17  ;;  %2712 = vmatprep.mubr.msk.bf16.mxu1 %vm3366_vm0, %v4202_v7 }
 0x3f3   :  { %1136 = vmatpush1.bf16.msra.mxu0 %v3573_v29  ;;  %2699 = vmatpush3.bf16.msra.mxu1 %v3594_v39 }
 0x3f4   :  { %1137 = vmatprep.subr.bf16.mxu0 %v3577_v30  ;;  %2700 = vmatprep.subr.bf16.mxu1 %v4202_v7 }
 0x3f7   :  { %1138 = vmatpush1.bf16.msra.mxu0 %v3580_v32  ;;  %2701 = vmatpush3.bf16.msra.mxu1 %v3604_v42 }
 0x3f8   :  { %1139 = vmatprep.subr.bf16.mxu0 %v3583_v33  ;;  %2702 = vmatprep.subr.bf16.mxu1 %v4202_v7 }
 0x3fb   :  { %1140 = vmatpush1.bf16.msra.mxu0 %v3585_v34  ;;  %2703 = vmatpush3.bf16.msra.mxu1 %v3615_v46 }
 0x3fc   :  { %1141 = vmatprep.subr.bf16.mxu0 %v3589_v37  ;;  %2704 = vmatprep.subr.bf16.mxu1 %v4202_v7 }
 0x3ff   :  { %1142 = vmatpush1.bf16.msra.mxu0 %v3597_v40  ;;  %2705 = vmatpush3.bf16.msra.mxu1 %v3627_v49 }
 0x400   :  { %1143 = vmatprep.subr.bf16.mxu0 %v3600_v41  ;;  %2706 = vmatprep.subr.bf16.mxu1 %v4202_v7 }
 0x403   :  { %1144 = vmatpush1.bf16.msra.mxu0 %v3607_v44  ;;  %2707 = vmatpush3.bf16.msra.mxu1 %v3641_v52 }
 0x404   :  { %1145 = vmatprep.subr.bf16.mxu0 %v3610_v45  ;;  %2708 = vmatprep.subr.bf16.mxu1 %v4202_v7 }
 0x407   :  { %1146 = vmatpush1.bf16.msra.mxu0 %v3618_v47  ;;  %2709 = vmatpush3.bf16.msra.mxu1 %v3649_v54 }
 0x408   :  { %1147 = vmatprep.subr.bf16.mxu0 %v3623_v48  ;;  %2710 = vmatprep.subr.bf16.mxu1 %v4202_v7 }
 0x40b   :  { %1148 = vmatpush1.bf16.msra.mxu0 %v3630_v50  ;;  %2711 = vmatpush3.bf16.msra.mxu1 %v3654_v55 }
 0x40c   :  { %1239 = vmatprep.subr.bf16.mxu0 %v3565_v24  ;;  %2716 = vmatprep.subr.bf16.mxu1 %v4202_v7 }
 0x4c1   :  { %v1061_v26 = vpop.f32.mrb[28].mxu0  ;;  %v1102_v27 = vpop.f32.mrb[20].mxu1 }
 0x4c2   :  { %v1062_v29 = vadd.f32 %v1061_v26, %v3756_v8  ;;  %v1063_v30 = vpop.f32.mrb[29].mxu0  ;;  %v2694_v32 = vpop.f32.mrb[21].mxu1  ;;  %v1103_v62 = vadd.f32 %v1102_v27, %v3764_v61 }
 0x4c3   :  { %v1064_v33 = vadd.f32 %v1063_v30, %v3759_v0  ;;  %v1065_v34 = vpop.f32.mrb[30].mxu0  ;;  %v1105_v16 = vpop.f32.mrb[22].mxu1 }
 0x4c4   :  { %v1112_v43 = vadd.f32 %v1062_v29, %v3714_v14  ;;  %v1066_v4 = vpop.f32.mrb[31].mxu0  ;;  %v2695_v19 = vpop.f32.mrb[23].mxu1 }
 0x4c5   :  { %v1119_v12 = vadd.f32 %v1064_v33, %v3719_v18  ;;  %v4204_v33 = vld [vmem:[#allocation30_spill] sm:$0xff] }
 0x4c6   :  { %v2395_v15 = vmul.f32 -1.442695, %v1112_v43 }
 0x4c7   :  { %v2396_v24 = vmul.f32 -1.442695, %v1119_v12 }
 0x4c8   :  { %3058 = vpow2.f32 %v2395_v15  ;;  %v3974_v15 = vld [vmem:[#allocation10 + $0x8] ss:$12 sps:$4 sm:$0xff]  }
 0x4c9   :  { %3060 = vpow2.f32 %v2396_v24  ;;  %v3983_v24 = vld [vmem:[#allocation10 + $0x20] ss:$12 sps:$4 sm:$0xff]  }
 0x4d2   :  { %v3059_v21 = vpop.eup %3058 }
 0x4d3   :  { %v1116_v28 = vadd.f32 1.0, %v3059_v21  ;;  %v3061_v56 = vpop.eup %3060  ;;  %v3989_v21 = vld [vmem:[#allocation10 + $0x38] ss:$12 sps:$4 sm:$0xff]  }
 0x4d4   :  { %v1123_v57 = vadd.f32 1.0, %v3061_v56  ;;  %v3998_v56 = vld [vmem:[#allocation10 + $0x64] ss:$12 sps:$4 sm:$0xff]  }
 0x4d5   :  { %3062 = vrcp.f32 %v1116_v28  ;;  %v3995_v28 = vld [vmem:[#allocation10 + $0x50] ss:$12 sps:$4 sm:$0xff]  }
 0x4df   :  { %v3063_v63 = vpop.eup %3062 }
 0x4e0   :  { %v1126_v38 = vmul.f32 %v3063_v63, %v1103_v62  ;;  %v4002_v62 = vld [vmem:[#allocation10 + $0x60] ss:$12 sps:$4 sm:$0xff]   ;;  %v4006_v63 = vld [vmem:[#allocation10 + $0x7c] ss:$12 sps:$4 sm:$0xff]  }
 0x4e2   :  { %v1127_v1 = vadd.f32 %v1126_v38, %v3722_v20  ;;  %v3915_v20 = vld [vmem:[#allocation10 + $0x1c] ss:$12 sps:$4 sm:$0xff]   ;;  %v4010_v38 = vld [vmem:[#allocation10 + $0x78] ss:$12 sps:$4 sm:$0xff]  }
 0x4e4   :  { %3064 = vtanh.f32 %v1127_v1  ;;  %v4014_v1 = vld [vmem:[#allocation10 + $0x94] ss:$12 sps:$4 sm:$0xff]  }
 0x4e5   :  { %3066 = vrcp.f32 %v1123_v57  ;;  %v4018_v57 = vld [vmem:[#allocation10 + $0x90] ss:$12 sps:$4 sm:$0xff]  }
 0x4ee   :  { %v3065_v14 = vpop.eup %3064 }
 0x4ef   :  { %v1129_v18 = vsub.f32 %v3861_v59, %v3065_v14  ;;  %v3067_v10 = vpop.eup %3066 }
 0x4f1   :  { %v1130_v23 = vmul.f32 %v3067_v10, %v1129_v18 }
 0x4f3   :  { %v3907_v58 = vadd.f32 %v3065_v14, %v1130_v23 }
 0x4f5   :  { %v1132_v2 = vpack.c.bf16 %v3907_v58, %v3907_v58 }
 0x4f7   :  { %1166 = vmatmul.mubr.bf16.vlgmr.msra.gmra.mrb[32].mxu0 %v1132_v2  ;;  %2713 = vmatmul.mubr.bf16.vlgmr.msra.gmra.mrb[24].mxu1 %v1132_v2 }
 0x4f8   :  { %1240 = vmatpush1.bf16.msra.mxu0 %v3911_v53  ;;  %2717 = vmatpush3.bf16.msra.mxu1 %v3587_v36  ;;  %v3930_v36 = vld [vmem:[#allocation10 + $0x30] ss:$12 sps:$4 sm:$0xff]  }
 0x4f9   :  { %1241 = vmatprep.subr.bf16.mxu0 %v3915_v20  ;;  %2718 = vmatprep.subr.bf16.mxu1 %v4202_v7 }
 0x4fa   :  { %1271 = vmatprep.mubr.bf16.mxu0 %v4203_v17  ;;  %2732 = vmatprep.mubr.msk.bf16.mxu1 %vm3366_vm0, %v4202_v7 }
 0x4fc   :  { %1242 = vmatpush1.bf16.msra.mxu0 %v3922_v60  ;;  %2719 = vmatpush3.bf16.msra.mxu1 %v3594_v39 }
 0x4fd   :  { %1243 = vmatprep.subr.bf16.mxu0 %v3926_v13  ;;  %2720 = vmatprep.subr.bf16.mxu1 %v4202_v7 }
 0x500   :  { %1244 = vmatpush1.bf16.msra.mxu0 %v3930_v36  ;;  %2721 = vmatpush3.bf16.msra.mxu1 %v3604_v42 }
 0x501   :  { %1245 = vmatprep.subr.bf16.mxu0 %v3934_v3  ;;  %2722 = vmatprep.subr.bf16.mxu1 %v4202_v7 }
 0x504   :  { %1246 = vmatpush1.bf16.msra.mxu0 %v3938_v6  ;;  %2723 = vmatpush3.bf16.msra.mxu1 %v3615_v46 }
 0x505   :  { %1247 = vmatprep.subr.bf16.mxu0 %v3589_v37  ;;  %2724 = vmatprep.subr.bf16.mxu1 %v4202_v7  ;;  %v3958_v37 = vld [vmem:[#allocation10 + $0x4] ss:$12 sps:$4 sm:$0xff]  }
 0x508   :  { %1248 = vmatpush1.bf16.msra.mxu0 %v3597_v40  ;;  %2725 = vmatpush3.bf16.msra.mxu1 %v3627_v49 }
 0x509   :  { %1249 = vmatprep.subr.bf16.mxu0 %v3600_v41  ;;  %2726 = vmatprep.subr.bf16.mxu1 %v4202_v7 }
 0x50c   :  { %1250 = vmatpush1.bf16.msra.mxu0 %v3607_v44  ;;  %2727 = vmatpush3.bf16.msra.mxu1 %v3641_v52 }
 0x50d   :  { %1251 = vmatprep.subr.bf16.mxu0 %v3610_v45  ;;  %2728 = vmatprep.subr.bf16.mxu1 %v4202_v7 }
 0x510   :  { %1252 = vmatpush1.bf16.msra.mxu0 %v3618_v47  ;;  %2729 = vmatpush3.bf16.msra.mxu1 %v3649_v54 }
 0x511   :  { %1253 = vmatprep.subr.bf16.mxu0 %v3623_v48  ;;  %2730 = vmatprep.subr.bf16.mxu1 %v4202_v7 }
 0x514   :  { %1254 = vmatpush1.bf16.msra.mxu0 %v3630_v50  ;;  %2731 = vmatpush3.bf16.msra.mxu1 %v3654_v55 }
 0x515   :  { %1345 = vmatprep.subr.bf16.mxu0 %v3958_v37  ;;  %2736 = vmatprep.subr.bf16.mxu1 %v4202_v7 }
 0x5ca   :  { %v1167_v39 = vpop.f32.mrb[32].mxu0  ;;  %v1208_v40 = vpop.f32.mrb[24].mxu1 }
 0x5cb   :  { %v1168_v41 = vadd.f32 %v1167_v39, %v3756_v8  ;;  %v1169_v42 = vpop.f32.mrb[33].mxu0  ;;  %v2714_v44 = vpop.f32.mrb[25].mxu1  ;;  %v1209_v29 = vadd.f32 %v1208_v40, %v3764_v61  ;;  %v4205_v39 = vld [vmem:[#allocation27_spill] sm:$0xff] }
 0x5cc   :  { %v1170_v45 = vadd.f32 %v1169_v42, %v3759_v0  ;;  %v1171_v46 = vpop.f32.mrb[34].mxu0  ;;  %v1211_v47 = vpop.f32.mrb[26].mxu1  ;;  %v4206_v42 = vld [vmem:[#allocation29_spill] sm:$0xff] }
 0x5cd   :  { %v1218_v48 = vadd.f32 %v1168_v41, %v3727_v25  ;;  %v1172_v9 = vpop.f32.mrb[35].mxu0  ;;  %v2715_v11 = vpop.f32.mrb[27].mxu1 }
 0x5ce   :  { %v1225_v51 = vadd.f32 %v1170_v45, %v3729_v31 }
 0x5cf   :  { %v2397_v35 = vmul.f32 -1.442695, %v1218_v48 }
 0x5d0   :  { %v2398_v59 = vmul.f32 -1.442695, %v1225_v51  ;;  %v4207_v51 = vld [vmem:[#allocation32_spill] sm:$0xff] }
 0x5d1   :  { %3068 = vpow2.f32 %v2397_v35 }
 0x5d2   :  { %3070 = vpow2.f32 %v2398_v59 }
 0x5db   :  { %v3069_v22 = vpop.eup %3068 }
 0x5dc   :  { %v1222_v26 = vadd.f32 1.0, %v3069_v22  ;;  %v3071_v27 = vpop.eup %3070 }
 0x5dd   :  { %v1229_v16 = vadd.f32 1.0, %v3071_v27 }
 0x5de   :  { %3072 = vrcp.f32 %v1222_v26 }
 0x5e8   :  { %v3073_v30 = vpop.eup %3072 }
 0x5e9   :  { %v1232_v32 = vmul.f32 %v3073_v30, %v1209_v29 }
 0x5eb   :  { %v1233_v34 = vadd.f32 %v1232_v32, %v4204_v33 }
 0x5ed   :  { %3074 = vtanh.f32 %v1233_v34 }
 0x5ee   :  { %3076 = vrcp.f32 %v1229_v16 }
 0x5f7   :  { %v3075_v25 = vpop.eup %3074 }
 0x5f8   :  { %v1235_v31 = vsub.f32 %v3907_v58, %v3075_v25  ;;  %v3077_v43 = vpop.eup %3076 }
 0x5fa   :  { %v1236_v4 = vmul.f32 %v3077_v43, %v1235_v31 }
 0x5fc   :  { %v3969_v19 = vadd.f32 %v3075_v25, %v1236_v4 }
 0x5fe   :  { %v1238_v12 = vpack.c.bf16 %v3969_v19, %v3969_v19 }
 0x600   :  { %1272 = vmatmul.mubr.bf16.vlgmr.msra.gmra.mrb[36].mxu0 %v1238_v12  ;;  %2733 = vmatmul.mubr.bf16.vlgmr.msra.gmra.mrb[28].mxu1 %v1238_v12 }
 0x601   :  { %1346 = vmatpush1.bf16.msra.mxu0 %v3911_v53  ;;  %2737 = vmatpush3.bf16.msra.mxu1 %v3974_v15 }
 0x602   :  { %1347 = vmatprep.subr.bf16.mxu0 %v3915_v20  ;;  %2738 = vmatprep.subr.bf16.mxu1 %v4202_v7 }
 0x603   :  { %1377 = vmatprep.mubr.bf16.mxu0 %v4203_v17  ;;  %2752 = vmatprep.mubr.msk.bf16.mxu1 %vm3366_vm0, %v4202_v7 }
 0x605   :  { %1348 = vmatpush1.bf16.msra.mxu0 %v3922_v60  ;;  %2739 = vmatpush3.bf16.msra.mxu1 %v3983_v24 }
 0x606   :  { %1349 = vmatprep.subr.bf16.mxu0 %v3926_v13  ;;  %2740 = vmatprep.subr.bf16.mxu1 %v4202_v7 }
 0x609   :  { %1350 = vmatpush1.bf16.msra.mxu0 %v3930_v36  ;;  %2741 = vmatpush3.bf16.msra.mxu1 %v3989_v21 }
 0x60a   :  { %1351 = vmatprep.subr.bf16.mxu0 %v3934_v3  ;;  %2742 = vmatprep.subr.bf16.mxu1 %v4202_v7 }
 0x60d   :  { %1352 = vmatpush1.bf16.msra.mxu0 %v3938_v6  ;;  %2743 = vmatpush3.bf16.msra.mxu1 %v3995_v28 }
 0x60e   :  { %1353 = vmatprep.subr.bf16.mxu0 %v3998_v56  ;;  %2744 = vmatprep.subr.bf16.mxu1 %v4202_v7 }
 0x611   :  { %1354 = vmatpush1.bf16.msra.mxu0 %v4002_v62  ;;  %2745 = vmatpush3.bf16.msra.mxu1 %v3627_v49  ;;  %v4022_v49 = vld [vmem:[#allocation10 + $0xac] ss:$12 sps:$4 sm:$0xff]  }
 0x612   :  { %1355 = vmatprep.subr.bf16.mxu0 %v4006_v63  ;;  %2746 = vmatprep.subr.bf16.mxu1 %v4202_v7 }
 0x615   :  { %1356 = vmatpush1.bf16.msra.mxu0 %v4010_v38  ;;  %2747 = vmatpush3.bf16.msra.mxu1 %v3641_v52 }
 0x616   :  { %1357 = vmatprep.subr.bf16.mxu0 %v4014_v1  ;;  %2748 = vmatprep.subr.bf16.mxu1 %v4202_v7 }
 0x619   :  { %1358 = vmatpush1.bf16.msra.mxu0 %v4018_v57  ;;  %2749 = vmatpush3.bf16.msra.mxu1 %v3649_v54 }
 0x61a   :  { %1359 = vmatprep.subr.bf16.mxu0 %v4022_v49  ;;  %2750 = vmatprep.subr.bf16.mxu1 %v4202_v7 }
 0x61d   :  { %1360 = vmatpush1.bf16.msra.mxu0 %v3630_v50  ;;  %2751 = vmatpush3.bf16.msra.mxu1 %v3654_v55 }
 0x61e   :  { %1451 = vmatprep.subr.bf16.mxu0 %v3958_v37  ;;  %2756 = vmatprep.subr.bf16.mxu1 %v4202_v7 }
 0x6d3   :  { %v1273_v52 = vpop.f32.mrb[36].mxu0  ;;  %v1314_v14 = vpop.f32.mrb[28].mxu1 }
 0x6d4   :  { %v1274_v18 = vadd.f32 %v1273_v52, %v3756_v8  ;;  %v1275_v10 = vpop.f32.mrb[37].mxu0  ;;  %v2734_v54 = vpop.f32.mrb[29].mxu1  ;;  %v1315_v48 = vadd.f32 %v1314_v14, %v3764_v61  ;;  %v4210_v14 = vld [vmem:[#allocation28_spill] sm:$0xff] }
 0x6d5   :  { %v1276_v23 = vadd.f32 %v1275_v10, %v3759_v0  ;;  %v1277_v58 = vpop.f32.mrb[38].mxu0  ;;  %v1317_v2 = vpop.f32.mrb[30].mxu1 }
 0x6d6   :  { %v1324_v40 = vadd.f32 %v1274_v18, %v4205_v39  ;;  %v1278_v41 = vpop.f32.mrb[39].mxu0  ;;  %v2735_v50 = vpop.f32.mrb[31].mxu1 }
 0x6d7   :  { %v1331_v55 = vadd.f32 %v1276_v23, %v4206_v42  ;;  %v2969_v41 = vld [vmem:[#allocation13 + $0x8] ss:$12 sps:$4 sm:$0xff]  }
 0x6d8   :  { %v2399_v44 = vmul.f32 -1.442695, %v1324_v40  ;;  %v2948_v40 = vld [vmem:[#allocation13] ss:$12 sps:$4 sm:$0xff]   ;;  %v2953_v42 = vld [vmem:[#allocation13 + $0x1c] ss:$12 sps:$4 sm:$0xff]  }
 0x6d9   :  { %v2400_v37 = vmul.f32 -1.442695, %v1331_v55  ;;  %v2951_v55 = vld [vmem:[#allocation13 + $0x18] ss:$12 sps:$4 sm:$0xff]  }
 0x6da   :  { %3078 = vpow2.f32 %v2399_v44  ;;  %v2973_v44 = vld [vmem:[#allocation13 + $0x20] ss:$12 sps:$4 sm:$0xff]  }
 0x6db   :  { %3080 = vpow2.f32 %v2400_v37  ;;  %v2956_v37 = vld [vmem:[#allocation13 + $0x34] ss:$12 sps:$4 sm:$0xff]  }
 0x6e4   :  { %v3079_v45 = vpop.eup %3078 }
 0x6e5   :  { %v1328_v46 = vadd.f32 1.0, %v3079_v45  ;;  %v3081_v47 = vpop.eup %3080  ;;  %v2954_v45 = vld [vmem:[#allocation13 + $0x30] ss:$12 sps:$4 sm:$0xff]  }
 0x6e6   :  { %v1335_v59 = vadd.f32 1.0, %v3081_v47  ;;  %v2959_v47 = vld [vmem:[#allocation13 + $0x4c] ss:$12 sps:$4 sm:$0xff]  }
 0x6e7   :  { %3082 = vrcp.f32 %v1328_v46  ;;  %v2977_v46 = vld [vmem:[#allocation13 + $0x38] ss:$12 sps:$4 sm:$0xff]  }
 0x6f1   :  { %v3083_v9 = vpop.eup %3082 }
 0x6f2   :  { %v1338_v11 = vmul.f32 %v3083_v9, %v1315_v48  ;;  %v2957_v48 = vld [vmem:[#allocation13 + $0x48] ss:$12 sps:$4 sm:$0xff]   ;;  %v2981_v9 = vld [vmem:[#allocation13 + $0x50] ss:$12 sps:$4 sm:$0xff]  }
 0x6f4   :  { %v1339_v35 = vadd.f32 %v1338_v11, %v4207_v51  ;;  %v2962_v11 = vld [vmem:[#allocation13 + $0x64] ss:$12 sps:$4 sm:$0xff]   ;;  %v2960_v51 = vld [vmem:[#allocation13 + $0x60] ss:$12 sps:$4 sm:$0xff]  }
 0x6f6   :  { %3084 = vtanh.f32 %v1339_v35  ;;  %v2985_v35 = vld [vmem:[#allocation13 + $0x68] ss:$12 sps:$4 sm:$0xff]  }
 0x6f7   :  { %3086 = vrcp.f32 %v1335_v59  ;;  %v2965_v59 = vld [vmem:[#allocation13 + $0x7c] ss:$12 sps:$4 sm:$0xff]  }
 0x700   :  { %v3085_v22 = vpop.eup %3084 }
 0x701   :  { %v1341_v26 = vsub.f32 %v3969_v19, %v3085_v22  ;;  %v3087_v27 = vpop.eup %3086  ;;  %v4208_v19 = vld [vmem:[#allocation33_spill] sm:$0xff] }
 0x703   :  { %v1342_v29 = vmul.f32 %v3087_v27, %v1341_v26  ;;  %v2989_v26 = vld [vmem:[#allocation13 + $0x80] ss:$12 sps:$4 sm:$0xff]  }
 0x704   :  { %v2968_v27 = vld [vmem:[#allocation13 + $0x94] ss:$12 sps:$4 sm:$0xff]  }
 0x705   :  { %v4037_v30 = vadd.f32 %v3085_v22, %v1342_v29  ;;  %v2963_v22 = vld [vmem:[#allocation13 + $0x78] ss:$12 sps:$4 sm:$0xff]   ;;  %v2966_v29 = vld [vmem:[#allocation13 + $0x90] ss:$12 sps:$4 sm:$0xff]  }
 0x707   :  { %v1344_v32 = vpack.c.bf16 %v4037_v30, %v4037_v30 }
 0x709   :  { %1378 = vmatmul.mubr.bf16.vlgmr.msra.gmra.mrb[40].mxu0 %v1344_v32  ;;  %2753 = vmatmul.mubr.bf16.vlgmr.msra.gmra.mrb[32].mxu1 %v1344_v32  ;;  %v2972_v32 = vld [vmem:[#allocation13 + $0xac] ss:$12 sps:$4 sm:$0xff]  }
 0x70a   :  { %1452 = vmatpush1.bf16.msra.mxu0 %v3911_v53  ;;  %2757 = vmatpush3.bf16.msra.mxu1 %v3974_v15  ;;  %v3137_v53 = vld [vmem:[#allocation10 + $0x68] ss:$12 sps:$4 sm:$0xff]  }
 0x70b   :  { %1453 = vmatprep.subr.bf16.mxu0 %v3915_v20  ;;  %2758 = vmatprep.subr.bf16.mxu1 %v4202_v7  ;;  %v3138_v20 = vld [vmem:[#allocation10 + $0x80] ss:$12 sps:$4 sm:$0xff]  }
 0x70c   :  { %1483 = vmatprep.mubr.bf16.mxu0 %v4203_v17  ;;  %2772 = vmatprep.mubr.msk.bf16.mxu1 %vm3366_vm0, %v4202_v7 }
 0x70e   :  { %1454 = vmatpush1.bf16.msra.mxu0 %v3922_v60  ;;  %2759 = vmatpush3.bf16.msra.mxu1 %v3983_v24  ;;  %v3139_v60 = vld [vmem:[#allocation10 + $0x98] ss:$12 sps:$4 sm:$0xff]  }
 0x70f   :  { %1455 = vmatprep.subr.bf16.mxu0 %v3926_v13  ;;  %2760 = vmatprep.subr.bf16.mxu1 %v4202_v7  ;;  %v3140_v13 = vld [vmem:[#allocation10 + $0xa8] ss:$12 sps:$4 sm:$0xff]  }
 0x712   :  { %1456 = vmatpush1.bf16.msra.mxu0 %v3930_v36  ;;  %2761 = vmatpush3.bf16.msra.mxu1 %v3989_v21  ;;  %v3141_v36 = vld [vmem:[#allocation10 + $0xb0] ss:$12 sps:$4 sm:$0xff]   ;;  %v4209_v21 = vld [vmem:[#allocation34_spill] sm:$0xff] }
 0x713   :  { %1457 = vmatprep.subr.bf16.mxu0 %v3934_v3  ;;  %2762 = vmatprep.subr.bf16.mxu1 %v4202_v7  ;;  %v2950_v3 = vld [vmem:[#allocation13 + $0x4] ss:$12 sps:$4 sm:$0xff]  }
 0x716   :  { %1458 = vmatpush1.bf16.msra.mxu0 %v3938_v6  ;;  %2763 = vmatpush3.bf16.msra.mxu1 %v3995_v28 }
 0x717   :  { %1459 = vmatprep.subr.bf16.mxu0 %v3998_v56  ;;  %2764 = vmatprep.subr.bf16.mxu1 %v4202_v7 }
 0x71a   :  { %1460 = vmatpush1.bf16.msra.mxu0 %v4002_v62  ;;  %2765 = vmatpush3.bf16.msra.mxu1 %v3137_v53  ;;  %v2970_v53 = vld [vmem:[#allocation13 + $0xa8] ss:$12 sps:$4 sm:$0xff]  }
 0x71b   :  { %1461 = vmatprep.subr.bf16.mxu0 %v4006_v63  ;;  %2766 = vmatprep.subr.bf16.mxu1 %v4202_v7 }
 0x71e   :  { %1462 = vmatpush1.bf16.msra.mxu0 %v4010_v38  ;;  %2767 = vmatpush3.bf16.msra.mxu1 %v3138_v20  ;;  %v2997_v20 = vld [vmem:[#allocation13 + $0xb0] ss:$12 sps:$4 sm:$0xff]  }
 0x71f   :  { %1463 = vmatprep.subr.bf16.mxu0 %v4014_v1  ;;  %2768 = vmatprep.subr.bf16.mxu1 %v4202_v7 }
 0x722   :  { %1464 = vmatpush1.bf16.msra.mxu0 %v4018_v57  ;;  %2769 = vmatpush3.bf16.msra.mxu1 %v3139_v60  ;;  %v2976_v60 = vld [vmem:[#allocation15 + $0x4] ss:$12 sps:$4 sm:$0xff]  }
 0x723   :  { %1465 = vmatprep.subr.bf16.mxu0 %v4022_v49  ;;  %2770 = vmatprep.subr.bf16.mxu1 %v4202_v7 }
 0x726   :  { %1466 = vmatpush1.bf16.msra.mxu0 %v3140_v13  ;;  %2771 = vmatpush3.bf16.msra.mxu1 %v3141_v36  ;;  %v2974_v13 = vld [vmem:[#allocation15] ss:$12 sps:$4 sm:$0xff]   ;;  %v1593_v36 = vld [vmem:[%s4173_s6] sm:$0xf] }
 0x727   :  { %2776 = vmatprep.subr.bf16.mxu1 %v4202_v7  ;;  %1771 = vmatprep.subr.bf16.mxu0 %v2950_v3  ;;  %v3001_v3 = vld [vmem:[#allocation15 + $0x8] ss:$12 sps:$4 sm:$0xff]  }
 0x7dc   :  { %v1379_v6 = vpop.f32.mrb[40].mxu0  ;;  %v1420_v33 = vpop.f32.mrb[32].mxu1 }
 0x7dd   :  { %v1380_v34 = vadd.f32 %v1379_v6, %v3756_v8  ;;  %v1381_v16 = vpop.f32.mrb[41].mxu0  ;;  %v2754_v25 = vpop.f32.mrb[33].mxu1  ;;  %v1421_v57 = vadd.f32 %v1420_v33, %v3764_v61  ;;  %v2980_v6 = vld [vmem:[#allocation15 + $0x1c] ss:$12 sps:$4 sm:$0xff]   ;;  %v2978_v33 = vld [vmem:[#allocation15 + $0x18] ss:$12 sps:$4 sm:$0xff]  }
 0x7de   :  { %v1382_v31 = vadd.f32 %v1381_v16, %v3759_v0  ;;  %v1383_v43 = vpop.f32.mrb[42].mxu0  ;;  %v1423_v4 = vpop.f32.mrb[34].mxu1  ;;  %v2984_v16 = vld [vmem:[#allocation15 + $0x34] ss:$12 sps:$4 sm:$0xff]   ;;  %v2982_v25 = vld [vmem:[#allocation15 + $0x30] ss:$12 sps:$4 sm:$0xff]  }
 0x7df   :  { %v1430_v12 = vadd.f32 %v1380_v34, %v4208_v19  ;;  %v1384_v15 = vpop.f32.mrb[43].mxu0  ;;  %v2755_v24 = vpop.f32.mrb[35].mxu1  ;;  %v3005_v34 = vld [vmem:[#allocation15 + $0x20] ss:$12 sps:$4 sm:$0xff]   ;;  %v2986_v4 = vld [vmem:[#allocation15 + $0x48] ss:$12 sps:$4 sm:$0xff]  }
 0x7e0   :  { %v1437_v28 = vadd.f32 %v1382_v31, %v4209_v21  ;;  %v3006_v31 = vld [vmem:[#allocation15 + $0x38] ss:$12 sps:$4 sm:$0xff]   ;;  %v3007_v19 = vld [vmem:[#allocation15 + $0x50] ss:$12 sps:$4 sm:$0xff]   ;;  %v3008_v15 = vld [vmem:[#allocation15 + $0x68] ss:$12 sps:$4 sm:$0xff]  }
 0x7e1   :  { %v2401_v56 = vmul.f32 -1.442695, %v1430_v12  ;;  %v2988_v43 = vld [vmem:[#allocation15 + $0x4c] ss:$12 sps:$4 sm:$0xff]   ;;  %v2992_v12 = vld [vmem:[#allocation15 + $0x64] ss:$12 sps:$4 sm:$0xff]  }
 0x7e2   :  { %v2402_v62 = vmul.f32 -1.442695, %v1437_v28  ;;  %v2996_v24 = vld [vmem:[#allocation15 + $0x7c] ss:$12 sps:$4 sm:$0xff]   ;;  %v2994_v21 = vld [vmem:[#allocation15 + $0x78] ss:$12 sps:$4 sm:$0xff]  }
 0x7e3   :  { %3088 = vpow2.f32 %v2401_v56  ;;  %v3009_v28 = vld [vmem:[#allocation15 + $0x80] ss:$12 sps:$4 sm:$0xff]  }
 0x7e4   :  { %3090 = vpow2.f32 %v2402_v62  ;;  %v3000_v56 = vld [vmem:[#allocation15 + $0x94] ss:$12 sps:$4 sm:$0xff]   ;;  %v2998_v62 = vld [vmem:[#allocation15 + $0x90] ss:$12 sps:$4 sm:$0xff]  }
 0x7ed   :  { %v3089_v63 = vpop.eup %3088 }
 0x7ee   :  { %v1434_v38 = vadd.f32 1.0, %v3089_v63  ;;  %v3091_v1 = vpop.eup %3090  ;;  %v3010_v63 = vld [vmem:[#allocation15 + $0x98] ss:$12 sps:$4 sm:$0xff]  }
 0x7ef   :  { %v1441_v10 = vadd.f32 1.0, %v3091_v1  ;;  %v3002_v1 = vld [vmem:[#allocation15 + $0xa8] ss:$12 sps:$4 sm:$0xff]  }
 0x7f0   :  { %3092 = vrcp.f32 %v1434_v38  ;;  %v3004_v38 = vld [vmem:[#allocation15 + $0xac] ss:$12 sps:$4 sm:$0xff]  }
 0x7fa   :  { %v3093_v49 = vpop.eup %3092 }
 0x7fb   :  { %v1444_v52 = vmul.f32 %v3093_v49, %v1421_v57  ;;  %v4107_v57 = vld [vmem:[%s4178_s11] sm:$0xff] }
 0x7fc   :  { %v3011_v49 = vld [vmem:[#allocation15 + $0xb0] ss:$12 sps:$4 sm:$0xff]  }
 0x7fd   :  { %v1445_v18 = vadd.f32 %v1444_v52, %v4210_v14  ;;  %v1852_v52 = vpack.c.bf16 %v4107_v57, %v4107_v57  ;;  %v3012_v14 = vld [vmem:[#allocation16] sm:$0xff]  }
 0x7ff   :  { %3094 = vtanh.f32 %v1445_v18  ;;  %v3013_v18 = vld [vmem:[#allocation16 + $0x8] sm:$0xff]  }
 0x800   :  { %3096 = vrcp.f32 %v1441_v10  ;;  %v3014_v10 = vld [vmem:[#allocation16 + $0x10] sm:$0xff]  }
 0x809   :  { %v3095_v54 = vpop.eup %3094 }
 0x80a   :  { %v1447_v23 = vsub.f32 %v4037_v30, %v3095_v54  ;;  %v3097_v58 = vpop.eup %3096  ;;  %v2993_v30 = vld [vmem:[#allocation13 + $0x98] ss:$12 sps:$4 sm:$0xff]  }
 0x80c   :  { %v1448_v2 = vmul.f32 %v3097_v58, %v1447_v23  ;;  %v3016_v23 = vld [vmem:[#allocation16 + $0x20] sm:$0xff]   ;;  %v3017_v58 = vld [vmem:[#allocation16 + $0x28] sm:$0xff]  }
 0x80e   :  { %v4077_v39 = vadd.f32 %v3095_v54, %v1448_v2  ;;  %v3015_v54 = vld [vmem:[#allocation16 + $0x18] sm:$0xff]   ;;  %v3018_v2 = vld [vmem:[#allocation16 + $0x30] sm:$0xff]  }
 0x810   :  { %v1450_v50 = vpack.c.bf16 %v4077_v39, %v4077_v39 }
 0x812   :  { %1484 = vmatmul.mubr.bf16.vlgmr.msra.gmra.mrb[44].mxu0 %v1450_v50  ;;  %2773 = vmatmul.mubr.bf16.vlgmr.msra.gmra.mrb[36].mxu1 %v1450_v50  ;;  %v3021_v50 = vld [vmem:[#allocation16 + $0x48] sm:$0xff]  }
 0x813   :  { %1772 = vmatpush1.bf16.msra.mxu0 %v2948_v40  ;;  %2777 = vmatpush3.bf16.msra.mxu1 %v2969_v41  ;;  %v3019_v40 = vld [vmem:[#allocation16 + $0x38] sm:$0xff]   ;;  %v3020_v41 = vld [vmem:[#allocation16 + $0x40] sm:$0xff]  }
 0x814   :  { %1773 = vmatprep.subr.bf16.mxu0 %v2953_v42  ;;  %2778 = vmatprep.subr.bf16.mxu1 %v4202_v7  ;;  %v3022_v42 = vld [vmem:[#allocation16 + $0x50] sm:$0xff]  }
 0x815   :  { %1803 = vmatprep.mubr.bf16.mxu0 %v4203_v17  ;;  %2792 = vmatprep.mubr.msk.bf16.mxu1 %vm3366_vm0, %v4202_v7 }
 0x817   :  { %1774 = vmatpush1.bf16.msra.mxu0 %v2951_v55  ;;  %2779 = vmatpush3.bf16.msra.mxu1 %v2973_v44  ;;  %v3023_v55 = vld [vmem:[#allocation16 + $0x58] sm:$0xff]   ;;  %v3024_v44 = vld [vmem:[#allocation16 + $0x60] sm:$0xff]  }
 0x818   :  { %1775 = vmatprep.subr.bf16.mxu0 %v2956_v37  ;;  %2780 = vmatprep.subr.bf16.mxu1 %v4202_v7  ;;  %v3025_v37 = vld [vmem:[#allocation16 + $0x68] sm:$0xff]  }
 0x81b   :  { %1776 = vmatpush1.bf16.msra.mxu0 %v2954_v45  ;;  %2781 = vmatpush3.bf16.msra.mxu1 %v2977_v46  ;;  %v3026_v45 = vld [vmem:[#allocation16 + $0x70] sm:$0xff]   ;;  %v3027_v46 = vld [vmem:[#allocation16 + $0x78] sm:$0xff]  }
 0x81c   :  { %1777 = vmatprep.subr.bf16.mxu0 %v2959_v47  ;;  %2782 = vmatprep.subr.bf16.mxu1 %v4202_v7 }
 0x81f   :  { %1778 = vmatpush1.bf16.msra.mxu0 %v2957_v48  ;;  %2783 = vmatpush3.bf16.msra.mxu1 %v2981_v9 }
 0x820   :  { %1779 = vmatprep.subr.bf16.mxu0 %v2962_v11  ;;  %2784 = vmatprep.subr.bf16.mxu1 %v4202_v7 }
 0x823   :  { %1780 = vmatpush1.bf16.msra.mxu0 %v2960_v51  ;;  %2785 = vmatpush3.bf16.msra.mxu1 %v2985_v35 }
 0x824   :  { %1781 = vmatprep.subr.bf16.mxu0 %v2965_v59  ;;  %2786 = vmatprep.subr.bf16.mxu1 %v4202_v7 }
 0x827   :  { %1782 = vmatpush1.bf16.msra.mxu0 %v2963_v22  ;;  %2787 = vmatpush3.bf16.msra.mxu1 %v2989_v26  ;;  %v4211_v26 = vld [vmem:[#allocation35_spill] sm:$0xff] }
 0x828   :  { %1783 = vmatprep.subr.bf16.mxu0 %v2968_v27  ;;  %2788 = vmatprep.subr.bf16.mxu1 %v4202_v7 }
 0x82b   :  { %1784 = vmatpush1.bf16.msra.mxu0 %v2966_v29  ;;  %2789 = vmatpush3.bf16.msra.mxu1 %v2993_v30 }
 0x82c   :  { %1785 = vmatprep.subr.bf16.mxu0 %v2972_v32  ;;  %2790 = vmatprep.subr.bf16.mxu1 %v4202_v7  ;;  %v4212_v32 = vld [vmem:[#allocation36_spill] sm:$0xff] }
 0x82f   :  { %1786 = vmatpush1.bf16.msra.mxu0 %v2970_v53  ;;  %2791 = vmatpush3.bf16.msra.mxu1 %v2997_v20 }
 0x830   :  { %1998 = vmatprep.subr.bf16.mxu0 %v2976_v60  ;;  %2796 = vmatprep.subr.bf16.mxu1 %v4202_v7 }
 0x832   :  { %1804 = vmatmul.mubr.bf16.vlgmr.msra.gmra.mrb[48].mxu0 %v1593_v36  ;;  %2793 = vmatmul.mubr.bf16.vlgmr.msra.gmra.mrb[40].mxu1 %v1593_v36 }
 0x833   :  { %1999 = vmatpush1.bf16.msra.mxu0 %v2974_v13  ;;  %2797 = vmatpush3.bf16.msra.mxu1 %v3001_v3 }
 0x834   :  { %2000 = vmatprep.subr.bf16.mxu0 %v2980_v6  ;;  %2798 = vmatprep.subr.bf16.mxu1 %v4202_v7 }
 0x835   :  { %2030 = vmatprep.mubr.bf16.mxu0 %v4203_v17  ;;  %2812 = vmatprep.mubr.msk.bf16.mxu1 %vm3366_vm0, %v4202_v7  ;;  %v2990_v17 = vld [vmem:[#allocation15 + $0x60] ss:$12 sps:$4 sm:$0xff]  }
 0x837   :  { %2001 = vmatpush1.bf16.msra.mxu0 %v2978_v33  ;;  %2799 = vmatpush3.bf16.msra.mxu1 %v3005_v34  ;;  %v4213_v33 = vld [vmem:[#allocation31_spill] sm:$0xff] }
 0x838   :  { %2002 = vmatprep.subr.bf16.mxu0 %v2984_v16  ;;  %2800 = vmatprep.subr.bf16.mxu1 %v4202_v7 }
 0x83b   :  { %2003 = vmatpush1.bf16.msra.mxu0 %v2982_v25  ;;  %2801 = vmatpush3.bf16.msra.mxu1 %v3006_v31 }
 0x83c   :  { %2004 = vmatprep.subr.bf16.mxu0 %v2988_v43  ;;  %2802 = vmatprep.subr.bf16.mxu1 %v4202_v7 }
 0x83f   :  { %2005 = vmatpush1.bf16.msra.mxu0 %v2986_v4  ;;  %2803 = vmatpush3.bf16.msra.mxu1 %v3007_v19 }
 0x840   :  { %2006 = vmatprep.subr.bf16.mxu0 %v2992_v12  ;;  %2804 = vmatprep.subr.bf16.mxu1 %v4202_v7 }
 0x843   :  { %2007 = vmatpush1.bf16.msra.mxu0 %v2990_v17  ;;  %2805 = vmatpush3.bf16.msra.mxu1 %v3008_v15 }
 0x844   :  { %2008 = vmatprep.subr.bf16.mxu0 %v2996_v24  ;;  %2806 = vmatprep.subr.bf16.mxu1 %v4202_v7 }
 0x847   :  { %2009 = vmatpush1.bf16.msra.mxu0 %v2994_v21  ;;  %2807 = vmatpush3.bf16.msra.mxu1 %v3009_v28  ;;  %v1626_v21 = vld [vmem:[%s4175_s8] sm:$0x7]  ;;  %v4214_v28 = vld [vmem:[#allocation25_spill] sm:$0xff] }
 0x848   :  { %2010 = vmatprep.subr.bf16.mxu0 %v3000_v56  ;;  %2808 = vmatprep.subr.bf16.mxu1 %v4202_v7  ;;  %v1631_v56 = vrot.slane %v1626_v21, %v4214_v28 }
 0x84b   :  { %2011 = vmatpush1.bf16.msra.mxu0 %v2998_v62  ;;  %2809 = vmatpush3.bf16.msra.mxu1 %v3010_v63 }
 0x84c   :  { %2012 = vmatprep.subr.bf16.mxu0 %v3004_v38  ;;  %2810 = vmatprep.subr.bf16.mxu1 %v4202_v7 }
 0x84f   :  { %2013 = vmatpush1.bf16.msra.mxu0 %v3002_v1  ;;  %2811 = vmatpush3.bf16.msra.mxu1 %v3011_v49  ;;  %v4215_v49 = vld [vmem:[#allocation26_spill] sm:$0xff] }
 0x850   :  { %2836 = vmatprep.subr.bf16.mxu1 %v4202_v7  ;;  %2816 = vmatprep.subr.bf16.mxu0 %v4202_v7 }
 0x852   :  { %2031 = vmatmul.mubr.bf16.vlgmr.msra.gmra.mrb[48].mxu0 %v1852_v52  ;;  %2813 = vmatmul.mubr.bf16.vlgmr.msra.gmra.mrb[44].mxu1 %v1852_v52  ;;  %v1635_v52 = vrot.slane %v1626_v21, %v4215_v49 }
 0x853   :  { %2852 = vmatprep.mubr.msk.bf16.mxu1 %vm3366_vm0, %v4202_v7  ;;  %2832 = vmatprep.mubr.msk.bf16.mxu0 %vm3366_vm0, %v4202_v7 }
 0x854   :  { %2837 = vmatpush3.bf16.msra.mxu1 %v3012_v14  ;;  %2817 = vmatpush3.bf16.msra.mxu0 %v3020_v41 }
 0x855   :  { %2838 = vmatprep.subr.bf16.mxu1 %v4202_v7  ;;  %2818 = vmatprep.subr.bf16.mxu0 %v4202_v7 }
 0x858   :  { %2839 = vmatpush3.bf16.msra.mxu1 %v3013_v18  ;;  %2819 = vmatpush3.bf16.msra.mxu0 %v3021_v50 }
 0x859   :  { %2840 = vmatprep.subr.bf16.mxu1 %v4202_v7  ;;  %2820 = vmatprep.subr.bf16.mxu0 %v4202_v7 }
 0x85c   :  { %2841 = vmatpush3.bf16.msra.mxu1 %v3014_v10  ;;  %2821 = vmatpush3.bf16.msra.mxu0 %v3022_v42 }
 0x85d   :  { %2842 = vmatprep.subr.bf16.mxu1 %v4202_v7  ;;  %2822 = vmatprep.subr.bf16.mxu0 %v4202_v7 }
 0x860   :  { %2843 = vmatpush3.bf16.msra.mxu1 %v3015_v54  ;;  %2823 = vmatpush3.bf16.msra.mxu0 %v3023_v55 }
 0x861   :  { %2844 = vmatprep.subr.bf16.mxu1 %v4202_v7  ;;  %2824 = vmatprep.subr.bf16.mxu0 %v4202_v7 }
 0x864   :  { %2845 = vmatpush3.bf16.msra.mxu1 %v3016_v23  ;;  %2825 = vmatpush3.bf16.msra.mxu0 %v3024_v44 }
 0x865   :  { %2846 = vmatprep.subr.bf16.mxu1 %v4202_v7  ;;  %2826 = vmatprep.subr.bf16.mxu0 %v4202_v7 }
 0x868   :  { %2847 = vmatpush3.bf16.msra.mxu1 %v3017_v58  ;;  %2827 = vmatpush3.bf16.msra.mxu0 %v3025_v37 }
 0x869   :  { %2848 = vmatprep.subr.bf16.mxu1 %v4202_v7  ;;  %2828 = vmatprep.subr.bf16.mxu0 %v4202_v7 }
 0x86c   :  { %2849 = vmatpush3.bf16.msra.mxu1 %v3018_v2  ;;  %2829 = vmatpush3.bf16.msra.mxu0 %v3026_v45  ;;  %v1639_v45 = vrot.slane %v1626_v21, %v3703_v5 }
 0x86d   :  { %2850 = vmatprep.subr.bf16.mxu1 %v4202_v7  ;;  %2830 = vmatprep.subr.bf16.mxu0 %v4202_v7 }
 0x870   :  { %2851 = vmatpush3.bf16.msra.mxu1 %v3019_v40  ;;  %2831 = vmatpush3.bf16.msra.mxu0 %v3027_v46 }
 0x8e5   :  { %v1485_v47 = vpop.f32.mrb[44].mxu0  ;;  %v1526_v48 = vpop.f32.mrb[36].mxu1 }
 0x8e6   :  { %v1486_v9 = vadd.f32 %v1485_v47, %v3756_v8  ;;  %v1487_v11 = vpop.f32.mrb[45].mxu0  ;;  %v2774_v51 = vpop.f32.mrb[37].mxu1  ;;  %v1527_v36 = vadd.f32 %v1526_v48, %v3764_v61  ;;  %v1853_v61 = vld [vmem:[%s4177_s10] sm:$0x7] }
 0x8e7   :  { %v1488_v35 = vadd.f32 %v1487_v11, %v3759_v0  ;;  %v1489_v59 = vpop.f32.mrb[46].mxu0  ;;  %v1529_v22 = vpop.f32.mrb[38].mxu1  ;;  %v1858_v62 = vrot.slane %v1853_v61, %v4214_v28  ;;  %v1862_v14 = vrot.slane %v1853_v61, %v4215_v49  ;;  %v1866_v37 = vrot.slane %v1853_v61, %v3703_v5 }
 0x8e8   :  { %v1536_v27 = vadd.f32 %v1486_v9, %v4211_v26  ;;  %v1490_v29 = vpop.f32.mrb[47].mxu0  ;;  %v2775_v30 = vpop.f32.mrb[39].mxu1 }
 0x8e9   :  { %v1543_v53 = vadd.f32 %v1488_v35, %v4212_v32  ;;  %v2856_v63 = vadd.f32 %v1858_v62, %v1631_v56  ;;  %v2858_v41 = vadd.f32 %v1862_v14, %v1635_v52 }
 0x8ea   :  { %v2403_v20 = vmul.f32 -1.442695, %v1536_v27 }
 0x8eb   :  { %v2404_v7 = vmul.f32 -1.442695, %v1543_v53 }
 0x8ec   :  { %3098 = vpow2.f32 %v2403_v20 }
 0x8ed   :  { %3100 = vpow2.f32 %v2404_v7 }
 0x8f6   :  { %v3099_v60 = vpop.eup %3098 }
 0x8f7   :  { %v1540_v13 = vadd.f32 1.0, %v3099_v60  ;;  %v3101_v8 = vpop.eup %3100  ;;  %v2471_v60 = vld [vmem:[%s4180_s13] ss:$0 sm:$0xff] }
 0x8f8   :  { %v1547_v16 = vadd.f32 1.0, %v3101_v8 }
 0x8f9   :  { %3102 = vrcp.f32 %v1540_v13 }
 0x903   :  { %v3103_v3 = vpop.eup %3102 }
 0x904   :  { %v1550_v0 = vmul.f32 %v3103_v3, %v1527_v36 }
 0x905   :  { %v1846_v6 = vpop.f32.mrb[40].mxu1 }
 0x906   :  { %v1551_v34 = vadd.f32 %v1550_v0, %v4213_v33  ;;  %v2794_v25 = vpop.f32.mrb[41].mxu1  ;;  %v1847_v9 = vadd.f32 %v1846_v6, %v1639_v45 }
 0x907   :  { %v1849_v31 = vpop.f32.mrb[42].mxu1 }
 0x908   :  { %3104 = vtanh.f32 %v1551_v34  ;;  %v2795_v43 = vpop.f32.mrb[43].mxu1 }
 0x909   :  { %3106 = vrcp.f32 %v1547_v16 }
 0x912   :  { %v3105_v4 = vpop.eup %3104 }
 0x913   :  { %v1553_v19 = vsub.f32 %v4077_v39, %v3105_v4  ;;  %v3107_v12 = vpop.eup %3106 }
 0x915   :  { %v1554_v17 = vmul.f32 %v3107_v12, %v1553_v19 }
 0x917   :  { %v1555_v15 = vadd.f32 %v3105_v4, %v1554_v17 }
 0x919   :  { %v2131_v24 = vpack.c.bf16 %v1555_v15, %v1555_v15 }
 0x91b   :  { %2853 = vmatmul.mubr.bf16.vlgmr.msra.gmra.mrb[48].mxu1 %v2131_v24 }
 0x925   :  { %v2032_v38 = vpop.f32.mrb[48].mxu0  ;;  %v2073_v39 = vpop.f32.mrb[44].mxu1 }
 0x926   :  { %v2857_v1 = vadd.f32 %v2856_v63, %v2032_v38  ;;  %v2034_v18 = vpop.f32.mrb[49].mxu0  ;;  %v2814_v10 = vpop.f32.mrb[45].mxu1  ;;  %v2074_v46 = vadd.f32 %v2073_v39, %v1866_v37 }
 0x927   :  { %v2036_v54 = vpop.f32.mrb[50].mxu0  ;;  %v2076_v23 = vpop.f32.mrb[46].mxu1  ;;  %v2859_v50 = vadd.f32 %v2858_v41, %v2034_v18 }
 0x928   :  { %v2453_v58 = vmul.f32 -1.442695, %v2857_v1  ;;  %v2037_v2 = vpop.f32.mrb[51].mxu0  ;;  %v2815_v40 = vpop.f32.mrb[47].mxu1 }
 0x929   :  { %v2454_v42 = vmul.f32 -1.442695, %v2859_v50 }
 0x92a   :  { %3108 = vpow2.f32 %v2453_v58 }
 0x92b   :  { %3110 = vpow2.f32 %v2454_v42 }
 0x934   :  { %v3109_v55 = vpop.eup %3108 }
 0x935   :  { %v2083_v44 = vadd.f32 1.0, %v3109_v55  ;;  %v3111_v47 = vpop.eup %3110 }
 0x936   :  { %v2090_v51 = vadd.f32 1.0, %v3111_v47 }
 0x937   :  { %3112 = vrcp.f32 %v2083_v44 }
 0x941   :  { %v3113_v48 = vpop.eup %3112 }
 0x942   :  { %v2093_v11 = vmul.f32 %v3113_v48, %v2074_v46 }
 0x944   :  { %v2094_v35 = vadd.f32 %v2093_v11, %v1847_v9 }
 0x946   :  { %3114 = vtanh.f32 %v2094_v35 }
 0x947   :  { %3116 = vrcp.f32 %v2090_v51 }
 0x950   :  { %v3115_v59 = vpop.eup %3114 }
 0x951   :  { %v2096_v22 = vsub.f32 %v4107_v57, %v3115_v59  ;;  %v3117_v26 = vpop.eup %3116 }
 0x953   :  { %v2097_v27 = vmul.f32 %v3117_v26, %v2096_v22 }
 0x955   :  { %v2098_v29 = vadd.f32 %v3115_v59, %v2097_v27 }
 0x957   :  { %v2132_v30 = vpack.c.bf16 %v2098_v29, %v2098_v29 }
 0x959   :  { %2833 = vmatmul.mubr.bf16.vlgmr.msra.gmra.mrb[52].mxu0 %v2132_v30 }
 0x9ee   :  { %v2303_v32 = vpop.f32.mrb[48].mxu1 }
 0x9ef   :  { %v2854_v53 = vpop.f32.mrb[49].mxu1 }
 0x9f0   :  { %v2306_v5 = vpop.f32.mrb[50].mxu1 }
 0x9f1   :  { %v2855_v20 = vpop.f32.mrb[51].mxu1 }
 0xa2c   :  { %v2215_v7 = vpop.f32.mrb[52].mxu0 }
 0xa2d   :  { %v2304_v13 = vadd.f32 %v2303_v32, %v2215_v7  ;;  %v2834_v8 = vpop.f32.mrb[53].mxu0 }
 0xa2e   :  { %v2218_v36 = vpop.f32.mrb[54].mxu0 }
 0xa2f   :  { %v2316_v57 = vadd.f32 %v2471_v60, %v2304_v13  ;;  %v2835_v3 = vpop.f32.mrb[55].mxu0 }
 0xa31   :  { %2317 = vst [vmem:[#allocation18] sm:$0xff] %v2316_v57 }
 0xa32   :  { %3329 = shalt.err (!%p3326_p12)
}
 0xa33   :  { %s3330_s13 = scalar_lea.hbm %s4181_s14, 128 }
 0xa34   :  { %p3331_p13 = scmp.ne.s32.totalorder %s4181_s14, %s3330_s13  ;;  %p3334_p0 = scmp.lt.u32.totalorder %s3330_s13, %s4181_s14 }
 0xa36   :  { %p3336_p1 = pnand %p3334_p0, %p3331_p13 }
 0xa38   :  { %3339 = shalt.err (!%p3336_p1)
}
 0xa39   :  { %2327 = dma.vmem_to_hbm [thread:$0]  %s2325_s1, 128, %s4181_s14, [#allocation6]  }
 0xa3a   :  { %3350 = dma.done.wait [#allocation6], 128  }
 0xa3b   :  { %3351 = vsyncadd [#allocation6], 4294967168 }
 0xa3c   :  { %2331 = vsyncpa [#allocation5], 1 }
 0xa3d   :  { %2332 = vsyncpa [#allocation8], 1 }
 0xa3e   :  { %2333 = vsyncpa [#allocation11], 1 }
 0xa3f   :  { %2334 = vsyncpa [#allocation14], 1 }
 0xa40   :  { %2335 = vsyncpa [#allocation17], 1 }
 0xa41   :  { %2336 = vsyncpa [#allocation6], 1 }

// kernel: tpu_custom_call.1
= control target key start
LH: loop header
LB: loop body
LE: loop exit
PB: predicated region body
PF: predicated region fallthrough
CT: control target
= control target key end

     0   :  { %19 = vsyncpa [#allocation5], 0  ;;  %s4167_s0 = inlined_call_operand.hbm [shape: bf16[8,8,128], index: 0, kind: input, shape index: {}]   ;;  %s4168_s1 = inlined_call_operand.hbm [shape: bf16[128,384], index: 1, kind: input, shape index: {}]   ;;  %s4169_s2 = inlined_call_operand.hbm [shape: f32[1,384], index: 2, kind: input, shape index: {}]   ;;  %s4170_s3 = inlined_call_operand.hbm [shape: bf16[128,384], index: 3, kind: input, shape index: {}]   ;;  %s4171_s4 = inlined_call_operand.hbm [shape: f32[1,384], index: 4, kind: input, shape index: {}]   ;;  %s4172_s5 = inlined_call_operand.vmem [shape: f32[8,128], index: 5, kind: input, shape index: {}]   ;;  %s4173_s6 = inlined_call_operand.vmem [shape: bf16[8,128], index: 6, kind: input, shape index: {}]   ;;  %s4174_s7 = inlined_call_operand.hbm [shape: bf16[128,384], index: 7, kind: input, shape index: {}]   ;;  %s4175_s8 = inlined_call_operand.vmem [shape: f32[1,384], index: 8, kind: input, shape index: {}]   ;;  %s4176_s9 = inlined_call_operand.hbm [shape: bf16[128,384], index: 9, kind: input, shape index: {}]   ;;  %s4177_s10 = inlined_call_operand.vmem [shape: f32[1,384], index: 10, kind: input, shape index: {}]   ;;  %s4178_s11 = inlined_call_operand.vmem [shape: f32[8,128], index: 11, kind: input, shape index: {}]   ;;  %s4179_s12 = inlined_call_operand.hbm [shape: bf16[256,128], index: 12, kind: input, shape index: {}]   ;;  %s4180_s13 = inlined_call_operand.vmem [shape: f32[1,128], index: 13, kind: input, shape index: {}]   ;;  %s4181_s14 = inlined_call_operand.hbm [shape: f32[8,128], index: 14, kind: output, shape index: {}]  }
   0x1   :  { %20 = vsyncpa [#allocation8], 0 }
   0x2   :  { %21 = vsyncpa [#allocation11], 0 }
   0x3   :  { %22 = vsyncpa [#allocation14], 0 }
   0x4   :  { %23 = vsyncpa [#allocation17], 0 }
   0x5   :  { %24 = vsyncpa [#allocation6], 0  ;;  %s3352_s29 = smov [#allocation7]   ;;  %s3142_s17 = scalar_lea.hbm %s4168_s1, 3072 }
   0x6   :  { %s42_s30 = sshll.u32 %s3352_s29, 4  ;;  %p3143_p0 = scmp.ne.s32.totalorder %s4168_s1, %s3142_s17  ;;  %s43_s30 = int_to_ptr.vmem [resolvable:$true] %s42_s30 }
   0x7   :  { %p3146_p1 = scmp.lt.u32.totalorder %s3142_s17, %s4168_s1 }
   0x9   :  { %p3148_p2 = pnand %p3146_p1, %p3143_p0 }
   0xb   :  { %3151 = shalt.err (!%p3148_p2)
}
   0xc   :  { %s3152_s22 = scalar_lea.vmem %s43_s30, 3072  ;;  %p3157_p4 = scmp.lt.s32.totalorder %s43_s30, %s43_s30 }
   0xd   :  { %p3153_p3 = scmp.ne.s32.totalorder %s43_s30, %s3152_s22  ;;  %p3158_p5 = scmp.lt.s32.totalorder %s3152_s22, %s3152_s22 }
   0xf   :  { %p3159_p6 = por %p3158_p5, %p3157_p4 }
  0x11   :  { %p3160_p7 = pnand %p3159_p6, %p3153_p3 }
  0x13   :  { %3163 = shalt.err (!%p3160_p7)
}
  0x14   :  { %s3353_s23 = smov 192   ;;  %s3354_s24 = smov 12  }
  0x15   :  { %48 = dma.hbm_to_vmem [thread:$0]  %s4168_s1, 3072, %s43_s30, [#allocation8], %s3353_s23, %s3353_s23, %s3354_s24  }
  0x16   :  { %s3355_s27 = smov [#allocation10]   ;;  %s3356_s29 = smov [#allocation13]  }
  0x17   :  { %s64_s28 = sshll.u32 %s3355_s27, 4  ;;  %s90_s15 = sshll.u32 %s3356_s29, 4  ;;  %s65_s28 = int_to_ptr.vmem [resolvable:$true] %s64_s28  ;;  %s91_s15 = int_to_ptr.vmem [resolvable:$true] %s90_s15 }
  0x18   :  { %s3164_s18 = scalar_lea.hbm %s4170_s3, 3072 }
  0x19   :  { %p3165_p8 = scmp.ne.s32.totalorder %s4170_s3, %s3164_s18  ;;  %p3168_p9 = scmp.lt.u32.totalorder %s3164_s18, %s4170_s3 }
  0x1b   :  { %p3170_p10 = pnand %p3168_p9, %p3165_p8 }
  0x1d   :  { %3173 = shalt.err (!%p3170_p10)
}
  0x1e   :  { %s3174_s1 = scalar_lea.vmem %s65_s28, 3072  ;;  %p3179_p12 = scmp.lt.s32.totalorder %s65_s28, %s65_s28 }
  0x1f   :  { %p3175_p11 = scmp.ne.s32.totalorder %s65_s28, %s3174_s1  ;;  %p3180_p13 = scmp.lt.s32.totalorder %s3174_s1, %s3174_s1 }
  0x21   :  { %p3181_p0 = por %p3180_p13, %p3179_p12 }
  0x23   :  { %p3182_p1 = pnand %p3181_p0, %p3175_p11 }
  0x25   :  { %3185 = shalt.err (!%p3182_p1)
}
  0x26   :  { %70 = dma.hbm_to_vmem [thread:$0]  %s4170_s3, 3072, %s65_s28, [#allocation11], %s3353_s23, %s3353_s23, %s3354_s24  }
  0x27   :  { %s3186_s29 = scalar_lea.hbm %s4174_s7, 3072 }
  0x28   :  { %p3187_p2 = scmp.ne.s32.totalorder %s4174_s7, %s3186_s29  ;;  %p3190_p3 = scmp.lt.u32.totalorder %s3186_s29, %s4174_s7 }
  0x2a   :  { %p3192_p4 = pnand %p3190_p3, %p3187_p2 }
  0x2c   :  { %3195 = shalt.err (!%p3192_p4)
}
  0x2d   :  { %s3196_s20 = scalar_lea.vmem %s91_s15, 3072  ;;  %p3201_p6 = scmp.lt.s32.totalorder %s91_s15, %s91_s15 }
  0x2e   :  { %p3197_p5 = scmp.ne.s32.totalorder %s91_s15, %s3196_s20  ;;  %p3202_p7 = scmp.lt.s32.totalorder %s3196_s20, %s3196_s20 }
  0x30   :  { %p3203_p8 = por %p3202_p7, %p3201_p6 }
  0x32   :  { %p3204_p9 = pnand %p3203_p8, %p3197_p5 }
  0x34   :  { %3207 = shalt.err (!%p3204_p9)
}
  0x35   :  { %96 = dma.hbm_to_vmem [thread:$0]  %s4174_s7, 3072, %s91_s15, [#allocation14], %s3353_s23, %s3353_s23, %s3354_s24  }
  0x36   :  { %s3357_s21 = smov [#allocation4]   ;;  %s3208_s25 = scalar_lea.hbm %s4167_s0, 512 }
  0x37   :  { %s30_s22 = sshll.u32 %s3357_s21, 4  ;;  %p3209_p10 = scmp.ne.s32.totalorder %s4167_s0, %s3208_s25  ;;  %s31_s22 = int_to_ptr.vmem [resolvable:$true] %s30_s22 }
  0x38   :  { %p3212_p11 = scmp.lt.u32.totalorder %s3208_s25, %s4167_s0 }
  0x3a   :  { %p3214_p12 = pnand %p3212_p11, %p3209_p10 }
  0x3c   :  { %3217 = shalt.err (!%p3214_p12)
}
  0x3d   :  { %s3218_s17 = scalar_lea.vmem %s31_s22, 512  ;;  %p3223_p0 = scmp.lt.s32.totalorder %s31_s22, %s31_s22 }
  0x3e   :  { %p3219_p13 = scmp.ne.s32.totalorder %s31_s22, %s3218_s17  ;;  %p3224_p1 = scmp.lt.s32.totalorder %s3218_s17, %s3218_s17 }
  0x40   :  { %p3225_p2 = por %p3224_p1, %p3223_p0 }
  0x42   :  { %p3226_p3 = pnand %p3225_p2, %p3219_p13 }
  0x44   :  { %3229 = shalt.err (!%p3226_p3)
}
  0x45   :  { %s3358_s7 = smov 64   ;;  %s3359_s15 = smov 4  }
  0x46   :  { %36 = dma.hbm_to_vmem [thread:$0]  %s4167_s0, 512, %s31_s22, [#allocation5], %s3358_s7, %s3358_s7, %s3359_s15  }
  0x47   :  { %s3360_s20 = smov [#allocation9]   ;;  %s3361_s28 = smov [#allocation12]  }
  0x48   :  { %s55_s3 = sshll.u32 %s3360_s20, 4  ;;  %s77_s21 = sshll.u32 %s3361_s28, 4  ;;  %s56_s3 = int_to_ptr.vmem [resolvable:$true] %s55_s3  ;;  %s78_s21 = int_to_ptr.vmem [resolvable:$true] %s77_s21 }
  0x49   :  { %s3230_s25 = scalar_lea.hbm %s4169_s2, 48 }
  0x4a   :  { %p3231_p4 = scmp.ne.s32.totalorder %s4169_s2, %s3230_s25  ;;  %p3234_p5 = scmp.lt.u32.totalorder %s3230_s25, %s4169_s2 }
  0x4c   :  { %p3236_p6 = pnand %p3234_p5, %p3231_p4 }
  0x4e   :  { %3239 = shalt.err (!%p3236_p6)
}
  0x4f   :  { %s3240_s0 = scalar_lea.vmem %s56_s3, 48  ;;  %s3244_s22 = scalar_lea.vmem %s56_s3, 64 }
  0x50   :  { %p3241_p7 = scmp.ne.s32.totalorder %s56_s3, %s3240_s0  ;;  %p3245_p8 = scmp.lt.s32.totalorder %s56_s3, %s56_s3 }
  0x51   :  { %p3246_p9 = scmp.lt.s32.totalorder %s3244_s22, %s3240_s0 }
  0x53   :  { %p3247_p10 = por %p3246_p9, %p3245_p8 }
  0x55   :  { %p3248_p11 = pnand %p3247_p10, %p3241_p7 }
  0x57   :  { %3251 = shalt.err (!%p3248_p11)
}
  0x58   :  { %58 = dma.hbm_to_vmem [thread:$0]  %s4169_s2, 48, %s56_s3, [#allocation8]  }
  0x59   :  { %s3252_s28 = scalar_lea.hbm %s4171_s4, 48 }
  0x5a   :  { %p3253_p12 = scmp.ne.s32.totalorder %s4171_s4, %s3252_s28  ;;  %p3256_p13 = scmp.lt.u32.totalorder %s3252_s28, %s4171_s4 }
  0x5c   :  { %p3258_p0 = pnand %p3256_p13, %p3253_p12 }
  0x5e   :  { %3261 = shalt.err (!%p3258_p0)
}
  0x5f   :  { %s3262_s27 = scalar_lea.vmem %s78_s21, 48  ;;  %s3266_s29 = scalar_lea.vmem %s78_s21, 64 }
  0x60   :  { %p3263_p1 = scmp.ne.s32.totalorder %s78_s21, %s3262_s27  ;;  %p3267_p2 = scmp.lt.s32.totalorder %s78_s21, %s78_s21 }
  0x61   :  { %p3268_p3 = scmp.lt.s32.totalorder %s3266_s29, %s3262_s27 }
  0x63   :  { %p3269_p4 = por %p3268_p3, %p3267_p2 }
  0x65   :  { %p3270_p5 = pnand %p3269_p4, %p3263_p1 }
  0x67   :  { %3273 = shalt.err (!%p3270_p5)
}
  0x68   :  { %80 = dma.hbm_to_vmem [thread:$0]  %s4171_s4, 48, %s78_s21, [#allocation11]  }
  0x69   :  { %s3362_s16 = smov [#allocation15]   ;;  %s3363_s22 = smov [#allocation16]  }
  0x6a   :  { %s104_s0 = sshll.u32 %s3362_s16, 4  ;;  %s120_s17 = sshll.u32 %s3363_s22, 4  ;;  %s105_s0 = int_to_ptr.vmem [resolvable:$true] %s104_s0  ;;  %s3527_s17 = int_to_ptr.vmem [resolvable:$true] %s120_s17 }
  0x6b   :  { %s3274_s20 = scalar_lea.hbm %s4176_s9, 3072 }
  0x6c   :  { %p3275_p6 = scmp.ne.s32.totalorder %s4176_s9, %s3274_s20  ;;  %p3278_p7 = scmp.lt.u32.totalorder %s3274_s20, %s4176_s9 }
  0x6e   :  { %p3280_p8 = pnand %p3278_p7, %p3275_p6 }
  0x70   :  { %3283 = shalt.err (!%p3280_p8)
}
  0x71   :  { %s3284_s4 = scalar_lea.vmem %s105_s0, 3072  ;;  %p3289_p10 = scmp.lt.s32.totalorder %s105_s0, %s105_s0 }
  0x72   :  { %p3285_p9 = scmp.ne.s32.totalorder %s105_s0, %s3284_s4  ;;  %p3290_p11 = scmp.lt.s32.totalorder %s3284_s4, %s3284_s4 }
  0x74   :  { %p3291_p12 = por %p3290_p11, %p3289_p10 }
  0x76   :  { %p3292_p13 = pnand %p3291_p12, %p3285_p9 }
  0x78   :  { %3295 = shalt.err (!%p3292_p13)
}
  0x79   :  { %110 = dma.hbm_to_vmem [thread:$0]  %s4176_s9, 3072, %s105_s0, [#allocation14], %s3353_s23, %s3353_s23, %s3354_s24  }
  0x7a   :  { %s3296_s2 = scalar_lea.hbm %s4179_s12, 2048 }
  0x7b   :  { %p3297_p0 = scmp.ne.s32.totalorder %s4179_s12, %s3296_s2  ;;  %p3300_p1 = scmp.lt.u32.totalorder %s3296_s2, %s4179_s12 }
  0x7d   :  { %p3302_p2 = pnand %p3300_p1, %p3297_p0 }
  0x7f   :  { %3305 = shalt.err (!%p3302_p2)
}
  0x80   :  { %s3306_s19 = scalar_lea.vmem %s3527_s17, 2048  ;;  %p3311_p4 = scmp.lt.s32.totalorder %s3527_s17, %s3527_s17 }
  0x81   :  { %p3307_p3 = scmp.ne.s32.totalorder %s3527_s17, %s3306_s19  ;;  %p3312_p5 = scmp.lt.s32.totalorder %s3306_s19, %s3306_s19 }
  0x83   :  { %p3313_p6 = por %p3312_p5, %p3311_p4 }
  0x85   :  { %p3314_p7 = pnand %p3313_p6, %p3307_p3 }
  0x87   :  { %3317 = shalt.err (!%p3314_p7)
}
  0x88   :  { %126 = dma.hbm_to_vmem [thread:$0]  %s4179_s12, 2048, %s3527_s17, [#allocation17], %s3358_s7, %s3358_s7, %s3359_s15  }
  0x89   :  { %3340 = dma.done.wait [#allocation5], 512  }
  0x8a   :  { %3341 = vsyncadd [#allocation5], 4294966784 }
  0x8b   :  { %3342 = dma.done.wait [#allocation8], 3120  }
  0x8c   :  { %3343 = vsyncadd [#allocation8], 4294964176 }
  0x8d   :  { %3344 = dma.done.wait [#allocation11], 3120  }
  0x8e   :  { %3345 = vsyncadd [#allocation11], 4294964176 }
  0x8f   :  { %3346 = dma.done.wait [#allocation14], 6144  }
  0x90   :  { %3347 = vsyncadd [#allocation14], 4294961152 }
  0x91   :  { %3348 = dma.done.wait [#allocation17], 2048  }
  0x92   :  { %3349 = vsyncadd [#allocation17], 4294965248  ;;  %v4182_v0 = vmov 0   ;;  %v2880_v1 = vld [vmem:[#allocation7 + $0x4] ss:$12 sps:$4 sm:$0xff]   ;;  %v2915_v31 = vld [vmem:[#allocation4 + $0x8] sm:$0xff]   ;;  %v202_v56 = vlaneseq }
  0x93   :  { %401 = vmatprep.mubr.bf16.mxu0 %v4182_v0  ;;  %v2882_v2 = vld [vmem:[#allocation7] ss:$12 sps:$4 sm:$0xff]   ;;  %369 = vmatprep.subr.bf16.mxu0 %v2880_v1  ;;  %v2883_v3 = vld [vmem:[#allocation7 + $0x1c] ss:$12 sps:$4 sm:$0xff]   ;;  %v2885_v4 = vld [vmem:[#allocation7 + $0x18] ss:$12 sps:$4 sm:$0xff]  }
  0x94   :  { %370 = vmatpush1.bf16.msra.mxu0 %v2882_v2  ;;  %v2886_v5 = vld [vmem:[#allocation7 + $0x34] ss:$12 sps:$4 sm:$0xff]   ;;  %v2888_v6 = vld [vmem:[#allocation7 + $0x30] ss:$12 sps:$4 sm:$0xff]   ;;  %v2889_v7 = vld [vmem:[#allocation7 + $0x4c] ss:$12 sps:$4 sm:$0xff]  }
  0x95   :  { %371 = vmatprep.subr.bf16.mxu0 %v2883_v3  ;;  %v2901_v8 = vld [vmem:[#allocation7 + $0x8] ss:$12 sps:$4 sm:$0xff]   ;;  %v2892_v10 = vld [vmem:[#allocation7 + $0x64] ss:$12 sps:$4 sm:$0xff]   ;;  %v2905_v11 = vld [vmem:[#allocation7 + $0x20] ss:$12 sps:$4 sm:$0xff]  }
  0x96   :  { %v2891_v9 = vld [vmem:[#allocation7 + $0x48] ss:$12 sps:$4 sm:$0xff]   ;;  %2592 = vmatprep.subr.bf16.mxu1 %v2901_v8  ;;  %v2906_v12 = vld [vmem:[#allocation4] sm:$0xff]   ;;  %v2914_v16 = vld [vmem:[#allocation7 + $0x50] ss:$12 sps:$4 sm:$0xff]   ;;  %v4184_v38 = vmov 0.0  }
  0x97   :  { %2593 = vmatpush3.bf16.msra.mxu1 %v2901_v8  ;;  %v2894_v13 = vld [vmem:[#allocation7 + $0x60] ss:$12 sps:$4 sm:$0xff]   ;;  %v2910_v14 = vld [vmem:[#allocation7 + $0x38] ss:$12 sps:$4 sm:$0xff]   ;;  %2608 = vmatprep.mubr.bf16.mxu1 %v2906_v12  ;;  %v2895_v15 = vld [vmem:[#allocation7 + $0x7c] ss:$12 sps:$4 sm:$0xff]  }
  0x98   :  { %372 = vmatpush1.bf16.msra.mxu0 %v2885_v4  ;;  %2594 = vmatprep.subr.bf16.mxu1 %v2905_v11  ;;  %v2897_v17 = vld [vmem:[#allocation7 + $0x78] ss:$12 sps:$4 sm:$0xff]   ;;  %v2898_v18 = vld [vmem:[#allocation7 + $0x94] ss:$12 sps:$4 sm:$0xff]   ;;  %v2900_v20 = vld [vmem:[#allocation7 + $0x90] ss:$12 sps:$4 sm:$0xff]  }
  0x99   :  { %373 = vmatprep.subr.bf16.mxu0 %v2886_v5  ;;  %v2919_v19 = vld [vmem:[#allocation7 + $0x68] ss:$12 sps:$4 sm:$0xff]   ;;  %v2902_v21 = vld [vmem:[#allocation7 + $0xac] ss:$12 sps:$4 sm:$0xff]   ;;  %v3567_v26 = vld [vmem:[#allocation10] ss:$12 sps:$4 sm:$0xff]  }
  0x9a   :  { %v2923_v22 = vld [vmem:[#allocation7 + $0x80] ss:$12 sps:$4 sm:$0xff]   ;;  %v2904_v23 = vld [vmem:[#allocation7 + $0xa8] ss:$12 sps:$4 sm:$0xff]   ;;  %v2928_v25 = vld [vmem:[#allocation7 + $0x98] ss:$12 sps:$4 sm:$0xff]  }
  0x9b   :  { %2595 = vmatpush3.bf16.msra.mxu1 %v2905_v11  ;;  %v3565_v24 = vld [vmem:[#allocation10 + $0x4] ss:$12 sps:$4 sm:$0xff]   ;;  %v3570_v27 = vld [vmem:[#allocation10 + $0x1c] ss:$12 sps:$4 sm:$0xff]   ;;  %v2932_v28 = vld [vmem:[#allocation7 + $0xb0] ss:$12 sps:$4 sm:$0xff]  }
  0x9c   :  { %374 = vmatpush1.bf16.msra.mxu0 %v2888_v6  ;;  %2596 = vmatprep.subr.bf16.mxu1 %v2910_v14  ;;  %v3573_v29 = vld [vmem:[#allocation10 + $0x18] ss:$12 sps:$4 sm:$0xff]   ;;  %v3577_v30 = vld [vmem:[#allocation10 + $0x34] ss:$12 sps:$4 sm:$0xff]   ;;  %v3580_v32 = vld [vmem:[#allocation10 + $0x30] ss:$12 sps:$4 sm:$0xff]  }
  0x9d   :  { %375 = vmatprep.subr.bf16.mxu0 %v2889_v7  ;;  %v3583_v33 = vld [vmem:[#allocation10 + $0x4c] ss:$12 sps:$4 sm:$0xff]   ;;  %v3585_v34 = vld [vmem:[#allocation10 + $0x48] ss:$12 sps:$4 sm:$0xff]   ;;  %v3589_v37 = vld [vmem:[#allocation10 + $0x64] ss:$12 sps:$4 sm:$0xff]  }
  0x9e   :  { %v2924_v35 = vld [vmem:[#allocation4 + $0x10] sm:$0xff]   ;;  %v3587_v36 = vld [vmem:[#allocation10 + $0x8] ss:$12 sps:$4 sm:$0xff]   ;;  %v3604_v42 = vld [vmem:[#allocation10 + $0x38] ss:$12 sps:$4 sm:$0xff]   ;;  %vm3366_vm0 = vmmov 0  }
  0x9f   :  { %2597 = vmatpush3.bf16.msra.mxu1 %v2910_v14  ;;  %v3594_v39 = vld [vmem:[#allocation10 + $0x20] ss:$12 sps:$4 sm:$0xff]   ;;  %v3600_v41 = vld [vmem:[#allocation10 + $0x7c] ss:$12 sps:$4 sm:$0xff]   ;;  %v2933_v43 = vld [vmem:[#allocation4 + $0x18] sm:$0xff]   ;;  %v203_v57 = vshrl.u32 %v202_v56, 7 }
  0xa0   :  { %376 = vmatpush1.bf16.msra.mxu0 %v2891_v9  ;;  %2598 = vmatprep.subr.bf16.mxu1 %v2914_v16  ;;  %v3597_v40 = vld [vmem:[#allocation10 + $0x60] ss:$12 sps:$4 sm:$0xff]   ;;  %v3607_v44 = vld [vmem:[#allocation10 + $0x78] ss:$12 sps:$4 sm:$0xff]   ;;  %v3615_v46 = vld [vmem:[#allocation10 + $0x50] ss:$12 sps:$4 sm:$0xff]  }
  0xa1   :  { %377 = vmatprep.subr.bf16.mxu0 %v2892_v10  ;;  %v3610_v45 = vld [vmem:[#allocation10 + $0x94] ss:$12 sps:$4 sm:$0xff]   ;;  %v3618_v47 = vld [vmem:[#allocation10 + $0x90] ss:$12 sps:$4 sm:$0xff]   ;;  %v3623_v48 = vld [vmem:[#allocation10 + $0xac] ss:$12 sps:$4 sm:$0xff]  }
  0xa2   :  { %v3627_v49 = vld [vmem:[#allocation10 + $0x68] ss:$12 sps:$4 sm:$0xff]   ;;  %v3635_v51 = vld [vmem:[%s4172_s5] sm:$0xff]  ;;  %v3649_v54 = vld [vmem:[#allocation10 + $0x98] ss:$12 sps:$4 sm:$0xff]   ;;  %v3695_v58 = vsub.s32 0, %v203_v57 }
  0xa3   :  { %2599 = vmatpush3.bf16.msra.mxu1 %v2914_v16  ;;  %v3630_v50 = vld [vmem:[#allocation10 + $0xa8] ss:$12 sps:$4 sm:$0xff]   ;;  %v3641_v52 = vld [vmem:[#allocation10 + $0x80] ss:$12 sps:$4 sm:$0xff]   ;;  %v565_v53 = vpack.c.bf16 %v3635_v51, %v3635_v51  ;;  %v3654_v55 = vld [vmem:[#allocation10 + $0xb0] ss:$12 sps:$4 sm:$0xff]  }
  0xa4   :  { %378 = vmatpush1.bf16.msra.mxu0 %v2894_v13  ;;  %2600 = vmatprep.subr.bf16.mxu1 %v2919_v19  ;;  %4190 = vst [vmem:[#allocation25_spill] sm:$0xff] %v3695_v58  ;;  %v200_v59 = vld [vmem:[#allocation9] sm:$0x7]  ;;  %v3697_v60 = vsub.s32 1, %v203_v57  ;;  %v3703_v5 = vsub.s32 2, %v203_v57  ;;  %s3367_s28 = smov [#allocation18]  }
  0xa5   :  { %379 = vmatprep.subr.bf16.mxu0 %v2895_v15  ;;  %v205_v62 = vrot.slane %v200_v59, %v3695_v58  ;;  %s2324_s1 = sshll.u32 %s3367_s28, 4  ;;  %s2325_s1 = int_to_ptr.vmem [resolvable:$true] %s2324_s1 }
  0xa6   :  { %4191 = vst [vmem:[#allocation26_spill] sm:$0xff] %v3697_v60  ;;  %v209_v1 = vrot.slane %v200_v59, %v3697_v60  ;;  %v3708_v7 = vrot.slane %v200_v59, %v3703_v5  ;;  %s3318_s30 = scalar_lea.vmem %s2325_s1, 128  ;;  %p3323_p9 = scmp.lt.s32.totalorder %s2325_s1, %s2325_s1 }
  0xa7   :  { %2601 = vmatpush3.bf16.msra.mxu1 %v2919_v19  ;;  %p3319_p8 = scmp.ne.s32.totalorder %s2325_s1, %s3318_s30  ;;  %p3324_p10 = scmp.lt.s32.totalorder %s3318_s30, %s3318_s30 }
  0xa8   :  { %380 = vmatpush1.bf16.msra.mxu0 %v2897_v17  ;;  %2602 = vmatprep.subr.bf16.mxu1 %v2923_v22 }
  0xa9   :  { %381 = vmatprep.subr.bf16.mxu0 %v2898_v18  ;;  %p3325_p11 = por %p3324_p10, %p3323_p9 }
  0xab   :  { %2603 = vmatpush3.bf16.msra.mxu1 %v2923_v22  ;;  %p3326_p12 = pnand %p3325_p11, %p3319_p8 }
  0xac   :  { %382 = vmatpush1.bf16.msra.mxu0 %v2900_v20  ;;  %2604 = vmatprep.subr.bf16.mxu1 %v2928_v25 }
  0xad   :  { %383 = vmatprep.subr.bf16.mxu0 %v2902_v21 }
  0xaf   :  { %2605 = vmatpush3.bf16.msra.mxu1 %v2928_v25 }
  0xb0   :  { %384 = vmatpush1.bf16.msra.mxu0 %v2904_v23  ;;  %2606 = vmatprep.subr.bf16.mxu1 %v2932_v28 }
  0xb1   :  { %710 = vmatprep.subr.bf16.mxu0 %v3565_v24 }
  0xb3   :  { %402 = vmatmul.mubr.bf16.vlgmr.msra.gmra.mrb[0].mxu0 %v2906_v12  ;;  %2607 = vmatpush3.bf16.msra.mxu1 %v2932_v28 }
  0xb4   :  { %711 = vmatpush1.bf16.msra.mxu0 %v3567_v26  ;;  %411 = vmatprep.mubr.bf16.mxu0 %v4182_v0 }
  0xb5   :  { %712 = vmatprep.subr.bf16.mxu0 %v3570_v27  ;;  %2616 = vmatprep.subr.bf16.mxu1 %v4184_v38 }
  0xb6   :  { %2609 = vmatmul.mubr.bf16.vlgmr.msra.gmra.mrb[0].mxu1 %v2915_v31 }
  0xb7   :  { %2617 = vmatpush3.bf16.msra.mxu1 %v3587_v36  ;;  %2612 = vmatprep.mubr.bf16.mxu1 %v2924_v35 }
  0xb8   :  { %713 = vmatpush1.bf16.msra.mxu0 %v3573_v29  ;;  %2618 = vmatprep.subr.bf16.mxu1 %v4184_v38 }
  0xb9   :  { %714 = vmatprep.subr.bf16.mxu0 %v3577_v30 }
  0xbb   :  { %412 = vmatmul.mubr.bf16.gmra.mrb[4].mxu0 %v2915_v31  ;;  %2619 = vmatpush3.bf16.msra.mxu1 %v3594_v39 }
  0xbc   :  { %715 = vmatpush1.bf16.msra.mxu0 %v3580_v32  ;;  %421 = vmatprep.mubr.bf16.mxu0 %v4182_v0 }
  0xbd   :  { %716 = vmatprep.subr.bf16.mxu0 %v3583_v33  ;;  %2620 = vmatprep.subr.bf16.mxu1 %v4184_v38 }
  0xbe   :  { %2613 = vmatmul.mubr.bf16.gmra.mrb[4].mxu1 %v2933_v43 }
  0xbf   :  { %2621 = vmatpush3.bf16.msra.mxu1 %v3604_v42  ;;  %2632 = vmatprep.mubr.msk.bf16.mxu1 %vm3366_vm0, %v4184_v38 }
  0xc0   :  { %717 = vmatpush1.bf16.msra.mxu0 %v3585_v34  ;;  %2622 = vmatprep.subr.bf16.mxu1 %v4184_v38 }
  0xc1   :  { %718 = vmatprep.subr.bf16.mxu0 %v3589_v37 }
  0xc3   :  { %422 = vmatmul.mubr.bf16.gmra.mrb[8].mxu0 %v2924_v35  ;;  %2623 = vmatpush3.bf16.msra.mxu1 %v3615_v46 }
  0xc4   :  { %719 = vmatpush1.bf16.msra.mxu0 %v3597_v40  ;;  %431 = vmatprep.mubr.bf16.mxu0 %v4182_v0 }
  0xc5   :  { %720 = vmatprep.subr.bf16.mxu0 %v3600_v41  ;;  %2624 = vmatprep.subr.bf16.mxu1 %v4184_v38 }
  0xc7   :  { %2625 = vmatpush3.bf16.msra.mxu1 %v3627_v49 }
  0xc8   :  { %721 = vmatpush1.bf16.msra.mxu0 %v3607_v44  ;;  %2626 = vmatprep.subr.bf16.mxu1 %v4184_v38 }
  0xc9   :  { %722 = vmatprep.subr.bf16.mxu0 %v3610_v45 }
  0xcb   :  { %432 = vmatmul.mubr.bf16.gmra.mrb[12].mxu0 %v2933_v43  ;;  %2627 = vmatpush3.bf16.msra.mxu1 %v3641_v52 }
  0xcc   :  { %723 = vmatpush1.bf16.msra.mxu0 %v3618_v47  ;;  %742 = vmatprep.mubr.bf16.mxu0 %v4182_v0 }
  0xcd   :  { %724 = vmatprep.subr.bf16.mxu0 %v3623_v48  ;;  %2628 = vmatprep.subr.bf16.mxu1 %v4184_v38 }
  0xcf   :  { %2629 = vmatpush3.bf16.msra.mxu1 %v3649_v54 }
  0xd0   :  { %725 = vmatpush1.bf16.msra.mxu0 %v3630_v50  ;;  %2630 = vmatprep.subr.bf16.mxu1 %v4184_v38 }
  0xd1   :  { %815 = vmatprep.subr.bf16.mxu0 %v3565_v24 }
  0xd3   :  { %743 = vmatmul.mubr.bf16.vlgmr.msra.gmra.mrb[16].mxu0 %v565_v53  ;;  %2631 = vmatpush3.bf16.msra.mxu1 %v3654_v55 }
  0xd4   :  { %816 = vmatpush1.bf16.msra.mxu0 %v3567_v26  ;;  %847 = vmatprep.mubr.bf16.mxu0 %v4182_v0 }
  0xd5   :  { %817 = vmatprep.subr.bf16.mxu0 %v3570_v27  ;;  %2636 = vmatprep.subr.bf16.mxu1 %v4184_v38 }
  0xd6   :  { %2633 = vmatmul.mubr.bf16.vlgmr.msra.gmra.mrb[8].mxu1 %v565_v53 }
  0xd7   :  { %2637 = vmatpush3.bf16.msra.mxu1 %v3587_v36  ;;  %2652 = vmatprep.mubr.msk.bf16.mxu1 %vm3366_vm0, %v4184_v38 }
  0xd8   :  { %818 = vmatpush1.bf16.msra.mxu0 %v3573_v29  ;;  %2638 = vmatprep.subr.bf16.mxu1 %v4184_v38 }
  0xd9   :  { %819 = vmatprep.subr.bf16.mxu0 %v3577_v30 }
  0xdb   :  { %2639 = vmatpush3.bf16.msra.mxu1 %v3594_v39 }
  0xdc   :  { %820 = vmatpush1.bf16.msra.mxu0 %v3580_v32  ;;  %2640 = vmatprep.subr.bf16.mxu1 %v4184_v38 }
  0xdd   :  { %821 = vmatprep.subr.bf16.mxu0 %v3583_v33 }
  0xdf   :  { %2641 = vmatpush3.bf16.msra.mxu1 %v3604_v42 }
  0xe0   :  { %822 = vmatpush1.bf16.msra.mxu0 %v3585_v34  ;;  %2642 = vmatprep.subr.bf16.mxu1 %v4184_v38 }
  0xe1   :  { %823 = vmatprep.subr.bf16.mxu0 %v3589_v37 }
  0xe3   :  { %2643 = vmatpush3.bf16.msra.mxu1 %v3615_v46 }
  0xe4   :  { %824 = vmatpush1.bf16.msra.mxu0 %v3597_v40  ;;  %2644 = vmatprep.subr.bf16.mxu1 %v4184_v38 }
  0xe5   :  { %825 = vmatprep.subr.bf16.mxu0 %v3600_v41 }
  0xe7   :  { %2645 = vmatpush3.bf16.msra.mxu1 %v3627_v49 }
  0xe8   :  { %826 = vmatpush1.bf16.msra.mxu0 %v3607_v44  ;;  %2646 = vmatprep.subr.bf16.mxu1 %v4184_v38 }
  0xe9   :  { %827 = vmatprep.subr.bf16.mxu0 %v3610_v45 }
  0xeb   :  { %2647 = vmatpush3.bf16.msra.mxu1 %v3641_v52 }
  0xec   :  { %828 = vmatpush1.bf16.msra.mxu0 %v3618_v47  ;;  %2648 = vmatprep.subr.bf16.mxu1 %v4184_v38 }
  0xed   :  { %829 = vmatprep.subr.bf16.mxu0 %v3623_v48 }
  0xef   :  { %2649 = vmatpush3.bf16.msra.mxu1 %v3649_v54 }
  0xf0   :  { %830 = vmatpush1.bf16.msra.mxu0 %v3630_v50  ;;  %2650 = vmatprep.subr.bf16.mxu1 %v4184_v38 }
  0xf1   :  { %921 = vmatprep.subr.bf16.mxu0 %v3565_v24 }
  0xf3   :  { %2651 = vmatpush3.bf16.msra.mxu1 %v3654_v55 }
  0xf4   :  { %2656 = vmatprep.subr.bf16.mxu1 %v4184_v38 }
 0x186   :  { %v403_v61 = vpop.f32.mrb[0].mxu0 }
 0x187   :  { %v405_v63 = vpop.f32.mrb[1].mxu0  ;;  %v404_v38 = vadd.f32 %v403_v61, %v205_v62 }
 0x188   :  { %v407_v2 = vpop.f32.mrb[2].mxu0 }
 0x189   :  { %v3701_v3 = vadd.f32 %v407_v2, %v205_v62  ;;  %v409_v4 = vpop.f32.mrb[3].mxu0  ;;  %v2610_v13 = vpop.f32.mrb[0].mxu1 }
 0x18a   :  { %v3705_v6 = vadd.f32 %v409_v4, %v209_v1  ;;  %v3717_v16 = vadd.f32 %v2610_v13, %v3708_v7  ;;  %v476_v17 = vpop.f32.mrb[1].mxu1 }
 0x18b   :  { %v2611_v19 = vpop.f32.mrb[2].mxu1 }
 0x18c   :  { %v3722_v20 = vadd.f32 %v2611_v19, %v3708_v7  ;;  %v479_v21 = vpop.f32.mrb[3].mxu1 }
 0x18d   :  { %v3725_v22 = vadd.f32 %v479_v21, %v3708_v7 }
 0x18e   :  { %v413_v8 = vpop.f32.mrb[4].mxu0 }
 0x18f   :  { %v3710_v9 = vadd.f32 %v413_v8, %v205_v62  ;;  %v415_v10 = vpop.f32.mrb[5].mxu0 }
 0x190   :  { %v3712_v11 = vadd.f32 %v415_v10, %v209_v1  ;;  %v417_v12 = vpop.f32.mrb[6].mxu0 }
 0x191   :  { %v3714_v14 = vadd.f32 %v417_v12, %v205_v62  ;;  %v419_v15 = vpop.f32.mrb[7].mxu0  ;;  %v2614_v43 = vpop.f32.mrb[4].mxu1 }
 0x192   :  { %v3719_v18 = vadd.f32 %v419_v15, %v209_v1  ;;  %v3734_v57 = vadd.f32 %v2614_v43, %v3708_v7  ;;  %v492_v59 = vpop.f32.mrb[5].mxu1 }
 0x193   :  { %v3739_v4 = vadd.f32 %v492_v59, %v3708_v7  ;;  %v2615_v8 = vpop.f32.mrb[6].mxu1 }
 0x194   :  { %4193 = vst [vmem:[#allocation28_spill] sm:$0xff] %v3734_v57  ;;  %v3742_v10 = vadd.f32 %v2615_v8, %v3708_v7  ;;  %v495_v12 = vpop.f32.mrb[7].mxu1 }
 0x195   :  { %4195 = vst [vmem:[#allocation30_spill] sm:$0xff] %v3739_v4  ;;  %v3745_v13 = vadd.f32 %v495_v12, %v3708_v7 }
 0x196   :  { %v423_v23 = vpop.f32.mrb[8].mxu0  ;;  %4196 = vst [vmem:[#allocation31_spill] sm:$0xff] %v3742_v10 }
 0x197   :  { %v3727_v25 = vadd.f32 %v423_v23, %v205_v62  ;;  %v425_v28 = vpop.f32.mrb[9].mxu0  ;;  %4197 = vst [vmem:[#allocation32_spill] sm:$0xff] %v3745_v13 }
 0x198   :  { %v3729_v31 = vadd.f32 %v425_v28, %v209_v1  ;;  %v427_v35 = vpop.f32.mrb[10].mxu0 }
 0x199   :  { %v3731_v53 = vadd.f32 %v427_v35, %v205_v62  ;;  %v429_v56 = vpop.f32.mrb[11].mxu0  ;;  %v563_v35 = vld [vmem:[#allocation12] sm:$0x7] }
 0x19a   :  { %v3736_v2 = vadd.f32 %v429_v56, %v209_v1  ;;  %v3756_v8 = vrot.slane %v563_v35, %v3695_v58  ;;  %v3759_v0 = vrot.slane %v563_v35, %v3697_v60  ;;  %v3764_v61 = vrot.slane %v563_v35, %v3703_v5 }
 0x19b   :  { %4192 = vst [vmem:[#allocation27_spill] sm:$0xff] %v3731_v53 }
 0x19c   :  { %4194 = vst [vmem:[#allocation29_spill] sm:$0xff] %v3736_v2 }
 0x19e   :  { %v433_v15 = vpop.f32.mrb[12].mxu0 }
 0x19f   :  { %v3747_v19 = vadd.f32 %v433_v15, %v205_v62  ;;  %v435_v21 = vpop.f32.mrb[13].mxu0 }
 0x1a0   :  { %v3749_v23 = vadd.f32 %v435_v21, %v209_v1  ;;  %v437_v28 = vpop.f32.mrb[14].mxu0  ;;  %v406_v21 = vadd.f32 %v405_v63, %v209_v1 }
 0x1a1   :  { %4198 = vst [vmem:[#allocation33_spill] sm:$0xff] %v3747_v19  ;;  %v3751_v43 = vadd.f32 %v437_v28, %v205_v62  ;;  %v439_v56 = vpop.f32.mrb[15].mxu0 }
 0x1a2   :  { %4199 = vst [vmem:[#allocation34_spill] sm:$0xff] %v3749_v23  ;;  %v3753_v59 = vadd.f32 %v439_v56, %v209_v1  ;;  %v477_v1 = vadd.f32 %v476_v17, %v3708_v7  ;;  %v4202_v7 = vmov 0.0   ;;  %v4203_v17 = vmov 0  }
 0x1a3   :  { %4200 = vst [vmem:[#allocation35_spill] sm:$0xff] %v3751_v43 }
 0x1a4   :  { %4201 = vst [vmem:[#allocation36_spill] sm:$0xff] %v3753_v59 }
 0x1a6   :  { %v744_v12 = vpop.f32.mrb[16].mxu0 }
 0x1a7   :  { %v745_v15 = vadd.f32 %v744_v12, %v3756_v8  ;;  %v746_v10 = vpop.f32.mrb[17].mxu0 }
 0x1a8   :  { %v747_v57 = vadd.f32 %v746_v10, %v3759_v0  ;;  %v748_v23 = vpop.f32.mrb[18].mxu0 }
 0x1a9   :  { %v794_v28 = vadd.f32 %v745_v15, %v404_v38  ;;  %v749_v43 = vpop.f32.mrb[19].mxu0  ;;  %v785_v59 = vpop.f32.mrb[8].mxu1 }
 0x1aa   :  { %v801_v19 = vadd.f32 %v747_v57, %v406_v21  ;;  %v2634_v58 = vpop.f32.mrb[9].mxu1  ;;  %v786_v62 = vadd.f32 %v785_v59, %v3764_v61 }
 0x1ab   :  { %v2389_v56 = vmul.f32 -1.442695, %v794_v28  ;;  %v788_v13 = vpop.f32.mrb[10].mxu1 }
 0x1ac   :  { %v2635_v2 = vpop.f32.mrb[11].mxu1  ;;  %v2390_v60 = vmul.f32 -1.442695, %v801_v19 }
 0x1ad   :  { %3028 = vpow2.f32 %v2389_v56 }
 0x1ae   :  { %3030 = vpow2.f32 %v2390_v60 }
 0x1b7   :  { %v3029_v53 = vpop.eup %3028 }
 0x1b8   :  { %v798_v4 = vadd.f32 1.0, %v3029_v53  ;;  %v3031_v63 = vpop.eup %3030 }
 0x1b9   :  { %v805_v10 = vadd.f32 1.0, %v3031_v63 }
 0x1ba   :  { %3032 = vrcp.f32 %v798_v4 }
 0x1c4   :  { %v3033_v38 = vpop.eup %3032 }
 0x1c5   :  { %v808_v57 = vmul.f32 %v3033_v38, %v786_v62 }
 0x1c7   :  { %v809_v23 = vadd.f32 %v808_v57, %v477_v1 }
 0x1c9   :  { %3034 = vtanh.f32 %v809_v23 }
 0x1ca   :  { %3036 = vrcp.f32 %v805_v10 }
 0x1d3   :  { %v3035_v58 = vpop.eup %3034 }
 0x1d4   :  { %v811_v2 = vsub.f32 %v3635_v51, %v3035_v58  ;;  %v3037_v53 = vpop.eup %3036 }
 0x1d6   :  { %v812_v60 = vmul.f32 %v3037_v53, %v811_v2 }
 0x1d8   :  { %v3769_v4 = vadd.f32 %v3035_v58, %v812_v60 }
 0x1da   :  { %v814_v13 = vpack.c.bf16 %v3769_v4, %v3769_v4 }
 0x1dc   :  { %848 = vmatmul.mubr.bf16.vlgmr.msra.gmra.mrb[20].mxu0 %v814_v13  ;;  %2653 = vmatmul.mubr.bf16.vlgmr.msra.gmra.mrb[12].mxu1 %v814_v13 }
 0x1dd   :  { %922 = vmatpush1.bf16.msra.mxu0 %v3567_v26  ;;  %2657 = vmatpush3.bf16.msra.mxu1 %v3587_v36 }
 0x1de   :  { %923 = vmatprep.subr.bf16.mxu0 %v3570_v27  ;;  %2658 = vmatprep.subr.bf16.mxu1 %v4202_v7 }
 0x1df   :  { %953 = vmatprep.mubr.bf16.mxu0 %v4203_v17  ;;  %2672 = vmatprep.mubr.msk.bf16.mxu1 %vm3366_vm0, %v4202_v7 }
 0x1e1   :  { %924 = vmatpush1.bf16.msra.mxu0 %v3573_v29  ;;  %2659 = vmatpush3.bf16.msra.mxu1 %v3594_v39 }
 0x1e2   :  { %925 = vmatprep.subr.bf16.mxu0 %v3577_v30  ;;  %2660 = vmatprep.subr.bf16.mxu1 %v4202_v7 }
 0x1e5   :  { %926 = vmatpush1.bf16.msra.mxu0 %v3580_v32  ;;  %2661 = vmatpush3.bf16.msra.mxu1 %v3604_v42 }
 0x1e6   :  { %927 = vmatprep.subr.bf16.mxu0 %v3583_v33  ;;  %2662 = vmatprep.subr.bf16.mxu1 %v4202_v7 }
 0x1e9   :  { %928 = vmatpush1.bf16.msra.mxu0 %v3585_v34  ;;  %2663 = vmatpush3.bf16.msra.mxu1 %v3615_v46 }
 0x1ea   :  { %929 = vmatprep.subr.bf16.mxu0 %v3589_v37  ;;  %2664 = vmatprep.subr.bf16.mxu1 %v4202_v7 }
 0x1ed   :  { %930 = vmatpush1.bf16.msra.mxu0 %v3597_v40  ;;  %2665 = vmatpush3.bf16.msra.mxu1 %v3627_v49 }
 0x1ee   :  { %931 = vmatprep.subr.bf16.mxu0 %v3600_v41  ;;  %2666 = vmatprep.subr.bf16.mxu1 %v4202_v7 }
 0x1f1   :  { %932 = vmatpush1.bf16.msra.mxu0 %v3607_v44  ;;  %2667 = vmatpush3.bf16.msra.mxu1 %v3641_v52 }
 0x1f2   :  { %933 = vmatprep.subr.bf16.mxu0 %v3610_v45  ;;  %2668 = vmatprep.subr.bf16.mxu1 %v4202_v7 }
 0x1f5   :  { %934 = vmatpush1.bf16.msra.mxu0 %v3618_v47  ;;  %2669 = vmatpush3.bf16.msra.mxu1 %v3649_v54 }
 0x1f6   :  { %935 = vmatprep.subr.bf16.mxu0 %v3623_v48  ;;  %2670 = vmatprep.subr.bf16.mxu1 %v4202_v7 }
 0x1f9   :  { %936 = vmatpush1.bf16.msra.mxu0 %v3630_v50  ;;  %2671 = vmatpush3.bf16.msra.mxu1 %v3654_v55 }
 0x1fa   :  { %1027 = vmatprep.subr.bf16.mxu0 %v3565_v24  ;;  %2676 = vmatprep.subr.bf16.mxu1 %v4202_v7 }
 0x2af   :  { %v849_v51 = vpop.f32.mrb[20].mxu0  ;;  %v890_v19 = vpop.f32.mrb[12].mxu1 }
 0x2b0   :  { %v850_v35 = vadd.f32 %v849_v51, %v3756_v8  ;;  %v851_v43 = vpop.f32.mrb[21].mxu0  ;;  %v2654_v59 = vpop.f32.mrb[13].mxu1  ;;  %v891_v58 = vadd.f32 %v890_v19, %v3764_v61 }
 0x2b1   :  { %v852_v12 = vadd.f32 %v851_v43, %v3759_v0  ;;  %v853_v15 = vpop.f32.mrb[22].mxu0  ;;  %v893_v21 = vpop.f32.mrb[14].mxu1 }
 0x2b2   :  { %v900_v28 = vadd.f32 %v850_v35, %v3701_v3  ;;  %v854_v56 = vpop.f32.mrb[23].mxu0  ;;  %v2655_v62 = vpop.f32.mrb[15].mxu1 }
 0x2b3   :  { %v907_v63 = vadd.f32 %v852_v12, %v3705_v6 }
 0x2b4   :  { %v2391_v38 = vmul.f32 -1.442695, %v900_v28 }
 0x2b5   :  { %v2392_v1 = vmul.f32 -1.442695, %v907_v63 }
 0x2b6   :  { %3038 = vpow2.f32 %v2391_v38 }
 0x2b7   :  { %3040 = vpow2.f32 %v2392_v1 }
 0x2c0   :  { %v3039_v57 = vpop.eup %3038 }
 0x2c1   :  { %v904_v10 = vadd.f32 1.0, %v3039_v57  ;;  %v3041_v23 = vpop.eup %3040 }
 0x2c2   :  { %v911_v13 = vadd.f32 1.0, %v3041_v23 }
 0x2c3   :  { %3042 = vrcp.f32 %v904_v10 }
 0x2cd   :  { %v3043_v2 = vpop.eup %3042 }
 0x2ce   :  { %v914_v53 = vmul.f32 %v3043_v2, %v891_v58 }
 0x2d0   :  { %v915_v60 = vadd.f32 %v914_v53, %v3725_v22 }
 0x2d2   :  { %3044 = vtanh.f32 %v915_v60 }
 0x2d3   :  { %3046 = vrcp.f32 %v911_v13 }
 0x2dc   :  { %v3045_v3 = vpop.eup %3044 }
 0x2dd   :  { %v917_v6 = vsub.f32 %v3769_v4, %v3045_v3  ;;  %v3047_v51 = vpop.eup %3046 }
 0x2df   :  { %v918_v35 = vmul.f32 %v3047_v51, %v917_v6 }
 0x2e1   :  { %v3815_v43 = vadd.f32 %v3045_v3, %v918_v35 }
 0x2e3   :  { %v920_v59 = vpack.c.bf16 %v3815_v43, %v3815_v43 }
 0x2e5   :  { %954 = vmatmul.mubr.bf16.vlgmr.msra.gmra.mrb[24].mxu0 %v920_v59  ;;  %2673 = vmatmul.mubr.bf16.vlgmr.msra.gmra.mrb[16].mxu1 %v920_v59 }
 0x2e6   :  { %1028 = vmatpush1.bf16.msra.mxu0 %v3567_v26  ;;  %2677 = vmatpush3.bf16.msra.mxu1 %v3587_v36 }
 0x2e7   :  { %1029 = vmatprep.subr.bf16.mxu0 %v3570_v27  ;;  %2678 = vmatprep.subr.bf16.mxu1 %v4202_v7 }
 0x2e8   :  { %1059 = vmatprep.mubr.bf16.mxu0 %v4203_v17  ;;  %2692 = vmatprep.mubr.msk.bf16.mxu1 %vm3366_vm0, %v4202_v7 }
 0x2ea   :  { %1030 = vmatpush1.bf16.msra.mxu0 %v3573_v29  ;;  %2679 = vmatpush3.bf16.msra.mxu1 %v3594_v39 }
 0x2eb   :  { %1031 = vmatprep.subr.bf16.mxu0 %v3577_v30  ;;  %2680 = vmatprep.subr.bf16.mxu1 %v4202_v7 }
 0x2ee   :  { %1032 = vmatpush1.bf16.msra.mxu0 %v3580_v32  ;;  %2681 = vmatpush3.bf16.msra.mxu1 %v3604_v42 }
 0x2ef   :  { %1033 = vmatprep.subr.bf16.mxu0 %v3583_v33  ;;  %2682 = vmatprep.subr.bf16.mxu1 %v4202_v7 }
 0x2f2   :  { %1034 = vmatpush1.bf16.msra.mxu0 %v3585_v34  ;;  %2683 = vmatpush3.bf16.msra.mxu1 %v3615_v46 }
 0x2f3   :  { %1035 = vmatprep.subr.bf16.mxu0 %v3589_v37  ;;  %2684 = vmatprep.subr.bf16.mxu1 %v4202_v7 }
 0x2f6   :  { %1036 = vmatpush1.bf16.msra.mxu0 %v3597_v40  ;;  %2685 = vmatpush3.bf16.msra.mxu1 %v3627_v49 }
 0x2f7   :  { %1037 = vmatprep.subr.bf16.mxu0 %v3600_v41  ;;  %2686 = vmatprep.subr.bf16.mxu1 %v4202_v7 }
 0x2fa   :  { %1038 = vmatpush1.bf16.msra.mxu0 %v3607_v44  ;;  %2687 = vmatpush3.bf16.msra.mxu1 %v3641_v52 }
 0x2fb   :  { %1039 = vmatprep.subr.bf16.mxu0 %v3610_v45  ;;  %2688 = vmatprep.subr.bf16.mxu1 %v4202_v7 }
 0x2fe   :  { %1040 = vmatpush1.bf16.msra.mxu0 %v3618_v47  ;;  %2689 = vmatpush3.bf16.msra.mxu1 %v3649_v54 }
 0x2ff   :  { %1041 = vmatprep.subr.bf16.mxu0 %v3623_v48  ;;  %2690 = vmatprep.subr.bf16.mxu1 %v4202_v7 }
 0x302   :  { %1042 = vmatpush1.bf16.msra.mxu0 %v3630_v50  ;;  %2691 = vmatpush3.bf16.msra.mxu1 %v3654_v55 }
 0x303   :  { %1133 = vmatprep.subr.bf16.mxu0 %v3565_v24  ;;  %2696 = vmatprep.subr.bf16.mxu1 %v4202_v7 }
 0x3b8   :  { %v955_v22 = vpop.f32.mrb[24].mxu0  ;;  %v996_v4 = vpop.f32.mrb[16].mxu1 }
 0x3b9   :  { %v956_v19 = vadd.f32 %v955_v22, %v3756_v8  ;;  %v957_v12 = vpop.f32.mrb[25].mxu0  ;;  %v2674_v15 = vpop.f32.mrb[17].mxu1  ;;  %v997_v53 = vadd.f32 %v996_v4, %v3764_v61 }
 0x3ba   :  { %v958_v21 = vadd.f32 %v957_v12, %v3759_v0  ;;  %v959_v28 = vpop.f32.mrb[26].mxu0  ;;  %v999_v56 = vpop.f32.mrb[18].mxu1 }
 0x3bb   :  { %v1006_v62 = vadd.f32 %v956_v19, %v3710_v9  ;;  %v960_v63 = vpop.f32.mrb[27].mxu0  ;;  %v2675_v38 = vpop.f32.mrb[19].mxu1 }
 0x3bc   :  { %v1013_v1 = vadd.f32 %v958_v21, %v3712_v11 }
 0x3bd   :  { %v2393_v57 = vmul.f32 -1.442695, %v1006_v62 }
 0x3be   :  { %v2394_v10 = vmul.f32 -1.442695, %v1013_v1 }
 0x3bf   :  { %3048 = vpow2.f32 %v2393_v57 }
 0x3c0   :  { %3050 = vpow2.f32 %v2394_v10 }
 0x3c9   :  { %v3049_v23 = vpop.eup %3048 }
 0x3ca   :  { %v1010_v58 = vadd.f32 1.0, %v3049_v23  ;;  %v3051_v2 = vpop.eup %3050 }
 0x3cb   :  { %v1017_v6 = vadd.f32 1.0, %v3051_v2 }
 0x3cc   :  { %3052 = vrcp.f32 %v1010_v58 }
 0x3d6   :  { %v3053_v60 = vpop.eup %3052 }
 0x3d7   :  { %v1020_v13 = vmul.f32 %v3053_v60, %v997_v53  ;;  %v3911_v53 = vld [vmem:[#allocation10] ss:$12 sps:$4 sm:$0xff]   ;;  %v3922_v60 = vld [vmem:[#allocation10 + $0x18] ss:$12 sps:$4 sm:$0xff]  }
 0x3d9   :  { %v1021_v3 = vadd.f32 %v1020_v13, %v3717_v16  ;;  %v3926_v13 = vld [vmem:[#allocation10 + $0x34] ss:$12 sps:$4 sm:$0xff]  }
 0x3db   :  { %3054 = vtanh.f32 %v1021_v3  ;;  %v3934_v3 = vld [vmem:[#allocation10 + $0x4c] ss:$12 sps:$4 sm:$0xff]  }
 0x3dc   :  { %3056 = vrcp.f32 %v1017_v6  ;;  %v3938_v6 = vld [vmem:[#allocation10 + $0x48] ss:$12 sps:$4 sm:$0xff]  }
 0x3e5   :  { %v3055_v9 = vpop.eup %3054 }
 0x3e6   :  { %v1023_v11 = vsub.f32 %v3815_v43, %v3055_v9  ;;  %v3057_v51 = vpop.eup %3056 }
 0x3e8   :  { %v1024_v35 = vmul.f32 %v3057_v51, %v1023_v11 }
 0x3ea   :  { %v3861_v59 = vadd.f32 %v3055_v9, %v1024_v35 }
 0x3ec   :  { %v1026_v22 = vpack.c.bf16 %v3861_v59, %v3861_v59 }
 0x3ee   :  { %1060 = vmatmul.mubr.bf16.vlgmr.msra.gmra.mrb[28].mxu0 %v1026_v22  ;;  %2693 = vmatmul.mubr.bf16.vlgmr.msra.gmra.mrb[20].mxu1 %v1026_v22 }
 0x3ef   :  { %1134 = vmatpush1.bf16.msra.mxu0 %v3567_v26  ;;  %2697 = vmatpush3.bf16.msra.mxu1 %v3587_v36 }
 0x3f0   :  { %1135 = vmatprep.subr.bf16.mxu0 %v3570_v27  ;;  %2698 = vmatprep.subr.bf16.mxu1 %v4202_v7 }
 0x3f1   :  { %1165 = vmatprep.mubr.bf16.mxu0 %v4203_v17  ;;  %2712 = vmatprep.mubr.msk.bf16.mxu1 %vm3366_vm0, %v4202_v7 }
 0x3f3   :  { %1136 = vmatpush1.bf16.msra.mxu0 %v3573_v29  ;;  %2699 = vmatpush3.bf16.msra.mxu1 %v3594_v39 }
 0x3f4   :  { %1137 = vmatprep.subr.bf16.mxu0 %v3577_v30  ;;  %2700 = vmatprep.subr.bf16.mxu1 %v4202_v7 }
 0x3f7   :  { %1138 = vmatpush1.bf16.msra.mxu0 %v3580_v32  ;;  %2701 = vmatpush3.bf16.msra.mxu1 %v3604_v42 }
 0x3f8   :  { %1139 = vmatprep.subr.bf16.mxu0 %v3583_v33  ;;  %2702 = vmatprep.subr.bf16.mxu1 %v4202_v7 }
 0x3fb   :  { %1140 = vmatpush1.bf16.msra.mxu0 %v3585_v34  ;;  %2703 = vmatpush3.bf16.msra.mxu1 %v3615_v46 }
 0x3fc   :  { %1141 = vmatprep.subr.bf16.mxu0 %v3589_v37  ;;  %2704 = vmatprep.subr.bf16.mxu1 %v4202_v7 }
 0x3ff   :  { %1142 = vmatpush1.bf16.msra.mxu0 %v3597_v40  ;;  %2705 = vmatpush3.bf16.msra.mxu1 %v3627_v49 }
 0x400   :  { %1143 = vmatprep.subr.bf16.mxu0 %v3600_v41  ;;  %2706 = vmatprep.subr.bf16.mxu1 %v4202_v7 }
 0x403   :  { %1144 = vmatpush1.bf16.msra.mxu0 %v3607_v44  ;;  %2707 = vmatpush3.bf16.msra.mxu1 %v3641_v52 }
 0x404   :  { %1145 = vmatprep.subr.bf16.mxu0 %v3610_v45  ;;  %2708 = vmatprep.subr.bf16.mxu1 %v4202_v7 }
 0x407   :  { %1146 = vmatpush1.bf16.msra.mxu0 %v3618_v47  ;;  %2709 = vmatpush3.bf16.msra.mxu1 %v3649_v54 }
 0x408   :  { %1147 = vmatprep.subr.bf16.mxu0 %v3623_v48  ;;  %2710 = vmatprep.subr.bf16.mxu1 %v4202_v7 }
 0x40b   :  { %1148 = vmatpush1.bf16.msra.mxu0 %v3630_v50  ;;  %2711 = vmatpush3.bf16.msra.mxu1 %v3654_v55 }
 0x40c   :  { %1239 = vmatprep.subr.bf16.mxu0 %v3565_v24  ;;  %2716 = vmatprep.subr.bf16.mxu1 %v4202_v7 }
 0x4c1   :  { %v1061_v26 = vpop.f32.mrb[28].mxu0  ;;  %v1102_v27 = vpop.f32.mrb[20].mxu1 }
 0x4c2   :  { %v1062_v29 = vadd.f32 %v1061_v26, %v3756_v8  ;;  %v1063_v30 = vpop.f32.mrb[29].mxu0  ;;  %v2694_v32 = vpop.f32.mrb[21].mxu1  ;;  %v1103_v62 = vadd.f32 %v1102_v27, %v3764_v61 }
 0x4c3   :  { %v1064_v33 = vadd.f32 %v1063_v30, %v3759_v0  ;;  %v1065_v34 = vpop.f32.mrb[30].mxu0  ;;  %v1105_v16 = vpop.f32.mrb[22].mxu1 }
 0x4c4   :  { %v1112_v43 = vadd.f32 %v1062_v29, %v3714_v14  ;;  %v1066_v4 = vpop.f32.mrb[31].mxu0  ;;  %v2695_v19 = vpop.f32.mrb[23].mxu1 }
 0x4c5   :  { %v1119_v12 = vadd.f32 %v1064_v33, %v3719_v18  ;;  %v4204_v33 = vld [vmem:[#allocation30_spill] sm:$0xff] }
 0x4c6   :  { %v2395_v15 = vmul.f32 -1.442695, %v1112_v43 }
 0x4c7   :  { %v2396_v24 = vmul.f32 -1.442695, %v1119_v12 }
 0x4c8   :  { %3058 = vpow2.f32 %v2395_v15  ;;  %v3974_v15 = vld [vmem:[#allocation10 + $0x8] ss:$12 sps:$4 sm:$0xff]  }
 0x4c9   :  { %3060 = vpow2.f32 %v2396_v24  ;;  %v3983_v24 = vld [vmem:[#allocation10 + $0x20] ss:$12 sps:$4 sm:$0xff]  }
 0x4d2   :  { %v3059_v21 = vpop.eup %3058 }
 0x4d3   :  { %v1116_v28 = vadd.f32 1.0, %v3059_v21  ;;  %v3061_v56 = vpop.eup %3060  ;;  %v3989_v21 = vld [vmem:[#allocation10 + $0x38] ss:$12 sps:$4 sm:$0xff]  }
 0x4d4   :  { %v1123_v57 = vadd.f32 1.0, %v3061_v56  ;;  %v3998_v56 = vld [vmem:[#allocation10 + $0x64] ss:$12 sps:$4 sm:$0xff]  }
 0x4d5   :  { %3062 = vrcp.f32 %v1116_v28  ;;  %v3995_v28 = vld [vmem:[#allocation10 + $0x50] ss:$12 sps:$4 sm:$0xff]  }
 0x4df   :  { %v3063_v63 = vpop.eup %3062 }
 0x4e0   :  { %v1126_v38 = vmul.f32 %v3063_v63, %v1103_v62  ;;  %v4002_v62 = vld [vmem:[#allocation10 + $0x60] ss:$12 sps:$4 sm:$0xff]   ;;  %v4006_v63 = vld [vmem:[#allocation10 + $0x7c] ss:$12 sps:$4 sm:$0xff]  }
 0x4e2   :  { %v1127_v1 = vadd.f32 %v1126_v38, %v3722_v20  ;;  %v3915_v20 = vld [vmem:[#allocation10 + $0x1c] ss:$12 sps:$4 sm:$0xff]   ;;  %v4010_v38 = vld [vmem:[#allocation10 + $0x78] ss:$12 sps:$4 sm:$0xff]  }
 0x4e4   :  { %3064 = vtanh.f32 %v1127_v1  ;;  %v4014_v1 = vld [vmem:[#allocation10 + $0x94] ss:$12 sps:$4 sm:$0xff]  }
 0x4e5   :  { %3066 = vrcp.f32 %v1123_v57  ;;  %v4018_v57 = vld [vmem:[#allocation10 + $0x90] ss:$12 sps:$4 sm:$0xff]  }
 0x4ee   :  { %v3065_v14 = vpop.eup %3064 }
 0x4ef   :  { %v1129_v18 = vsub.f32 %v3861_v59, %v3065_v14  ;;  %v3067_v10 = vpop.eup %3066 }
 0x4f1   :  { %v1130_v23 = vmul.f32 %v3067_v10, %v1129_v18 }
 0x4f3   :  { %v3907_v58 = vadd.f32 %v3065_v14, %v1130_v23 }
 0x4f5   :  { %v1132_v2 = vpack.c.bf16 %v3907_v58, %v3907_v58 }
 0x4f7   :  { %1166 = vmatmul.mubr.bf16.vlgmr.msra.gmra.mrb[32].mxu0 %v1132_v2  ;;  %2713 = vmatmul.mubr.bf16.vlgmr.msra.gmra.mrb[24].mxu1 %v1132_v2 }
 0x4f8   :  { %1240 = vmatpush1.bf16.msra.mxu0 %v3911_v53  ;;  %2717 = vmatpush3.bf16.msra.mxu1 %v3587_v36  ;;  %v3930_v36 = vld [vmem:[#allocation10 + $0x30] ss:$12 sps:$4 sm:$0xff]  }
 0x4f9   :  { %1241 = vmatprep.subr.bf16.mxu0 %v3915_v20  ;;  %2718 = vmatprep.subr.bf16.mxu1 %v4202_v7 }
 0x4fa   :  { %1271 = vmatprep.mubr.bf16.mxu0 %v4203_v17  ;;  %2732 = vmatprep.mubr.msk.bf16.mxu1 %vm3366_vm0, %v4202_v7 }
 0x4fc   :  { %1242 = vmatpush1.bf16.msra.mxu0 %v3922_v60  ;;  %2719 = vmatpush3.bf16.msra.mxu1 %v3594_v39 }
 0x4fd   :  { %1243 = vmatprep.subr.bf16.mxu0 %v3926_v13  ;;  %2720 = vmatprep.subr.bf16.mxu1 %v4202_v7 }
 0x500   :  { %1244 = vmatpush1.bf16.msra.mxu0 %v3930_v36  ;;  %2721 = vmatpush3.bf16.msra.mxu1 %v3604_v42 }
 0x501   :  { %1245 = vmatprep.subr.bf16.mxu0 %v3934_v3  ;;  %2722 = vmatprep.subr.bf16.mxu1 %v4202_v7 }
 0x504   :  { %1246 = vmatpush1.bf16.msra.mxu0 %v3938_v6  ;;  %2723 = vmatpush3.bf16.msra.mxu1 %v3615_v46 }
 0x505   :  { %1247 = vmatprep.subr.bf16.mxu0 %v3589_v37  ;;  %2724 = vmatprep.subr.bf16.mxu1 %v4202_v7  ;;  %v3958_v37 = vld [vmem:[#allocation10 + $0x4] ss:$12 sps:$4 sm:$0xff]  }
 0x508   :  { %1248 = vmatpush1.bf16.msra.mxu0 %v3597_v40  ;;  %2725 = vmatpush3.bf16.msra.mxu1 %v3627_v49 }
 0x509   :  { %1249 = vmatprep.subr.bf16.mxu0 %v3600_v41  ;;  %2726 = vmatprep.subr.bf16.mxu1 %v4202_v7 }
 0x50c   :  { %1250 = vmatpush1.bf16.msra.mxu0 %v3607_v44  ;;  %2727 = vmatpush3.bf16.msra.mxu1 %v3641_v52 }
 0x50d   :  { %1251 = vmatprep.subr.bf16.mxu0 %v3610_v45  ;;  %2728 = vmatprep.subr.bf16.mxu1 %v4202_v7 }
 0x510   :  { %1252 = vmatpush1.bf16.msra.mxu0 %v3618_v47  ;;  %2729 = vmatpush3.bf16.msra.mxu1 %v3649_v54 }
 0x511   :  { %1253 = vmatprep.subr.bf16.mxu0 %v3623_v48  ;;  %2730 = vmatprep.subr.bf16.mxu1 %v4202_v7 }
 0x514   :  { %1254 = vmatpush1.bf16.msra.mxu0 %v3630_v50  ;;  %2731 = vmatpush3.bf16.msra.mxu1 %v3654_v55 }
 0x515   :  { %1345 = vmatprep.subr.bf16.mxu0 %v3958_v37  ;;  %2736 = vmatprep.subr.bf16.mxu1 %v4202_v7 }
 0x5ca   :  { %v1167_v39 = vpop.f32.mrb[32].mxu0  ;;  %v1208_v40 = vpop.f32.mrb[24].mxu1 }
 0x5cb   :  { %v1168_v41 = vadd.f32 %v1167_v39, %v3756_v8  ;;  %v1169_v42 = vpop.f32.mrb[33].mxu0  ;;  %v2714_v44 = vpop.f32.mrb[25].mxu1  ;;  %v1209_v29 = vadd.f32 %v1208_v40, %v3764_v61  ;;  %v4205_v39 = vld [vmem:[#allocation27_spill] sm:$0xff] }
 0x5cc   :  { %v1170_v45 = vadd.f32 %v1169_v42, %v3759_v0  ;;  %v1171_v46 = vpop.f32.mrb[34].mxu0  ;;  %v1211_v47 = vpop.f32.mrb[26].mxu1  ;;  %v4206_v42 = vld [vmem:[#allocation29_spill] sm:$0xff] }
 0x5cd   :  { %v1218_v48 = vadd.f32 %v1168_v41, %v3727_v25  ;;  %v1172_v9 = vpop.f32.mrb[35].mxu0  ;;  %v2715_v11 = vpop.f32.mrb[27].mxu1 }
 0x5ce   :  { %v1225_v51 = vadd.f32 %v1170_v45, %v3729_v31 }
 0x5cf   :  { %v2397_v35 = vmul.f32 -1.442695, %v1218_v48 }
 0x5d0   :  { %v2398_v59 = vmul.f32 -1.442695, %v1225_v51  ;;  %v4207_v51 = vld [vmem:[#allocation32_spill] sm:$0xff] }
 0x5d1   :  { %3068 = vpow2.f32 %v2397_v35 }
 0x5d2   :  { %3070 = vpow2.f32 %v2398_v59 }
 0x5db   :  { %v3069_v22 = vpop.eup %3068 }
 0x5dc   :  { %v1222_v26 = vadd.f32 1.0, %v3069_v22  ;;  %v3071_v27 = vpop.eup %3070 }
 0x5dd   :  { %v1229_v16 = vadd.f32 1.0, %v3071_v27 }
 0x5de   :  { %3072 = vrcp.f32 %v1222_v26 }
 0x5e8   :  { %v3073_v30 = vpop.eup %3072 }
 0x5e9   :  { %v1232_v32 = vmul.f32 %v3073_v30, %v1209_v29 }
 0x5eb   :  { %v1233_v34 = vadd.f32 %v1232_v32, %v4204_v33 }
 0x5ed   :  { %3074 = vtanh.f32 %v1233_v34 }
 0x5ee   :  { %3076 = vrcp.f32 %v1229_v16 }
 0x5f7   :  { %v3075_v25 = vpop.eup %3074 }
 0x5f8   :  { %v1235_v31 = vsub.f32 %v3907_v58, %v3075_v25  ;;  %v3077_v43 = vpop.eup %3076 }
 0x5fa   :  { %v1236_v4 = vmul.f32 %v3077_v43, %v1235_v31 }
 0x5fc   :  { %v3969_v19 = vadd.f32 %v3075_v25, %v1236_v4 }
 0x5fe   :  { %v1238_v12 = vpack.c.bf16 %v3969_v19, %v3969_v19 }
 0x600   :  { %1272 = vmatmul.mubr.bf16.vlgmr.msra.gmra.mrb[36].mxu0 %v1238_v12  ;;  %2733 = vmatmul.mubr.bf16.vlgmr.msra.gmra.mrb[28].mxu1 %v1238_v12 }
 0x601   :  { %1346 = vmatpush1.bf16.msra.mxu0 %v3911_v53  ;;  %2737 = vmatpush3.bf16.msra.mxu1 %v3974_v15 }
 0x602   :  { %1347 = vmatprep.subr.bf16.mxu0 %v3915_v20  ;;  %2738 = vmatprep.subr.bf16.mxu1 %v4202_v7 }
 0x603   :  { %1377 = vmatprep.mubr.bf16.mxu0 %v4203_v17  ;;  %2752 = vmatprep.mubr.msk.bf16.mxu1 %vm3366_vm0, %v4202_v7 }
 0x605   :  { %1348 = vmatpush1.bf16.msra.mxu0 %v3922_v60  ;;  %2739 = vmatpush3.bf16.msra.mxu1 %v3983_v24 }
 0x606   :  { %1349 = vmatprep.subr.bf16.mxu0 %v3926_v13  ;;  %2740 = vmatprep.subr.bf16.mxu1 %v4202_v7 }
 0x609   :  { %1350 = vmatpush1.bf16.msra.mxu0 %v3930_v36  ;;  %2741 = vmatpush3.bf16.msra.mxu1 %v3989_v21 }
 0x60a   :  { %1351 = vmatprep.subr.bf16.mxu0 %v3934_v3  ;;  %2742 = vmatprep.subr.bf16.mxu1 %v4202_v7 }
 0x60d   :  { %1352 = vmatpush1.bf16.msra.mxu0 %v3938_v6  ;;  %2743 = vmatpush3.bf16.msra.mxu1 %v3995_v28 }
 0x60e   :  { %1353 = vmatprep.subr.bf16.mxu0 %v3998_v56  ;;  %2744 = vmatprep.subr.bf16.mxu1 %v4202_v7 }
 0x611   :  { %1354 = vmatpush1.bf16.msra.mxu0 %v4002_v62  ;;  %2745 = vmatpush3.bf16.msra.mxu1 %v3627_v49  ;;  %v4022_v49 = vld [vmem:[#allocation10 + $0xac] ss:$12 sps:$4 sm:$0xff]  }
 0x612   :  { %1355 = vmatprep.subr.bf16.mxu0 %v4006_v63  ;;  %2746 = vmatprep.subr.bf16.mxu1 %v4202_v7 }
 0x615   :  { %1356 = vmatpush1.bf16.msra.mxu0 %v4010_v38  ;;  %2747 = vmatpush3.bf16.msra.mxu1 %v3641_v52 }
 0x616   :  { %1357 = vmatprep.subr.bf16.mxu0 %v4014_v1  ;;  %2748 = vmatprep.subr.bf16.mxu1 %v4202_v7 }
 0x619   :  { %1358 = vmatpush1.bf16.msra.mxu0 %v4018_v57  ;;  %2749 = vmatpush3.bf16.msra.mxu1 %v3649_v54 }
 0x61a   :  { %1359 = vmatprep.subr.bf16.mxu0 %v4022_v49  ;;  %2750 = vmatprep.subr.bf16.mxu1 %v4202_v7 }
 0x61d   :  { %1360 = vmatpush1.bf16.msra.mxu0 %v3630_v50  ;;  %2751 = vmatpush3.bf16.msra.mxu1 %v3654_v55 }
 0x61e   :  { %1451 = vmatprep.subr.bf16.mxu0 %v3958_v37  ;;  %2756 = vmatprep.subr.bf16.mxu1 %v4202_v7 }
 0x6d3   :  { %v1273_v52 = vpop.f32.mrb[36].mxu0  ;;  %v1314_v14 = vpop.f32.mrb[28].mxu1 }
 0x6d4   :  { %v1274_v18 = vadd.f32 %v1273_v52, %v3756_v8  ;;  %v1275_v10 = vpop.f32.mrb[37].mxu0  ;;  %v2734_v54 = vpop.f32.mrb[29].mxu1  ;;  %v1315_v48 = vadd.f32 %v1314_v14, %v3764_v61  ;;  %v4210_v14 = vld [vmem:[#allocation28_spill] sm:$0xff] }
 0x6d5   :  { %v1276_v23 = vadd.f32 %v1275_v10, %v3759_v0  ;;  %v1277_v58 = vpop.f32.mrb[38].mxu0  ;;  %v1317_v2 = vpop.f32.mrb[30].mxu1 }
 0x6d6   :  { %v1324_v40 = vadd.f32 %v1274_v18, %v4205_v39  ;;  %v1278_v41 = vpop.f32.mrb[39].mxu0  ;;  %v2735_v50 = vpop.f32.mrb[31].mxu1 }
 0x6d7   :  { %v1331_v55 = vadd.f32 %v1276_v23, %v4206_v42  ;;  %v2969_v41 = vld [vmem:[#allocation13 + $0x8] ss:$12 sps:$4 sm:$0xff]  }
 0x6d8   :  { %v2399_v44 = vmul.f32 -1.442695, %v1324_v40  ;;  %v2948_v40 = vld [vmem:[#allocation13] ss:$12 sps:$4 sm:$0xff]   ;;  %v2953_v42 = vld [vmem:[#allocation13 + $0x1c] ss:$12 sps:$4 sm:$0xff]  }
 0x6d9   :  { %v2400_v37 = vmul.f32 -1.442695, %v1331_v55  ;;  %v2951_v55 = vld [vmem:[#allocation13 + $0x18] ss:$12 sps:$4 sm:$0xff]  }
 0x6da   :  { %3078 = vpow2.f32 %v2399_v44  ;;  %v2973_v44 = vld [vmem:[#allocation13 + $0x20] ss:$12 sps:$4 sm:$0xff]  }
 0x6db   :  { %3080 = vpow2.f32 %v2400_v37  ;;  %v2956_v37 = vld [vmem:[#allocation13 + $0x34] ss:$12 sps:$4 sm:$0xff]  }
 0x6e4   :  { %v3079_v45 = vpop.eup %3078 }
 0x6e5   :  { %v1328_v46 = vadd.f32 1.0, %v3079_v45  ;;  %v3081_v47 = vpop.eup %3080  ;;  %v2954_v45 = vld [vmem:[#allocation13 + $0x30] ss:$12 sps:$4 sm:$0xff]  }
 0x6e6   :  { %v1335_v59 = vadd.f32 1.0, %v3081_v47  ;;  %v2959_v47 = vld [vmem:[#allocation13 + $0x4c] ss:$12 sps:$4 sm:$0xff]  }
 0x6e7   :  { %3082 = vrcp.f32 %v1328_v46  ;;  %v2977_v46 = vld [vmem:[#allocation13 + $0x38] ss:$12 sps:$4 sm:$0xff]  }
 0x6f1   :  { %v3083_v9 = vpop.eup %3082 }
 0x6f2   :  { %v1338_v11 = vmul.f32 %v3083_v9, %v1315_v48  ;;  %v2957_v48 = vld [vmem:[#allocation13 + $0x48] ss:$12 sps:$4 sm:$0xff]   ;;  %v2981_v9 = vld [vmem:[#allocation13 + $0x50] ss:$12 sps:$4 sm:$0xff]  }
 0x6f4   :  { %v1339_v35 = vadd.f32 %v1338_v11, %v4207_v51  ;;  %v2962_v11 = vld [vmem:[#allocation13 + $0x64] ss:$12 sps:$4 sm:$0xff]   ;;  %v2960_v51 = vld [vmem:[#allocation13 + $0x60] ss:$12 sps:$4 sm:$0xff]  }
 0x6f6   :  { %3084 = vtanh.f32 %v1339_v35  ;;  %v2985_v35 = vld [vmem:[#allocation13 + $0x68] ss:$12 sps:$4 sm:$0xff]  }
 0x6f7   :  { %3086 = vrcp.f32 %v1335_v59  ;;  %v2965_v59 = vld [vmem:[#allocation13 + $0x7c] ss:$12 sps:$4 sm:$0xff]  }
 0x700   :  { %v3085_v22 = vpop.eup %3084 }
 0x701   :  { %v1341_v26 = vsub.f32 %v3969_v19, %v3085_v22  ;;  %v3087_v27 = vpop.eup %3086  ;;  %v4208_v19 = vld [vmem:[#allocation33_spill] sm:$0xff] }
 0x703   :  { %v1342_v29 = vmul.f32 %v3087_v27, %v1341_v26  ;;  %v2989_v26 = vld [vmem:[#allocation13 + $0x80] ss:$12 sps:$4 sm:$0xff]  }
 0x704   :  { %v2968_v27 = vld [vmem:[#allocation13 + $0x94] ss:$12 sps:$4 sm:$0xff]  }
 0x705   :  { %v4037_v30 = vadd.f32 %v3085_v22, %v1342_v29  ;;  %v2963_v22 = vld [vmem:[#allocation13 + $0x78] ss:$12 sps:$4 sm:$0xff]   ;;  %v2966_v29 = vld [vmem:[#allocation13 + $0x90] ss:$12 sps:$4 sm:$0xff]  }
 0x707   :  { %v1344_v32 = vpack.c.bf16 %v4037_v30, %v4037_v30 }
 0x709   :  { %1378 = vmatmul.mubr.bf16.vlgmr.msra.gmra.mrb[40].mxu0 %v1344_v32  ;;  %2753 = vmatmul.mubr.bf16.vlgmr.msra.gmra.mrb[32].mxu1 %v1344_v32  ;;  %v2972_v32 = vld [vmem:[#allocation13 + $0xac] ss:$12 sps:$4 sm:$0xff]  }
 0x70a   :  { %1452 = vmatpush1.bf16.msra.mxu0 %v3911_v53  ;;  %2757 = vmatpush3.bf16.msra.mxu1 %v3974_v15  ;;  %v3137_v53 = vld [vmem:[#allocation10 + $0x68] ss:$12 sps:$4 sm:$0xff]  }
 0x70b   :  { %1453 = vmatprep.subr.bf16.mxu0 %v3915_v20  ;;  %2758 = vmatprep.subr.bf16.mxu1 %v4202_v7  ;;  %v3138_v20 = vld [vmem:[#allocation10 + $0x80] ss:$12 sps:$4 sm:$0xff]  }
 0x70c   :  { %1483 = vmatprep.mubr.bf16.mxu0 %v4203_v17  ;;  %2772 = vmatprep.mubr.msk.bf16.mxu1 %vm3366_vm0, %v4202_v7 }
 0x70e   :  { %1454 = vmatpush1.bf16.msra.mxu0 %v3922_v60  ;;  %2759 = vmatpush3.bf16.msra.mxu1 %v3983_v24  ;;  %v3139_v60 = vld [vmem:[#allocation10 + $0x98] ss:$12 sps:$4 sm:$0xff]  }
 0x70f   :  { %1455 = vmatprep.subr.bf16.mxu0 %v3926_v13  ;;  %2760 = vmatprep.subr.bf16.mxu1 %v4202_v7  ;;  %v3140_v13 = vld [vmem:[#allocation10 + $0xa8] ss:$12 sps:$4 sm:$0xff]  }
 0x712   :  { %1456 = vmatpush1.bf16.msra.mxu0 %v3930_v36  ;;  %2761 = vmatpush3.bf16.msra.mxu1 %v3989_v21  ;;  %v3141_v36 = vld [vmem:[#allocation10 + $0xb0] ss:$12 sps:$4 sm:$0xff]   ;;  %v4209_v21 = vld [vmem:[#allocation34_spill] sm:$0xff] }
 0x713   :  { %1457 = vmatprep.subr.bf16.mxu0 %v3934_v3  ;;  %2762 = vmatprep.subr.bf16.mxu1 %v4202_v7  ;;  %v2950_v3 = vld [vmem:[#allocation13 + $0x4] ss:$12 sps:$4 sm:$0xff]  }
 0x716   :  { %1458 = vmatpush1.bf16.msra.mxu0 %v3938_v6  ;;  %2763 = vmatpush3.bf16.msra.mxu1 %v3995_v28 }
 0x717   :  { %1459 = vmatprep.subr.bf16.mxu0 %v3998_v56  ;;  %2764 = vmatprep.subr.bf16.mxu1 %v4202_v7 }
 0x71a   :  { %1460 = vmatpush1.bf16.msra.mxu0 %v4002_v62  ;;  %2765 = vmatpush3.bf16.msra.mxu1 %v3137_v53  ;;  %v2970_v53 = vld [vmem:[#allocation13 + $0xa8] ss:$12 sps:$4 sm:$0xff]  }
 0x71b   :  { %1461 = vmatprep.subr.bf16.mxu0 %v4006_v63  ;;  %2766 = vmatprep.subr.bf16.mxu1 %v4202_v7 }
 0x71e   :  { %1462 = vmatpush1.bf16.msra.mxu0 %v4010_v38  ;;  %2767 = vmatpush3.bf16.msra.mxu1 %v3138_v20  ;;  %v2997_v20 = vld [vmem:[#allocation13 + $0xb0] ss:$12 sps:$4 sm:$0xff]  }
 0x71f   :  { %1463 = vmatprep.subr.bf16.mxu0 %v4014_v1  ;;  %2768 = vmatprep.subr.bf16.mxu1 %v4202_v7 }
 0x722   :  { %1464 = vmatpush1.bf16.msra.mxu0 %v4018_v57  ;;  %2769 = vmatpush3.bf16.msra.mxu1 %v3139_v60  ;;  %v2976_v60 = vld [vmem:[#allocation15 + $0x4] ss:$12 sps:$4 sm:$0xff]  }
 0x723   :  { %1465 = vmatprep.subr.bf16.mxu0 %v4022_v49  ;;  %2770 = vmatprep.subr.bf16.mxu1 %v4202_v7 }
 0x726   :  { %1466 = vmatpush1.bf16.msra.mxu0 %v3140_v13  ;;  %2771 = vmatpush3.bf16.msra.mxu1 %v3141_v36  ;;  %v2974_v13 = vld [vmem:[#allocation15] ss:$12 sps:$4 sm:$0xff]   ;;  %v1593_v36 = vld [vmem:[%s4173_s6] sm:$0xf] }
 0x727   :  { %2776 = vmatprep.subr.bf16.mxu1 %v4202_v7  ;;  %1771 = vmatprep.subr.bf16.mxu0 %v2950_v3  ;;  %v3001_v3 = vld [vmem:[#allocation15 + $0x8] ss:$12 sps:$4 sm:$0xff]  }
 0x7dc   :  { %v1379_v6 = vpop.f32.mrb[40].mxu0  ;;  %v1420_v33 = vpop.f32.mrb[32].mxu1 }
 0x7dd   :  { %v1380_v34 = vadd.f32 %v1379_v6, %v3756_v8  ;;  %v1381_v16 = vpop.f32.mrb[41].mxu0  ;;  %v2754_v25 = vpop.f32.mrb[33].mxu1  ;;  %v1421_v57 = vadd.f32 %v1420_v33, %v3764_v61  ;;  %v2980_v6 = vld [vmem:[#allocation15 + $0x1c] ss:$12 sps:$4 sm:$0xff]   ;;  %v2978_v33 = vld [vmem:[#allocation15 + $0x18] ss:$12 sps:$4 sm:$0xff]  }
 0x7de   :  { %v1382_v31 = vadd.f32 %v1381_v16, %v3759_v0  ;;  %v1383_v43 = vpop.f32.mrb[42].mxu0  ;;  %v1423_v4 = vpop.f32.mrb[34].mxu1  ;;  %v2984_v16 = vld [vmem:[#allocation15 + $0x34] ss:$12 sps:$4 sm:$0xff]   ;;  %v2982_v25 = vld [vmem:[#allocation15 + $0x30] ss:$12 sps:$4 sm:$0xff]  }
 0x7df   :  { %v1430_v12 = vadd.f32 %v1380_v34, %v4208_v19  ;;  %v1384_v15 = vpop.f32.mrb[43].mxu0  ;;  %v2755_v24 = vpop.f32.mrb[35].mxu1  ;;  %v3005_v34 = vld [vmem:[#allocation15 + $0x20] ss:$12 sps:$4 sm:$0xff]   ;;  %v2986_v4 = vld [vmem:[#allocation15 + $0x48] ss:$12 sps:$4 sm:$0xff]  }
 0x7e0   :  { %v1437_v28 = vadd.f32 %v1382_v31, %v4209_v21  ;;  %v3006_v31 = vld [vmem:[#allocation15 + $0x38] ss:$12 sps:$4 sm:$0xff]   ;;  %v3007_v19 = vld [vmem:[#allocation15 + $0x50] ss:$12 sps:$4 sm:$0xff]   ;;  %v3008_v15 = vld [vmem:[#allocation15 + $0x68] ss:$12 sps:$4 sm:$0xff]  }
 0x7e1   :  { %v2401_v56 = vmul.f32 -1.442695, %v1430_v12  ;;  %v2988_v43 = vld [vmem:[#allocation15 + $0x4c] ss:$12 sps:$4 sm:$0xff]   ;;  %v2992_v12 = vld [vmem:[#allocation15 + $0x64] ss:$12 sps:$4 sm:$0xff]  }
 0x7e2   :  { %v2402_v62 = vmul.f32 -1.442695, %v1437_v28  ;;  %v2996_v24 = vld [vmem:[#allocation15 + $0x7c] ss:$12 sps:$4 sm:$0xff]   ;;  %v2994_v21 = vld [vmem:[#allocation15 + $0x78] ss:$12 sps:$4 sm:$0xff]  }
 0x7e3   :  { %3088 = vpow2.f32 %v2401_v56  ;;  %v3009_v28 = vld [vmem:[#allocation15 + $0x80] ss:$12 sps:$4 sm:$0xff]  }
 0x7e4   :  { %3090 = vpow2.f32 %v2402_v62  ;;  %v3000_v56 = vld [vmem:[#allocation15 + $0x94] ss:$12 sps:$4 sm:$0xff]   ;;  %v2998_v62 = vld [vmem:[#allocation15 + $0x90] ss:$12 sps:$4 sm:$0xff]  }
 0x7ed   :  { %v3089_v63 = vpop.eup %3088 }
 0x7ee   :  { %v1434_v38 = vadd.f32 1.0, %v3089_v63  ;;  %v3091_v1 = vpop.eup %3090  ;;  %v3010_v63 = vld [vmem:[#allocation15 + $0x98] ss:$12 sps:$4 sm:$0xff]  }
 0x7ef   :  { %v1441_v10 = vadd.f32 1.0, %v3091_v1  ;;  %v3002_v1 = vld [vmem:[#allocation15 + $0xa8] ss:$12 sps:$4 sm:$0xff]  }
 0x7f0   :  { %3092 = vrcp.f32 %v1434_v38  ;;  %v3004_v38 = vld [vmem:[#allocation15 + $0xac] ss:$12 sps:$4 sm:$0xff]  }
 0x7fa   :  { %v3093_v49 = vpop.eup %3092 }
 0x7fb   :  { %v1444_v52 = vmul.f32 %v3093_v49, %v1421_v57  ;;  %v4107_v57 = vld [vmem:[%s4178_s11] sm:$0xff] }
 0x7fc   :  { %v3011_v49 = vld [vmem:[#allocation15 + $0xb0] ss:$12 sps:$4 sm:$0xff]  }
 0x7fd   :  { %v1445_v18 = vadd.f32 %v1444_v52, %v4210_v14  ;;  %v1852_v52 = vpack.c.bf16 %v4107_v57, %v4107_v57  ;;  %v3012_v14 = vld [vmem:[#allocation16] sm:$0xff]  }
 0x7ff   :  { %3094 = vtanh.f32 %v1445_v18  ;;  %v3013_v18 = vld [vmem:[#allocation16 + $0x8] sm:$0xff]  }
 0x800   :  { %3096 = vrcp.f32 %v1441_v10  ;;  %v3014_v10 = vld [vmem:[#allocation16 + $0x10] sm:$0xff]  }
 0x809   :  { %v3095_v54 = vpop.eup %3094 }
 0x80a   :  { %v1447_v23 = vsub.f32 %v4037_v30, %v3095_v54  ;;  %v3097_v58 = vpop.eup %3096  ;;  %v2993_v30 = vld [vmem:[#allocation13 + $0x98] ss:$12 sps:$4 sm:$0xff]  }
 0x80c   :  { %v1448_v2 = vmul.f32 %v3097_v58, %v1447_v23  ;;  %v3016_v23 = vld [vmem:[#allocation16 + $0x20] sm:$0xff]   ;;  %v3017_v58 = vld [vmem:[#allocation16 + $0x28] sm:$0xff]  }
 0x80e   :  { %v4077_v39 = vadd.f32 %v3095_v54, %v1448_v2  ;;  %v3015_v54 = vld [vmem:[#allocation16 + $0x18] sm:$0xff]   ;;  %v3018_v2 = vld [vmem:[#allocation16 + $0x30] sm:$0xff]  }
 0x810   :  { %v1450_v50 = vpack.c.bf16 %v4077_v39, %v4077_v39 }
 0x812   :  { %1484 = vmatmul.mubr.bf16.vlgmr.msra.gmra.mrb[44].mxu0 %v1450_v50  ;;  %2773 = vmatmul.mubr.bf16.vlgmr.msra.gmra.mrb[36].mxu1 %v1450_v50  ;;  %v3021_v50 = vld [vmem:[#allocation16 + $0x48] sm:$0xff]  }
 0x813   :  { %1772 = vmatpush1.bf16.msra.mxu0 %v2948_v40  ;;  %2777 = vmatpush3.bf16.msra.mxu1 %v2969_v41  ;;  %v3019_v40 = vld [vmem:[#allocation16 + $0x38] sm:$0xff]   ;;  %v3020_v41 = vld [vmem:[#allocation16 + $0x40] sm:$0xff]  }
 0x814   :  { %1773 = vmatprep.subr.bf16.mxu0 %v2953_v42  ;;  %2778 = vmatprep.subr.bf16.mxu1 %v4202_v7  ;;  %v3022_v42 = vld [vmem:[#allocation16 + $0x50] sm:$0xff]  }
 0x815   :  { %1803 = vmatprep.mubr.bf16.mxu0 %v4203_v17  ;;  %2792 = vmatprep.mubr.msk.bf16.mxu1 %vm3366_vm0, %v4202_v7 }
 0x817   :  { %1774 = vmatpush1.bf16.msra.mxu0 %v2951_v55  ;;  %2779 = vmatpush3.bf16.msra.mxu1 %v2973_v44  ;;  %v3023_v55 = vld [vmem:[#allocation16 + $0x58] sm:$0xff]   ;;  %v3024_v44 = vld [vmem:[#allocation16 + $0x60] sm:$0xff]  }
 0x818   :  { %1775 = vmatprep.subr.bf16.mxu0 %v2956_v37  ;;  %2780 = vmatprep.subr.bf16.mxu1 %v4202_v7  ;;  %v3025_v37 = vld [vmem:[#allocation16 + $0x68] sm:$0xff]  }
 0x81b   :  { %1776 = vmatpush1.bf16.msra.mxu0 %v2954_v45  ;;  %2781 = vmatpush3.bf16.msra.mxu1 %v2977_v46  ;;  %v3026_v45 = vld [vmem:[#allocation16 + $0x70] sm:$0xff]   ;;  %v3027_v46 = vld [vmem:[#allocation16 + $0x78] sm:$0xff]  }
 0x81c   :  { %1777 = vmatprep.subr.bf16.mxu0 %v2959_v47  ;;  %2782 = vmatprep.subr.bf16.mxu1 %v4202_v7 }
 0x81f   :  { %1778 = vmatpush1.bf16.msra.mxu0 %v2957_v48  ;;  %2783 = vmatpush3.bf16.msra.mxu1 %v2981_v9 }
 0x820   :  { %1779 = vmatprep.subr.bf16.mxu0 %v2962_v11  ;;  %2784 = vmatprep.subr.bf16.mxu1 %v4202_v7 }
 0x823   :  { %1780 = vmatpush1.bf16.msra.mxu0 %v2960_v51  ;;  %2785 = vmatpush3.bf16.msra.mxu1 %v2985_v35 }
 0x824   :  { %1781 = vmatprep.subr.bf16.mxu0 %v2965_v59  ;;  %2786 = vmatprep.subr.bf16.mxu1 %v4202_v7 }
 0x827   :  { %1782 = vmatpush1.bf16.msra.mxu0 %v2963_v22  ;;  %2787 = vmatpush3.bf16.msra.mxu1 %v2989_v26  ;;  %v4211_v26 = vld [vmem:[#allocation35_spill] sm:$0xff] }
 0x828   :  { %1783 = vmatprep.subr.bf16.mxu0 %v2968_v27  ;;  %2788 = vmatprep.subr.bf16.mxu1 %v4202_v7 }
 0x82b   :  { %1784 = vmatpush1.bf16.msra.mxu0 %v2966_v29  ;;  %2789 = vmatpush3.bf16.msra.mxu1 %v2993_v30 }
 0x82c   :  { %1785 = vmatprep.subr.bf16.mxu0 %v2972_v32  ;;  %2790 = vmatprep.subr.bf16.mxu1 %v4202_v7  ;;  %v4212_v32 = vld [vmem:[#allocation36_spill] sm:$0xff] }
 0x82f   :  { %1786 = vmatpush1.bf16.msra.mxu0 %v2970_v53  ;;  %2791 = vmatpush3.bf16.msra.mxu1 %v2997_v20 }
 0x830   :  { %1998 = vmatprep.subr.bf16.mxu0 %v2976_v60  ;;  %2796 = vmatprep.subr.bf16.mxu1 %v4202_v7 }
 0x832   :  { %1804 = vmatmul.mubr.bf16.vlgmr.msra.gmra.mrb[48].mxu0 %v1593_v36  ;;  %2793 = vmatmul.mubr.bf16.vlgmr.msra.gmra.mrb[40].mxu1 %v1593_v36 }
 0x833   :  { %1999 = vmatpush1.bf16.msra.mxu0 %v2974_v13  ;;  %2797 = vmatpush3.bf16.msra.mxu1 %v3001_v3 }
 0x834   :  { %2000 = vmatprep.subr.bf16.mxu0 %v2980_v6  ;;  %2798 = vmatprep.subr.bf16.mxu1 %v4202_v7 }
 0x835   :  { %2030 = vmatprep.mubr.bf16.mxu0 %v4203_v17  ;;  %2812 = vmatprep.mubr.msk.bf16.mxu1 %vm3366_vm0, %v4202_v7  ;;  %v2990_v17 = vld [vmem:[#allocation15 + $0x60] ss:$12 sps:$4 sm:$0xff]  }
 0x837   :  { %2001 = vmatpush1.bf16.msra.mxu0 %v2978_v33  ;;  %2799 = vmatpush3.bf16.msra.mxu1 %v3005_v34  ;;  %v4213_v33 = vld [vmem:[#allocation31_spill] sm:$0xff] }
 0x838   :  { %2002 = vmatprep.subr.bf16.mxu0 %v2984_v16  ;;  %2800 = vmatprep.subr.bf16.mxu1 %v4202_v7 }
 0x83b   :  { %2003 = vmatpush1.bf16.msra.mxu0 %v2982_v25  ;;  %2801 = vmatpush3.bf16.msra.mxu1 %v3006_v31 }
 0x83c   :  { %2004 = vmatprep.subr.bf16.mxu0 %v2988_v43  ;;  %2802 = vmatprep.subr.bf16.mxu1 %v4202_v7 }
 0x83f   :  { %2005 = vmatpush1.bf16.msra.mxu0 %v2986_v4  ;;  %2803 = vmatpush3.bf16.msra.mxu1 %v3007_v19 }
 0x840   :  { %2006 = vmatprep.subr.bf16.mxu0 %v2992_v12  ;;  %2804 = vmatprep.subr.bf16.mxu1 %v4202_v7 }
 0x843   :  { %2007 = vmatpush1.bf16.msra.mxu0 %v2990_v17  ;;  %2805 = vmatpush3.bf16.msra.mxu1 %v3008_v15 }
 0x844   :  { %2008 = vmatprep.subr.bf16.mxu0 %v2996_v24  ;;  %2806 = vmatprep.subr.bf16.mxu1 %v4202_v7 }
 0x847   :  { %2009 = vmatpush1.bf16.msra.mxu0 %v2994_v21  ;;  %2807 = vmatpush3.bf16.msra.mxu1 %v3009_v28  ;;  %v1626_v21 = vld [vmem:[%s4175_s8] sm:$0x7]  ;;  %v4214_v28 = vld [vmem:[#allocation25_spill] sm:$0xff] }
 0x848   :  { %2010 = vmatprep.subr.bf16.mxu0 %v3000_v56  ;;  %2808 = vmatprep.subr.bf16.mxu1 %v4202_v7  ;;  %v1631_v56 = vrot.slane %v1626_v21, %v4214_v28 }
 0x84b   :  { %2011 = vmatpush1.bf16.msra.mxu0 %v2998_v62  ;;  %2809 = vmatpush3.bf16.msra.mxu1 %v3010_v63 }
 0x84c   :  { %2012 = vmatprep.subr.bf16.mxu0 %v3004_v38  ;;  %2810 = vmatprep.subr.bf16.mxu1 %v4202_v7 }
 0x84f   :  { %2013 = vmatpush1.bf16.msra.mxu0 %v3002_v1  ;;  %2811 = vmatpush3.bf16.msra.mxu1 %v3011_v49  ;;  %v4215_v49 = vld [vmem:[#allocation26_spill] sm:$0xff] }
 0x850   :  { %2836 = vmatprep.subr.bf16.mxu1 %v4202_v7  ;;  %2816 = vmatprep.subr.bf16.mxu0 %v4202_v7 }
 0x852   :  { %2031 = vmatmul.mubr.bf16.vlgmr.msra.gmra.mrb[48].mxu0 %v1852_v52  ;;  %2813 = vmatmul.mubr.bf16.vlgmr.msra.gmra.mrb[44].mxu1 %v1852_v52  ;;  %v1635_v52 = vrot.slane %v1626_v21, %v4215_v49 }
 0x853   :  { %2852 = vmatprep.mubr.msk.bf16.mxu1 %vm3366_vm0, %v4202_v7  ;;  %2832 = vmatprep.mubr.msk.bf16.mxu0 %vm3366_vm0, %v4202_v7 }
 0x854   :  { %2837 = vmatpush3.bf16.msra.mxu1 %v3012_v14  ;;  %2817 = vmatpush3.bf16.msra.mxu0 %v3020_v41 }
 0x855   :  { %2838 = vmatprep.subr.bf16.mxu1 %v4202_v7  ;;  %2818 = vmatprep.subr.bf16.mxu0 %v4202_v7 }
 0x858   :  { %2839 = vmatpush3.bf16.msra.mxu1 %v3013_v18  ;;  %2819 = vmatpush3.bf16.msra.mxu0 %v3021_v50 }
 0x859   :  { %2840 = vmatprep.subr.bf16.mxu1 %v4202_v7  ;;  %2820 = vmatprep.subr.bf16.mxu0 %v4202_v7 }
 0x85c   :  { %2841 = vmatpush3.bf16.msra.mxu1 %v3014_v10  ;;  %2821 = vmatpush3.bf16.msra.mxu0 %v3022_v42 }
 0x85d   :  { %2842 = vmatprep.subr.bf16.mxu1 %v4202_v7  ;;  %2822 = vmatprep.subr.bf16.mxu0 %v4202_v7 }
 0x860   :  { %2843 = vmatpush3.bf16.msra.mxu1 %v3015_v54  ;;  %2823 = vmatpush3.bf16.msra.mxu0 %v3023_v55 }
 0x861   :  { %2844 = vmatprep.subr.bf16.mxu1 %v4202_v7  ;;  %2824 = vmatprep.subr.bf16.mxu0 %v4202_v7 }
 0x864   :  { %2845 = vmatpush3.bf16.msra.mxu1 %v3016_v23  ;;  %2825 = vmatpush3.bf16.msra.mxu0 %v3024_v44 }
 0x865   :  { %2846 = vmatprep.subr.bf16.mxu1 %v4202_v7  ;;  %2826 = vmatprep.subr.bf16.mxu0 %v4202_v7 }
 0x868   :  { %2847 = vmatpush3.bf16.msra.mxu1 %v3017_v58  ;;  %2827 = vmatpush3.bf16.msra.mxu0 %v3025_v37 }
 0x869   :  { %2848 = vmatprep.subr.bf16.mxu1 %v4202_v7  ;;  %2828 = vmatprep.subr.bf16.mxu0 %v4202_v7 }
 0x86c   :  { %2849 = vmatpush3.bf16.msra.mxu1 %v3018_v2  ;;  %2829 = vmatpush3.bf16.msra.mxu0 %v3026_v45  ;;  %v1639_v45 = vrot.slane %v1626_v21, %v3703_v5 }
 0x86d   :  { %2850 = vmatprep.subr.bf16.mxu1 %v4202_v7  ;;  %2830 = vmatprep.subr.bf16.mxu0 %v4202_v7 }
 0x870   :  { %2851 = vmatpush3.bf16.msra.mxu1 %v3019_v40  ;;  %2831 = vmatpush3.bf16.msra.mxu0 %v3027_v46 }
 0x8e5   :  { %v1485_v47 = vpop.f32.mrb[44].mxu0  ;;  %v1526_v48 = vpop.f32.mrb[36].mxu1 }
 0x8e6   :  { %v1486_v9 = vadd.f32 %v1485_v47, %v3756_v8  ;;  %v1487_v11 = vpop.f32.mrb[45].mxu0  ;;  %v2774_v51 = vpop.f32.mrb[37].mxu1  ;;  %v1527_v36 = vadd.f32 %v1526_v48, %v3764_v61  ;;  %v1853_v61 = vld [vmem:[%s4177_s10] sm:$0x7] }
 0x8e7   :  { %v1488_v35 = vadd.f32 %v1487_v11, %v3759_v0  ;;  %v1489_v59 = vpop.f32.mrb[46].mxu0  ;;  %v1529_v22 = vpop.f32.mrb[38].mxu1  ;;  %v1858_v62 = vrot.slane %v1853_v61, %v4214_v28  ;;  %v1862_v14 = vrot.slane %v1853_v61, %v4215_v49  ;;  %v1866_v37 = vrot.slane %v1853_v61, %v3703_v5 }
 0x8e8   :  { %v1536_v27 = vadd.f32 %v1486_v9, %v4211_v26  ;;  %v1490_v29 = vpop.f32.mrb[47].mxu0  ;;  %v2775_v30 = vpop.f32.mrb[39].mxu1 }
 0x8e9   :  { %v1543_v53 = vadd.f32 %v1488_v35, %v4212_v32  ;;  %v2856_v63 = vadd.f32 %v1858_v62, %v1631_v56  ;;  %v2858_v41 = vadd.f32 %v1862_v14, %v1635_v52 }
 0x8ea   :  { %v2403_v20 = vmul.f32 -1.442695, %v1536_v27 }
 0x8eb   :  { %v2404_v7 = vmul.f32 -1.442695, %v1543_v53 }
 0x8ec   :  { %3098 = vpow2.f32 %v2403_v20 }
 0x8ed   :  { %3100 = vpow2.f32 %v2404_v7 }
 0x8f6   :  { %v3099_v60 = vpop.eup %3098 }
 0x8f7   :  { %v1540_v13 = vadd.f32 1.0, %v3099_v60  ;;  %v3101_v8 = vpop.eup %3100  ;;  %v2471_v60 = vld [vmem:[%s4180_s13] ss:$0 sm:$0xff] }
 0x8f8   :  { %v1547_v16 = vadd.f32 1.0, %v3101_v8 }
 0x8f9   :  { %3102 = vrcp.f32 %v1540_v13 }
 0x903   :  { %v3103_v3 = vpop.eup %3102 }
 0x904   :  { %v1550_v0 = vmul.f32 %v3103_v3, %v1527_v36 }
 0x905   :  { %v1846_v6 = vpop.f32.mrb[40].mxu1 }
 0x906   :  { %v1551_v34 = vadd.f32 %v1550_v0, %v4213_v33  ;;  %v2794_v25 = vpop.f32.mrb[41].mxu1  ;;  %v1847_v9 = vadd.f32 %v1846_v6, %v1639_v45 }
 0x907   :  { %v1849_v31 = vpop.f32.mrb[42].mxu1 }
 0x908   :  { %3104 = vtanh.f32 %v1551_v34  ;;  %v2795_v43 = vpop.f32.mrb[43].mxu1 }
 0x909   :  { %3106 = vrcp.f32 %v1547_v16 }
 0x912   :  { %v3105_v4 = vpop.eup %3104 }
 0x913   :  { %v1553_v19 = vsub.f32 %v4077_v39, %v3105_v4  ;;  %v3107_v12 = vpop.eup %3106 }
 0x915   :  { %v1554_v17 = vmul.f32 %v3107_v12, %v1553_v19 }
 0x917   :  { %v1555_v15 = vadd.f32 %v3105_v4, %v1554_v17 }
 0x919   :  { %v2131_v24 = vpack.c.bf16 %v1555_v15, %v1555_v15 }
 0x91b   :  { %2853 = vmatmul.mubr.bf16.vlgmr.msra.gmra.mrb[48].mxu1 %v2131_v24 }
 0x925   :  { %v2032_v38 = vpop.f32.mrb[48].mxu0  ;;  %v2073_v39 = vpop.f32.mrb[44].mxu1 }
 0x926   :  { %v2857_v1 = vadd.f32 %v2856_v63, %v2032_v38  ;;  %v2034_v18 = vpop.f32.mrb[49].mxu0  ;;  %v2814_v10 = vpop.f32.mrb[45].mxu1  ;;  %v2074_v46 = vadd.f32 %v2073_v39, %v1866_v37 }
 0x927   :  { %v2036_v54 = vpop.f32.mrb[50].mxu0  ;;  %v2076_v23 = vpop.f32.mrb[46].mxu1  ;;  %v2859_v50 = vadd.f32 %v2858_v41, %v2034_v18 }
 0x928   :  { %v2453_v58 = vmul.f32 -1.442695, %v2857_v1  ;;  %v2037_v2 = vpop.f32.mrb[51].mxu0  ;;  %v2815_v40 = vpop.f32.mrb[47].mxu1 }
 0x929   :  { %v2454_v42 = vmul.f32 -1.442695, %v2859_v50 }
 0x92a   :  { %3108 = vpow2.f32 %v2453_v58 }
 0x92b   :  { %3110 = vpow2.f32 %v2454_v42 }
 0x934   :  { %v3109_v55 = vpop.eup %3108 }
 0x935   :  { %v2083_v44 = vadd.f32 1.0, %v3109_v55  ;;  %v3111_v47 = vpop.eup %3110 }
 0x936   :  { %v2090_v51 = vadd.f32 1.0, %v3111_v47 }
 0x937   :  { %3112 = vrcp.f32 %v2083_v44 }
 0x941   :  { %v3113_v48 = vpop.eup %3112 }
 0x942   :  { %v2093_v11 = vmul.f32 %v3113_v48, %v2074_v46 }
 0x944   :  { %v2094_v35 = vadd.f32 %v2093_v11, %v1847_v9 }
 0x946   :  { %3114 = vtanh.f32 %v2094_v35 }
 0x947   :  { %3116 = vrcp.f32 %v2090_v51 }
 0x950   :  { %v3115_v59 = vpop.eup %3114 }
 0x951   :  { %v2096_v22 = vsub.f32 %v4107_v57, %v3115_v59  ;;  %v3117_v26 = vpop.eup %3116 }
 0x953   :  { %v2097_v27 = vmul.f32 %v3117_v26, %v2096_v22 }
 0x955   :  { %v2098_v29 = vadd.f32 %v3115_v59, %v2097_v27 }
 0x957   :  { %v2132_v30 = vpack.c.bf16 %v2098_v29, %v2098_v29 }
 0x959   :  { %2833 = vmatmul.mubr.bf16.vlgmr.msra.gmra.mrb[52].mxu0 %v2132_v30 }
 0x9ee   :  { %v2303_v32 = vpop.f32.mrb[48].mxu1 }
 0x9ef   :  { %v2854_v53 = vpop.f32.mrb[49].mxu1 }
 0x9f0   :  { %v2306_v5 = vpop.f32.mrb[50].mxu1 }
 0x9f1   :  { %v2855_v20 = vpop.f32.mrb[51].mxu1 }
 0xa2c   :  { %v2215_v7 = vpop.f32.mrb[52].mxu0 }
 0xa2d   :  { %v2304_v13 = vadd.f32 %v2303_v32, %v2215_v7  ;;  %v2834_v8 = vpop.f32.mrb[53].mxu0 }
 0xa2e   :  { %v2218_v36 = vpop.f32.mrb[54].mxu0 }
 0xa2f   :  { %v2316_v57 = vadd.f32 %v2471_v60, %v2304_v13  ;;  %v2835_v3 = vpop.f32.mrb[55].mxu0 }
 0xa31   :  { %2317 = vst [vmem:[#allocation18] sm:$0xff] %v2316_v57 }
 0xa32   :  { %3329 = shalt.err (!%p3326_p12)
}
 0xa33   :  { %s3330_s13 = scalar_lea.hbm %s4181_s14, 128 }
 0xa34   :  { %p3331_p13 = scmp.ne.s32.totalorder %s4181_s14, %s3330_s13  ;;  %p3334_p0 = scmp.lt.u32.totalorder %s3330_s13, %s4181_s14 }
 0xa36   :  { %p3336_p1 = pnand %p3334_p0, %p3331_p13 }
 0xa38   :  { %3339 = shalt.err (!%p3336_p1)
}
 0xa39   :  { %2327 = dma.vmem_to_hbm [thread:$0]  %s2325_s1, 128, %s4181_s14, [#allocation6]  }
 0xa3a   :  { %3350 = dma.done.wait [#allocation6], 128  }
 0xa3b   :  { %3351 = vsyncadd [#allocation6], 4294967168 }
 0xa3c   :  { %2331 = vsyncpa [#allocation5], 1 }
 0xa3d   :  { %2332 = vsyncpa [#allocation8], 1 }
 0xa3e   :  { %2333 = vsyncpa [#allocation11], 1 }
 0xa3f   :  { %2334 = vsyncpa [#allocation14], 1 }
 0xa40   :  { %2335 = vsyncpa [#allocation17], 1 }
 0xa41   :  { %2336 = vsyncpa [#allocation6], 1 }

</bundles_post_ra>
